<compile_context>
chip_gen: v5e
topology: v5e:2x2
jax: 0.10.0
libtpu: 0.0.40
codegen_flags: <defaults>
</compile_context>

<pallas_src>
import functools

import jax
import jax.numpy as jnp
from jax.experimental import pallas as pl
from jax.experimental.pallas import tpu as pltpu


# ---------------------------------------------------------------------------
# helpers
# ---------------------------------------------------------------------------
def _round_up(x, m):
    return (x + m - 1) // m * m


def _pad_axis(x, axis, new_size):
    if x.shape[axis] == new_size:
        return x
    pads = [(0, 0)] * x.ndim
    pads[axis] = (0, new_size - x.shape[axis])
    return jnp.pad(x, pads)


def _pad_gates(w, H, Hp):
    """Pad the trailing 4H gate axis to 4*Hp, padding each gate block separately
    so the i/f/g/o slices stay lane-aligned."""
    lead = w.shape[:-1]
    w4 = w.reshape(*lead, 4, H)
    w4 = _pad_axis(w4, w4.ndim - 1, Hp)
    return w4.reshape(*lead, 4 * Hp)


def _sigmoid(x):
    # sigmoid(x) = 0.5 * tanh(0.5 x) + 0.5 : one EUP op per gate instead of the
    # dependent exp + reciprocal chain (the recurrence is serial-latency bound).
    return 0.5 * jnp.tanh(0.5 * x) + 0.5


def _vmem_capacity():
    try:
        return int(pltpu.get_tpu_info().vmem_capacity_bytes)
    except Exception:
        return 64 * 1024 * 1024          # conservative (v7x per-core) default


def _vmem_need(tc, tb, Ep, Hp, Vp, fuse):
    """Rough per-core VMEM footprint (bytes) of the recurrence kernel.
    Inputs/outputs AND the grid-invariant weights are counted double-buffered
    (conservative; see TODO about pl.Buffered(1) below)."""
    H4 = 4 * Hp
    need = 2 * tc * tb * Ep * 2                        # x chunk (bf16)
    need += 2 * (Ep * H4 * 2 + Hp * H4 * 2 + H4 * 4)   # W_ih, W_hh, b_gates
    need += 2 * 2 * tb * Hp * 4                        # h0, c0
    need += 2 * 2 * tb * Hp * 4                        # hn, cn
    need += tc * tb * H4 * 4                           # gates_x scratch (f32)
    need += tc * tb * Hp * 2                           # hidden slab scratch (bf16)
    if fuse:
        need += 2 * (Hp * Vp * 2 + Vp * 4)             # W_lin, b_lin
        need += 2 * tc * tb * Vp * 4                   # fused logits block (f32)
    else:
        need += 2 * tc * tb * Hp * 2                   # hidden-state out block (bf16)
    return need


# ---------------------------------------------------------------------------
# Kernel 1: LSTM recurrence (time-chunked), fused input projection and
#           (optionally) fused output Linear.
#   grid = (batch_tiles [parallel], time_chunks [arbitrary])
# ---------------------------------------------------------------------------
def _lstm_chunk_kernel(*refs, T, fuse, mask_time):
    if fuse:
        (x_ref, w_ih_ref, w_hh_ref, b_g_ref, w_lin_ref, b_lin_ref,
         h0_ref, c0_ref, out_ref, hn_ref, cn_ref, gx_ref, hs_ref) = refs
    else:
        (x_ref, w_ih_ref, w_hh_ref, b_g_ref,
         h0_ref, c0_ref, out_ref, hn_ref, cn_ref, gx_ref, hs_ref) = refs

    ti = pl.program_id(1)
    Tc, tb, Ep = x_ref.shape
    Hp = hn_ref.shape[-1]

    # (Re)initialize the VMEM-resident carried state at the first time chunk
    # of every batch tile.
    @pl.when(ti == 0)
    def _():
        hn_ref[...] = h0_ref[...]
        cn_ref[...] = c0_ref[...]

    # Fused input projection for the WHOLE chunk: one big MXU matmul
    # (Tc*tb, Ep) x (Ep, 4Hp), bf16 operands, f32 accumulation.
    gx_ref[...] = (
        jnp.dot(x_ref[...].reshape(Tc * tb, Ep), w_ih_ref[...],
                preferred_element_type=jnp.float32)
        + b_g_ref[...]
    ).reshape(Tc, tb, 4 * Hp)

    whh = w_hh_ref[...]                      # (Hp, 4Hp) bf16, loaded once per chunk
    h = hn_ref[...].astype(jnp.bfloat16)     # carried hidden state (bf16)
    c = cn_ref[...]                          # carried cell state (f32)

    # Fully-unrolled sequential recurrence over the (small, static) chunk.
    for s in range(Tc):
        gates = gx_ref[s] + jnp.dot(h, whh, preferred_element_type=jnp.float32)
        i_g = _sigmoid(gates[:, 0 * Hp:1 * Hp])
        f_g = _sigmoid(gates[:, 1 * Hp:2 * Hp])
        g_g = jnp.tanh(gates[:, 2 * Hp:3 * Hp])
        o_g = _sigmoid(gates[:, 3 * Hp:4 * Hp])
        c_new = f_g * c + i_g * g_g
        h_new = o_g * jnp.tanh(c_new)
        if mask_time:                         # freeze the state on padded steps
            keep = (ti * Tc + s) < T
            c_new = jnp.where(keep, c_new, c)
            h_new = jnp.where(keep, h_new, h.astype(jnp.float32))
        h = h_new.astype(jnp.bfloat16)
        c = c_new
        hs_ref[s] = h

    hn_ref[...] = h.astype(jnp.float32)
    cn_ref[...] = c

    if fuse:
        # Fused output head: one (Tc*tb, Hp) x (Hp, Vp) MXU matmul per chunk,
        # written back batch-major so the wrapper never transposes the logits.
        Vp = out_ref.shape[-1]
        y = (jnp.dot(hs_ref[...].reshape(Tc * tb, Hp), w_lin_ref[...],
                     preferred_element_type=jnp.float32)
             + b_lin_ref[...]).reshape(Tc, tb, Vp)
        for s in range(Tc):                   # static (tb, Vp) stores, lane-dense
            out_ref[:, s, :] = y[s]
    else:
        out_ref[...] = hs_ref[...]            # time-major bf16 hidden states


def lstm_pallas(x, w_ih, w_hh, b_g, w_lin, b_lin, h0, c0, *,
                Tc, tb, T, fuse, vmem_limit):
    """x: (Tp, Bp, Ep) bf16; w_ih: (Ep, 4Hp) bf16; w_hh: (Hp, 4Hp) bf16;
    b_g: (1, 4Hp) f32; w_lin: (Hp, Vp) bf16; b_lin: (1, Vp) f32;
    h0/c0: (Bp, Hp) f32."""
    Tp, Bp, Ep = x.shape
    Hp = h0.shape[-1]
    Vp = w_lin.shape[-1]
    H4 = w_hh.shape[-1]
    nb, nt = Bp // tb, Tp // Tc

    # TODO(synk): single-buffer the grid-invariant weight operands with
    # pl.BlockSpec(..., pipeline_mode=pl.Buffered(1)) to reclaim one extra copy
    # of W_ih/W_hh/W_lin from VMEM; they are budgeted at 2x in _vmem_need here.
    in_specs = [
        pl.BlockSpec((Tc, tb, Ep), lambda bi, ti: (ti, bi, 0)),    # x chunk
        pl.BlockSpec((Ep, H4), lambda bi, ti: (0, 0)),             # W_ih (resident)
        pl.BlockSpec((Hp, H4), lambda bi, ti: (0, 0)),             # W_hh (resident)
        pl.BlockSpec((1, H4), lambda bi, ti: (0, 0)),              # b_gates
    ]
    operands = [x, w_ih, w_hh, b_g]
    if fuse:
        in_specs += [
            pl.BlockSpec((Hp, Vp), lambda bi, ti: (0, 0)),         # W_lin (resident)
            pl.BlockSpec((1, Vp), lambda bi, ti: (0, 0)),          # b_lin
        ]
        operands += [w_lin, b_lin]
    in_specs += [
        pl.BlockSpec((tb, Hp), lambda bi, ti: (bi, 0)),            # h0
        pl.BlockSpec((tb, Hp), lambda bi, ti: (bi, 0)),            # c0
    ]
    operands += [h0, c0]

    if fuse:
        main_shape = jax.ShapeDtypeStruct((Bp, Tp, Vp), jnp.float32)
        main_spec = pl.BlockSpec((tb, Tc, Vp), lambda bi, ti: (bi, ti, 0))
    else:
        main_shape = jax.ShapeDtypeStruct((Tp, Bp, Hp), jnp.bfloat16)
        main_spec = pl.BlockSpec((Tc, tb, Hp), lambda bi, ti: (ti, bi, 0))

    out_shapes = (main_shape,
                  jax.ShapeDtypeStruct((Bp, Hp), jnp.float32),      # hn
                  jax.ShapeDtypeStruct((Bp, Hp), jnp.float32))      # cn
    out_specs = [main_spec,
                 pl.BlockSpec((tb, Hp), lambda bi, ti: (bi, 0)),    # hn (carried)
                 pl.BlockSpec((tb, Hp), lambda bi, ti: (bi, 0))]    # cn (carried)

    kernel = functools.partial(_lstm_chunk_kernel, T=T, fuse=fuse,
                               mask_time=(Tp != T))

    return pl.pallas_call(
        kernel,
        out_shape=out_shapes,
        grid_spec=pltpu.PrefetchScalarGridSpec(
            num_scalar_prefetch=0,
            grid=(nb, nt),
            in_specs=in_specs,
            out_specs=out_specs,
            scratch_shapes=[
                pltpu.VMEM((Tc, tb, H4), jnp.float32),     # chunk gates_x
                pltpu.VMEM((Tc, tb, Hp), jnp.bfloat16),    # chunk hidden slab
            ]),
        compiler_params=pltpu.CompilerParams(
            # batch tiles independent (shardable across multi-TC parts);
            # time chunks are the sequential carried axis.
            dimension_semantics=("parallel", "arbitrary"),
            vmem_limit_bytes=vmem_limit),
    )(*operands)


# ---------------------------------------------------------------------------
# Kernel 2: tiled matmul + bias  (only used by the large-vocab fallback path)
#   y = x @ w + b    x:(M,K) bf16, w:(K,N) bf16, b:(1,N) f32 -> y:(M,N) f32
# ---------------------------------------------------------------------------
def _matmul_bias_kernel(x_ref, w_ref, b_ref, o_ref):
    o_ref[...] = (jnp.dot(x_ref[...], w_ref[...],
                          preferred_element_type=jnp.float32)
                  + b_ref[...]).astype(o_ref.dtype)


def matmul_bias_pallas(x, w, b, *, vmem_limit, tm=512, tn=512,
                       out_dtype=jnp.float32):
    M, K = x.shape
    N = w.shape[1]
    tm = min(tm, _round_up(M, 8))
    tn = min(tn, _round_up(N, 128))
    Mp, Np = _round_up(M, tm), _round_up(N, tn)
    x_p = _pad_axis(x, 0, Mp)
    w_p = _pad_axis(w, 1, Np)
    b_p = _pad_axis(b, 1, Np)

    out = pl.pallas_call(
        _matmul_bias_kernel,
        out_shape=jax.ShapeDtypeStruct((Mp, Np), out_dtype),
        grid_spec=pltpu.PrefetchScalarGridSpec(
            num_scalar_prefetch=0,
            grid=(Mp // tm, Np // tn),
            in_specs=[
                pl.BlockSpec((tm, K), lambda i, j: (i, 0)),
                pl.BlockSpec((K, tn), lambda i, j: (0, j)),
                pl.BlockSpec((1, tn), lambda i, j: (0, j)),
            ],
            out_specs=pl.BlockSpec((tm, tn), lambda i, j: (i, j)),
        ),
        compiler_params=pltpu.CompilerParams(
            dimension_semantics=("parallel", "parallel"),
            vmem_limit_bytes=vmem_limit),
    )(x_p, w_p, b_p)
    return out[:M, :N]


# ---------------------------------------------------------------------------
# Full model forward (mirrors LSTM.forward of the PyTorch module)
# ---------------------------------------------------------------------------
@functools.partial(jax.jit, static_argnames=("force_unfused", "time_chunk_cap"))
def lstm_model_forward(params, x_tokens, h, c, force_unfused=False,
                       time_chunk_cap=32):
    """x_tokens: (B, T) int32; h, c: (1, B, H) or None.
    Returns (linoutput (B, T, vocab), (hn, cn)) like the PyTorch module."""
    B, T = x_tokens.shape
    E = params["emb"].shape[1]
    H = params["w_hh_t"].shape[0]
    V = params["w_lin_t"].shape[1]

    # Hardware-aligned padded sizes (16 sublanes covers both f32 and bf16 tiles).
    Hp = _round_up(H, 128)
    Vp = _round_up(V, 128)
    Ep = _round_up(E, 128)
    Bp = _round_up(B, 16)
    # Single batch tile unless the batch is large enough that every tile still
    # feeds the MXU with >= 256 rows (tiny tiles only serialize the grid on
    # single-TensorCore v5e/v6e and starve the MXU).
    if Bp >= 512:
        tb = 256
        Bp = _round_up(Bp, tb)
    else:
        tb = Bp

    # VMEM-aware tiling / fusion decisions (64 MiB per core on v7x, 128 MiB on
    # v5e/v6e); leave headroom for compiler temporaries.
    vmem_cap = _vmem_capacity()
    vmem_budget = int(vmem_cap * 0.70)
    vmem_limit = int(vmem_cap * 0.85)
    fuse = (not force_unfused) and (
        _vmem_need(min(T, 8), tb, Ep, Hp, Vp, True) <= vmem_budget)

    def fits(tc):
        return _vmem_need(tc, tb, Ep, Hp, Vp, fuse) <= vmem_budget

    cap = max(8, min(int(time_chunk_cap), 64))
    if T <= cap and fits(T):
        Tc, Tp = T, T                         # single chunk, no time padding
    else:
        Tc = max(8, (min(cap, T) // 8) * 8)   # multiple of 8 (aligned out blocks)
        while Tc > 8 and not fits(Tc):
            Tc -= 8
        Tp = _round_up(T, Tc)

    # ---- glue: embedding gather (transpose the tiny int32 index matrix, not
    #      the gathered activations), padded + bf16 --------------------------
    emb_p = _pad_axis(params["emb"], 1, Ep).astype(jnp.bfloat16)
    x_tbe = jnp.take(emb_p, x_tokens.T, axis=0)                 # (T, B, Ep) bf16
    x_tbe = _pad_axis(_pad_axis(x_tbe, 1, Bp), 0, Tp)           # (Tp, Bp, Ep)

    # ---- weights: per-gate lane padding, bf16 operands for the MXU ----------
    w_ih = _pad_axis(_pad_gates(params["w_ih_t"], H, Hp), 0, Ep).astype(jnp.bfloat16)
    w_hh = _pad_axis(_pad_gates(params["w_hh_t"], H, Hp), 0, Hp).astype(jnp.bfloat16)
    b_g = _pad_gates(params["b_gates"], H, Hp)                              # f32
    w_lin = _pad_axis(_pad_axis(params["w_lin_t"], 1, Vp), 0, Hp).astype(jnp.bfloat16)
    b_lin = _pad_axis(params["b_lin"], 1, Vp)                               # f32

    if h is None:
        h0 = jnp.zeros((Bp, Hp), jnp.float32)
        c0 = jnp.zeros((Bp, Hp), jnp.float32)
    else:
        h0 = _pad_axis(_pad_axis(h[0], 0, Bp), 1, Hp)
        c0 = _pad_axis(_pad_axis(c[0], 0, Bp), 1, Hp)

    main, hn, cn = lstm_pallas(x_tbe, w_ih, w_hh, b_g, w_lin, b_lin, h0, c0,
                               Tc=Tc, tb=tb, T=T, fuse=fuse,
                               vmem_limit=vmem_limit)

    if fuse:
        linoutput = main[:B, :T, :V]          # already batch-major, no transpose
    else:
        # Large-vocab fallback: time-major bf16 hidden states + separate tiled
        # matmul (transpose the cheap Hp-wide hidden tensor, not the logits).
        hid = jnp.transpose(main, (1, 0, 2)).reshape(Bp * Tp, Hp)
        logits = matmul_bias_pallas(hid, w_lin, b_lin, vmem_limit=vmem_limit)
        linoutput = logits.reshape(Bp, Tp, Vp)[:B, :T, :V]

    hn = hn[:B, :H][None]                     # (1, B, H)
    cn = cn[:B, :H][None]
    return linoutput, (hn, cn)


# ---------------------------------------------------------------------------
# Pure-JAX reference (sanity check)
# ---------------------------------------------------------------------------
def reference_forward(params, x_tokens, h, c):
    B, T = x_tokens.shape
    H = params["w_hh_t"].shape[0]
    emb = jnp.take(params["emb"], x_tokens, axis=0)              # (B, T, E)
    if h is None:
        h = jnp.zeros((1, B, H), jnp.float32)
        c = jnp.zeros((1, B, H), jnp.float32)

    def step(carry, x_t):
        h_p, c_p = carry
        gates = x_t @ params["w_ih_t"] + h_p @ params["w_hh_t"] + params["b_gates"]
        i_g = jax.nn.sigmoid(gates[:, 0 * H:1 * H])
        f_g = jax.nn.sigmoid(gates[:, 1 * H:2 * H])
        g_g = jnp.tanh(gates[:, 2 * H:3 * H])
        o_g = jax.nn.sigmoid(gates[:, 3 * H:4 * H])
        c_n = f_g * c_p + i_g * g_g
        h_n = o_g * jnp.tanh(c_n)
        return (h_n, c_n), h_n

    (hn, cn), outs = jax.lax.scan(step, (h[0], c[0]),
                                  jnp.transpose(emb, (1, 0, 2)))
    lin = jnp.transpose(outs, (1, 0, 2)) @ params["w_lin_t"] + params["b_lin"]
    return lin, (hn[None], cn[None])


# ---------------------------------------------------------------------------
# Deterministic parameter init + smoke test
# ---------------------------------------------------------------------------
def init_params(key, vocab_size, emb_dim, hidden_dim, vocab):
    ks = jax.random.split(key, 6)
    scale = 0.1
    emb = scale * jax.random.normal(ks[0], (vocab_size, emb_dim), jnp.float32)
    w_ih = scale * jax.random.normal(ks[1], (4 * hidden_dim, emb_dim), jnp.float32)
    w_hh = scale * jax.random.normal(ks[2], (4 * hidden_dim, hidden_dim), jnp.float32)
    b_ih = scale * jax.random.normal(ks[3], (4 * hidden_dim,), jnp.float32)
    b_hh = scale * jax.random.normal(ks[4], (4 * hidden_dim,), jnp.float32)
    w_lin = scale * jax.random.normal(ks[5], (vocab, hidden_dim), jnp.float32)
    b_lin = jnp.zeros((vocab,), jnp.float32)
    return {
        "emb": emb,
        "w_ih_t": w_ih.T,                               # (E, 4H)
        "w_hh_t": w_hh.T,                               # (H, 4H)
        "b_gates": (b_ih + b_hh)[None, :],              # (1, 4H)
        "w_lin_t": w_lin.T,                             # (H, vocab)
        "b_lin": b_lin[None, :],                        # (1, vocab)
    }


if __name__ == "__main__":
    vocab_size = 100   # embedding table rows
    emb_dim = 32
    hidden_dim = 32
    vocab = 64         # output vocabulary of the Linear head
    B, T = 2, 8

    key = jax.random.PRNGKey(0)
    pkey, xkey, hkey, ckey, x2key = jax.random.split(key, 5)
    params = init_params(pkey, vocab_size, emb_dim, hidden_dim, vocab)
    x_tokens = jax.random.randint(xkey, (B, T), 0, vocab_size, dtype=jnp.int32)

    # Path 1: h=None / c=None (zero initial state), fused output head.
    linoutput, (hn, cn) = lstm_model_forward(params, x_tokens, None, None)
    jax.block_until_ready((linoutput, hn, cn))

    ref_lin, (ref_hn, ref_cn) = reference_forward(params, x_tokens, None, None)
    assert linoutput.shape == (B, T, vocab)
    assert hn.shape == (1, B, hidden_dim) and cn.shape == (1, B, hidden_dim)
    # bf16 MXU operands vs f32 reference -> loose-but-meaningful tolerance.
    assert jnp.allclose(linoutput, ref_lin, atol=2e-2, rtol=2e-2)
    assert jnp.allclose(hn, ref_hn, atol=2e-2, rtol=2e-2)
    assert jnp.allclose(cn, ref_cn, atol=2e-2, rtol=2e-2)

    # Path 2: explicit initial state.
    h_in = 0.1 * jax.random.normal(hkey, (1, B, hidden_dim), jnp.float32)
    c_in = 0.1 * jax.random.normal(ckey, (1, B, hidden_dim), jnp.float32)
    lin2, (hn2, cn2) = lstm_model_forward(params, x_tokens, h_in, c_in)
    jax.block_until_ready((lin2, hn2, cn2))
    ref2, (rhn2, rcn2) = reference_forward(params, x_tokens, h_in, c_in)
    assert jnp.allclose(lin2, ref2, atol=2e-2, rtol=2e-2)
    assert jnp.allclose(hn2, rhn2, atol=2e-2, rtol=2e-2)
    assert jnp.allclose(cn2, rcn2, atol=2e-2, rtol=2e-2)

    # Path 3: exercise the large-vocab fallback (un-fused head) and the
    # padded/masked time-chunk path (T=11 with an 8-step chunk cap).
    x_tokens3 = jax.random.randint(x2key, (B, 11), 0, vocab_size, dtype=jnp.int32)
    lin3, (hn3, cn3) = lstm_model_forward(params, x_tokens3, None, None,
                                          force_unfused=True, time_chunk_cap=8)
    jax.block_until_ready((lin3, hn3, cn3))
    ref3, (rhn3, rcn3) = reference_forward(params, x_tokens3, None, None)
    assert lin3.shape == (B, 11, vocab)
    assert jnp.allclose(lin3, ref3, atol=2e-2, rtol=2e-2)
    assert jnp.allclose(hn3, rhn3, atol=2e-2, rtol=2e-2)
    assert jnp.allclose(cn3, rcn3, atol=2e-2, rtol=2e-2)

    print("KERNEL_OK")
</pallas_src>

<mosaic_0001>
module attributes {stable_mosaic.version = 11 : i64} {
  func.func @_lstm_chunk_kernel(%arg0: i32, %arg1: i32, %arg2: memref<8x16x128xbf16, #tpu.memory_space<vmem>>, %arg3: memref<128x512xbf16, #tpu.memory_space<vmem>>, %arg4: memref<128x512xbf16, #tpu.memory_space<vmem>>, %arg5: memref<1x512xf32, #tpu.memory_space<vmem>>, %arg6: memref<128x128xbf16, #tpu.memory_space<vmem>>, %arg7: memref<1x128xf32, #tpu.memory_space<vmem>>, %arg8: memref<16x128xf32, #tpu.memory_space<vmem>>, %arg9: memref<16x128xf32, #tpu.memory_space<vmem>>, %arg10: memref<16x8x128xf32, #tpu.memory_space<vmem>>, %arg11: memref<16x128xf32, #tpu.memory_space<vmem>>, %arg12: memref<16x128xf32, #tpu.memory_space<vmem>>, %arg13: memref<8x16x512xf32, #tpu.memory_space<vmem>>, %arg14: memref<8x16x128xbf16, #tpu.memory_space<vmem>>) attributes {dimension_semantics = [#tpu.dimension_semantics<parallel>, #tpu.dimension_semantics<arbitrary>], iteration_bounds = array<i64: 1, 1>, scalar_prefetch = 0 : i64, scratch_operands = 2 : i64, tpu.core_type = #tpu.core_type<tc>, window_params = [{transform_indices = @transform_0, window_bounds = array<i64: 8, 16, 128>}, {pipeline_mode = #tpu.pipeline_mode<synchronous>, transform_indices = @transform_1, window_bounds = array<i64: 128, 512>}, {pipeline_mode = #tpu.pipeline_mode<synchronous>, transform_indices = @transform_2, window_bounds = array<i64: 128, 512>}, {pipeline_mode = #tpu.pipeline_mode<synchronous>, transform_indices = @transform_3, window_bounds = array<i64: 1, 512>}, {pipeline_mode = #tpu.pipeline_mode<synchronous>, transform_indices = @transform_4, window_bounds = array<i64: 128, 128>}, {pipeline_mode = #tpu.pipeline_mode<synchronous>, transform_indices = @transform_5, window_bounds = array<i64: 1, 128>}, {transform_indices = @transform_6, window_bounds = array<i64: 16, 128>}, {transform_indices = @transform_7, window_bounds = array<i64: 16, 128>}, {transform_indices = @transform_8, window_bounds = array<i64: 16, 8, 128>}, {transform_indices = @transform_9, window_bounds = array<i64: 16, 128>}, {transform_indices = @transform_10, window_bounds = array<i64: 16, 128>}]} {
    %c0_i32 = arith.constant 0 : i32
    %0 = arith.cmpi eq, %arg1, %c0_i32 : i32
    %1 = arith.extui %0 : i1 to i32
    %c0_i32_0 = arith.constant 0 : i32
    %2 = arith.cmpi ne, %1, %c0_i32_0 : i32
    scf.if %2 {
      %c0_173 = arith.constant 0 : index
      %c0_174 = arith.constant 0 : index
      %379 = vector.load %arg8[%c0_173, %c0_174] : memref<16x128xf32, #tpu.memory_space<vmem>>, vector<16x128xf32>
      %c0_175 = arith.constant 0 : index
      %c0_176 = arith.constant 0 : index
      %380 = vector.load %arg11[%c0_175, %c0_176] : memref<16x128xf32, #tpu.memory_space<vmem>>, vector<16x128xf32>
      tpu.vector_store %arg11[%c0_175, %c0_176], %379 {strides = array<i32>} : memref<16x128xf32, #tpu.memory_space<vmem>>, vector<16x128xf32>,
      %c0_177 = arith.constant 0 : index
      %c0_178 = arith.constant 0 : index
      %381 = vector.load %arg9[%c0_177, %c0_178] : memref<16x128xf32, #tpu.memory_space<vmem>>, vector<16x128xf32>
      %c0_179 = arith.constant 0 : index
      %c0_180 = arith.constant 0 : index
      %382 = vector.load %arg12[%c0_179, %c0_180] : memref<16x128xf32, #tpu.memory_space<vmem>>, vector<16x128xf32>
      tpu.vector_store %arg12[%c0_179, %c0_180], %381 {strides = array<i32>} : memref<16x128xf32, #tpu.memory_space<vmem>>, vector<16x128xf32>,
    } else {
    }
    %c0 = arith.constant 0 : index
    %c0_1 = arith.constant 0 : index
    %c0_2 = arith.constant 0 : index
    %3 = vector.load %arg2[%c0, %c0_1, %c0_2] : memref<8x16x128xbf16, #tpu.memory_space<vmem>>, vector<8x16x128xbf16>
    %4 = vector.shape_cast %3 : vector<8x16x128xbf16> to vector<128x128xbf16>
    %c0_3 = arith.constant 0 : index
    %c0_4 = arith.constant 0 : index
    %5 = vector.load %arg3[%c0_3, %c0_4] : memref<128x512xbf16, #tpu.memory_space<vmem>>, vector<128x512xbf16>
    %cst = arith.constant dense<0.000000e+00> : vector<128x512xf32>
    %6 = tpu.matmul %4, %5, %cst {dimension_numbers = #tpu.dot_dimension_numbers<[1], [0], [0], [1], [0, 0, 1, 1], [], []>} : vector<128x128xbf16>, vector<128x512xbf16>, vector<128x512xf32> -> vector<128x512xf32>
    %c0_5 = arith.constant 0 : index
    %c0_6 = arith.constant 0 : index
    %7 = vector.load %arg5[%c0_5, %c0_6] : memref<1x512xf32, #tpu.memory_space<vmem>>, vector<1x512xf32>
    %8 = vector.broadcast %7 : vector<1x512xf32> to vector<128x512xf32>
    %9 = arith.addf %6, %8 : vector<128x512xf32>
    %10 = vector.shape_cast %9 : vector<128x512xf32> to vector<8x16x512xf32>
    %c0_7 = arith.constant 0 : index
    %c0_8 = arith.constant 0 : index
    %c0_9 = arith.constant 0 : index
    %11 = vector.load %arg13[%c0_7, %c0_8, %c0_9] : memref<8x16x512xf32, #tpu.memory_space<vmem>>, vector<8x16x512xf32>
    tpu.vector_store %arg13[%c0_7, %c0_8, %c0_9], %10 {strides = array<i32>} : memref<8x16x512xf32, #tpu.memory_space<vmem>>, vector<8x16x512xf32>,
    %c0_10 = arith.constant 0 : index
    %c0_11 = arith.constant 0 : index
    %12 = vector.load %arg4[%c0_10, %c0_11] : memref<128x512xbf16, #tpu.memory_space<vmem>>, vector<128x512xbf16>
    %c0_12 = arith.constant 0 : index
    %c0_13 = arith.constant 0 : index
    %13 = vector.load %arg11[%c0_12, %c0_13] : memref<16x128xf32, #tpu.memory_space<vmem>>, vector<16x128xf32>
    %14 = arith.truncf %13 : vector<16x128xf32> to vector<16x128xbf16>
    %c0_14 = arith.constant 0 : index
    %c0_15 = arith.constant 0 : index
    %15 = vector.load %arg12[%c0_14, %c0_15] : memref<16x128xf32, #tpu.memory_space<vmem>>, vector<16x128xf32>
    %c0_16 = arith.constant 0 : index
    %c0_17 = arith.constant 0 : index
    %c0_18 = arith.constant 0 : index
    %16 = vector.load %arg13[%c0_16, %c0_17, %c0_18] : memref<8x16x512xf32, #tpu.memory_space<vmem>>, vector<1x16x512xf32>
    %17 = vector.shape_cast %16 : vector<1x16x512xf32> to vector<16x512xf32>
    %cst_19 = arith.constant dense<0.000000e+00> : vector<16x512xf32>
    %18 = tpu.matmul %14, %12, %cst_19 {dimension_numbers = #tpu.dot_dimension_numbers<[1], [0], [0], [1], [0, 0, 1, 1], [], []>} : vector<16x128xbf16>, vector<128x512xbf16>, vector<16x512xf32> -> vector<16x512xf32>
    %19 = arith.addf %17, %18 : vector<16x512xf32>
    %20 = vector.extract_strided_slice %19 {offsets = [0, 0], sizes = [16, 128], strides = [1, 1]} : vector<16x512xf32> to vector<16x128xf32>
    %cst_20 = arith.constant 5.000000e-01 : f32
    %21 = vector.broadcast %cst_20 : f32 to vector<16x128xf32>
    %22 = arith.mulf %21, %20 : vector<16x128xf32>
    %23 = math.tanh %22 : vector<16x128xf32>
    %cst_21 = arith.constant 5.000000e-01 : f32
    %24 = vector.broadcast %cst_21 : f32 to vector<16x128xf32>
    %25 = arith.mulf %24, %23 : vector<16x128xf32>
    %cst_22 = arith.constant 5.000000e-01 : f32
    %26 = vector.broadcast %cst_22 : f32 to vector<16x128xf32>
    %27 = arith.addf %25, %26 : vector<16x128xf32>
    %28 = vector.extract_strided_slice %19 {offsets = [0, 128], sizes = [16, 128], strides = [1, 1]} : vector<16x512xf32> to vector<16x128xf32>
    %cst_23 = arith.constant 5.000000e-01 : f32
    %29 = vector.broadcast %cst_23 : f32 to vector<16x128xf32>
    %30 = arith.mulf %29, %28 : vector<16x128xf32>
    %31 = math.tanh %30 : vector<16x128xf32>
    %cst_24 = arith.constant 5.000000e-01 : f32
    %32 = vector.broadcast %cst_24 : f32 to vector<16x128xf32>
    %33 = arith.mulf %32, %31 : vector<16x128xf32>
    %cst_25 = arith.constant 5.000000e-01 : f32
    %34 = vector.broadcast %cst_25 : f32 to vector<16x128xf32>
    %35 = arith.addf %33, %34 : vector<16x128xf32>
    %36 = vector.extract_strided_slice %19 {offsets = [0, 256], sizes = [16, 128], strides = [1, 1]} : vector<16x512xf32> to vector<16x128xf32>
    %37 = math.tanh %36 : vector<16x128xf32>
    %38 = vector.extract_strided_slice %19 {offsets = [0, 384], sizes = [16, 128], strides = [1, 1]} : vector<16x512xf32> to vector<16x128xf32>
    %cst_26 = arith.constant 5.000000e-01 : f32
    %39 = vector.broadcast %cst_26 : f32 to vector<16x128xf32>
    %40 = arith.mulf %39, %38 : vector<16x128xf32>
    %41 = math.tanh %40 : vector<16x128xf32>
    %cst_27 = arith.constant 5.000000e-01 : f32
    %42 = vector.broadcast %cst_27 : f32 to vector<16x128xf32>
    %43 = arith.mulf %42, %41 : vector<16x128xf32>
    %cst_28 = arith.constant 5.000000e-01 : f32
    %44 = vector.broadcast %cst_28 : f32 to vector<16x128xf32>
    %45 = arith.addf %43, %44 : vector<16x128xf32>
    %46 = arith.mulf %35, %15 : vector<16x128xf32>
    %47 = arith.mulf %27, %37 : vector<16x128xf32>
    %48 = arith.addf %46, %47 : vector<16x128xf32>
    %49 = math.tanh %48 : vector<16x128xf32>
    %50 = arith.mulf %45, %49 : vector<16x128xf32>
    %51 = arith.truncf %50 : vector<16x128xf32> to vector<16x128xbf16>
    %c0_29 = arith.constant 0 : index
    %c0_30 = arith.constant 0 : index
    %c0_31 = arith.constant 0 : index
    %52 = vector.load %arg14[%c0_29, %c0_30, %c0_31] : memref<8x16x128xbf16, #tpu.memory_space<vmem>>, vector<1x16x128xbf16>
    %53 = vector.shape_cast %52 : vector<1x16x128xbf16> to vector<16x128xbf16>
    %54 = vector.shape_cast %51 : vector<16x128xbf16> to vector<1x16x128xbf16>
    tpu.vector_store %arg14[%c0_29, %c0_30, %c0_31], %54 {strides = array<i32>} : memref<8x16x128xbf16, #tpu.memory_space<vmem>>, vector<1x16x128xbf16>,
    %c1 = arith.constant 1 : index
    %c0_32 = arith.constant 0 : index
    %c0_33 = arith.constant 0 : index
    %55 = vector.load %arg13[%c1, %c0_32, %c0_33] : memref<8x16x512xf32, #tpu.memory_space<vmem>>, vector<1x16x512xf32>
    %56 = vector.shape_cast %55 : vector<1x16x512xf32> to vector<16x512xf32>
    %cst_34 = arith.constant dense<0.000000e+00> : vector<16x512xf32>
    %57 = tpu.matmul %51, %12, %cst_34 {dimension_numbers = #tpu.dot_dimension_numbers<[1], [0], [0], [1], [0, 0, 1, 1], [], []>} : vector<16x128xbf16>, vector<128x512xbf16>, vector<16x512xf32> -> vector<16x512xf32>
    %58 = arith.addf %56, %57 : vector<16x512xf32>
    %59 = vector.extract_strided_slice %58 {offsets = [0, 0], sizes = [16, 128], strides = [1, 1]} : vector<16x512xf32> to vector<16x128xf32>
    %cst_35 = arith.constant 5.000000e-01 : f32
    %60 = vector.broadcast %cst_35 : f32 to vector<16x128xf32>
    %61 = arith.mulf %60, %59 : vector<16x128xf32>
    %62 = math.tanh %61 : vector<16x128xf32>
    %cst_36 = arith.constant 5.000000e-01 : f32
    %63 = vector.broadcast %cst_36 : f32 to vector<16x128xf32>
    %64 = arith.mulf %63, %62 : vector<16x128xf32>
    %cst_37 = arith.constant 5.000000e-01 : f32
    %65 = vector.broadcast %cst_37 : f32 to vector<16x128xf32>
    %66 = arith.addf %64, %65 : vector<16x128xf32>
    %67 = vector.extract_strided_slice %58 {offsets = [0, 128], sizes = [16, 128], strides = [1, 1]} : vector<16x512xf32> to vector<16x128xf32>
    %cst_38 = arith.constant 5.000000e-01 : f32
    %68 = vector.broadcast %cst_38 : f32 to vector<16x128xf32>
    %69 = arith.mulf %68, %67 : vector<16x128xf32>
    %70 = math.tanh %69 : vector<16x128xf32>
    %cst_39 = arith.constant 5.000000e-01 : f32
    %71 = vector.broadcast %cst_39 : f32 to vector<16x128xf32>
    %72 = arith.mulf %71, %70 : vector<16x128xf32>
    %cst_40 = arith.constant 5.000000e-01 : f32
    %73 = vector.broadcast %cst_40 : f32 to vector<16x128xf32>
    %74 = arith.addf %72, %73 : vector<16x128xf32>
    %75 = vector.extract_strided_slice %58 {offsets = [0, 256], sizes = [16, 128], strides = [1, 1]} : vector<16x512xf32> to vector<16x128xf32>
    %76 = math.tanh %75 : vector<16x128xf32>
    %77 = vector.extract_strided_slice %58 {offsets = [0, 384], sizes = [16, 128], strides = [1, 1]} : vector<16x512xf32> to vector<16x128xf32>
    %cst_41 = arith.constant 5.000000e-01 : f32
    %78 = vector.broadcast %cst_41 : f32 to vector<16x128xf32>
    %79 = arith.mulf %78, %77 : vector<16x128xf32>
    %80 = math.tanh %79 : vector<16x128xf32>
    %cst_42 = arith.constant 5.000000e-01 : f32
    %81 = vector.broadcast %cst_42 : f32 to vector<16x128xf32>
    %82 = arith.mulf %81, %80 : vector<16x128xf32>
    %cst_43 = arith.constant 5.000000e-01 : f32
    %83 = vector.broadcast %cst_43 : f32 to vector<16x128xf32>
    %84 = arith.addf %82, %83 : vector<16x128xf32>
    %85 = arith.mulf %74, %48 : vector<16x128xf32>
    %86 = arith.mulf %66, %76 : vector<16x128xf32>
    %87 = arith.addf %85, %86 : vector<16x128xf32>
    %88 = math.tanh %87 : vector<16x128xf32>
    %89 = arith.mulf %84, %88 : vector<16x128xf32>
    %90 = arith.truncf %89 : vector<16x128xf32> to vector<16x128xbf16>
    %c1_44 = arith.constant 1 : index
    %c0_45 = arith.constant 0 : index
    %c0_46 = arith.constant 0 : index
    %91 = vector.load %arg14[%c1_44, %c0_45, %c0_46] : memref<8x16x128xbf16, #tpu.memory_space<vmem>>, vector<1x16x128xbf16>
    %92 = vector.shape_cast %91 : vector<1x16x128xbf16> to vector<16x128xbf16>
    %93 = vector.shape_cast %90 : vector<16x128xbf16> to vector<1x16x128xbf16>
    tpu.vector_store %arg14[%c1_44, %c0_45, %c0_46], %93 {strides = array<i32>} : memref<8x16x128xbf16, #tpu.memory_space<vmem>>, vector<1x16x128xbf16>,
    %c2 = arith.constant 2 : index
    %c0_47 = arith.constant 0 : index
    %c0_48 = arith.constant 0 : index
    %94 = vector.load %arg13[%c2, %c0_47, %c0_48] : memref<8x16x512xf32, #tpu.memory_space<vmem>>, vector<1x16x512xf32>
    %95 = vector.shape_cast %94 : vector<1x16x512xf32> to vector<16x512xf32>
    %cst_49 = arith.constant dense<0.000000e+00> : vector<16x512xf32>
    %96 = tpu.matmul %90, %12, %cst_49 {dimension_numbers = #tpu.dot_dimension_numbers<[1], [0], [0], [1], [0, 0, 1, 1], [], []>} : vector<16x128xbf16>, vector<128x512xbf16>, vector<16x512xf32> -> vector<16x512xf32>
    %97 = arith.addf %95, %96 : vector<16x512xf32>
    %98 = vector.extract_strided_slice %97 {offsets = [0, 0], sizes = [16, 128], strides = [1, 1]} : vector<16x512xf32> to vector<16x128xf32>
    %cst_50 = arith.constant 5.000000e-01 : f32
    %99 = vector.broadcast %cst_50 : f32 to vector<16x128xf32>
    %100 = arith.mulf %99, %98 : vector<16x128xf32>
    %101 = math.tanh %100 : vector<16x128xf32>
    %cst_51 = arith.constant 5.000000e-01 : f32
    %102 = vector.broadcast %cst_51 : f32 to vector<16x128xf32>
    %103 = arith.mulf %102, %101 : vector<16x128xf32>
    %cst_52 = arith.constant 5.000000e-01 : f32
    %104 = vector.broadcast %cst_52 : f32 to vector<16x128xf32>
    %105 = arith.addf %103, %104 : vector<16x128xf32>
    %106 = vector.extract_strided_slice %97 {offsets = [0, 128], sizes = [16, 128], strides = [1, 1]} : vector<16x512xf32> to vector<16x128xf32>
    %cst_53 = arith.constant 5.000000e-01 : f32
    %107 = vector.broadcast %cst_53 : f32 to vector<16x128xf32>
    %108 = arith.mulf %107, %106 : vector<16x128xf32>
    %109 = math.tanh %108 : vector<16x128xf32>
    %cst_54 = arith.constant 5.000000e-01 : f32
    %110 = vector.broadcast %cst_54 : f32 to vector<16x128xf32>
    %111 = arith.mulf %110, %109 : vector<16x128xf32>
    %cst_55 = arith.constant 5.000000e-01 : f32
    %112 = vector.broadcast %cst_55 : f32 to vector<16x128xf32>
    %113 = arith.addf %111, %112 : vector<16x128xf32>
    %114 = vector.extract_strided_slice %97 {offsets = [0, 256], sizes = [16, 128], strides = [1, 1]} : vector<16x512xf32> to vector<16x128xf32>
    %115 = math.tanh %114 : vector<16x128xf32>
    %116 = vector.extract_strided_slice %97 {offsets = [0, 384], sizes = [16, 128], strides = [1, 1]} : vector<16x512xf32> to vector<16x128xf32>
    %cst_56 = arith.constant 5.000000e-01 : f32
    %117 = vector.broadcast %cst_56 : f32 to vector<16x128xf32>
    %118 = arith.mulf %117, %116 : vector<16x128xf32>
    %119 = math.tanh %118 : vector<16x128xf32>
    %cst_57 = arith.constant 5.000000e-01 : f32
    %120 = vector.broadcast %cst_57 : f32 to vector<16x128xf32>
    %121 = arith.mulf %120, %119 : vector<16x128xf32>
    %cst_58 = arith.constant 5.000000e-01 : f32
    %122 = vector.broadcast %cst_58 : f32 to vector<16x128xf32>
    %123 = arith.addf %121, %122 : vector<16x128xf32>
    %124 = arith.mulf %113, %87 : vector<16x128xf32>
    %125 = arith.mulf %105, %115 : vector<16x128xf32>
    %126 = arith.addf %124, %125 : vector<16x128xf32>
    %127 = math.tanh %126 : vector<16x128xf32>
    %128 = arith.mulf %123, %127 : vector<16x128xf32>
    %129 = arith.truncf %128 : vector<16x128xf32> to vector<16x128xbf16>
    %c2_59 = arith.constant 2 : index
    %c0_60 = arith.constant 0 : index
    %c0_61 = arith.constant 0 : index
    %130 = vector.load %arg14[%c2_59, %c0_60, %c0_61] : memref<8x16x128xbf16, #tpu.memory_space<vmem>>, vector<1x16x128xbf16>
    %131 = vector.shape_cast %130 : vector<1x16x128xbf16> to vector<16x128xbf16>
    %132 = vector.shape_cast %129 : vector<16x128xbf16> to vector<1x16x128xbf16>
    tpu.vector_store %arg14[%c2_59, %c0_60, %c0_61], %132 {strides = array<i32>} : memref<8x16x128xbf16, #tpu.memory_space<vmem>>, vector<1x16x128xbf16>,
    %c3 = arith.constant 3 : index
    %c0_62 = arith.constant 0 : index
    %c0_63 = arith.constant 0 : index
    %133 = vector.load %arg13[%c3, %c0_62, %c0_63] : memref<8x16x512xf32, #tpu.memory_space<vmem>>, vector<1x16x512xf32>
    %134 = vector.shape_cast %133 : vector<1x16x512xf32> to vector<16x512xf32>
    %cst_64 = arith.constant dense<0.000000e+00> : vector<16x512xf32>
    %135 = tpu.matmul %129, %12, %cst_64 {dimension_numbers = #tpu.dot_dimension_numbers<[1], [0], [0], [1], [0, 0, 1, 1], [], []>} : vector<16x128xbf16>, vector<128x512xbf16>, vector<16x512xf32> -> vector<16x512xf32>
    %136 = arith.addf %134, %135 : vector<16x512xf32>
    %137 = vector.extract_strided_slice %136 {offsets = [0, 0], sizes = [16, 128], strides = [1, 1]} : vector<16x512xf32> to vector<16x128xf32>
    %cst_65 = arith.constant 5.000000e-01 : f32
    %138 = vector.broadcast %cst_65 : f32 to vector<16x128xf32>
    %139 = arith.mulf %138, %137 : vector<16x128xf32>
    %140 = math.tanh %139 : vector<16x128xf32>
    %cst_66 = arith.constant 5.000000e-01 : f32
    %141 = vector.broadcast %cst_66 : f32 to vector<16x128xf32>
    %142 = arith.mulf %141, %140 : vector<16x128xf32>
    %cst_67 = arith.constant 5.000000e-01 : f32
    %143 = vector.broadcast %cst_67 : f32 to vector<16x128xf32>
    %144 = arith.addf %142, %143 : vector<16x128xf32>
    %145 = vector.extract_strided_slice %136 {offsets = [0, 128], sizes = [16, 128], strides = [1, 1]} : vector<16x512xf32> to vector<16x128xf32>
    %cst_68 = arith.constant 5.000000e-01 : f32
    %146 = vector.broadcast %cst_68 : f32 to vector<16x128xf32>
    %147 = arith.mulf %146, %145 : vector<16x128xf32>
    %148 = math.tanh %147 : vector<16x128xf32>
    %cst_69 = arith.constant 5.000000e-01 : f32
    %149 = vector.broadcast %cst_69 : f32 to vector<16x128xf32>
    %150 = arith.mulf %149, %148 : vector<16x128xf32>
    %cst_70 = arith.constant 5.000000e-01 : f32
    %151 = vector.broadcast %cst_70 : f32 to vector<16x128xf32>
    %152 = arith.addf %150, %151 : vector<16x128xf32>
    %153 = vector.extract_strided_slice %136 {offsets = [0, 256], sizes = [16, 128], strides = [1, 1]} : vector<16x512xf32> to vector<16x128xf32>
    %154 = math.tanh %153 : vector<16x128xf32>
    %155 = vector.extract_strided_slice %136 {offsets = [0, 384], sizes = [16, 128], strides = [1, 1]} : vector<16x512xf32> to vector<16x128xf32>
    %cst_71 = arith.constant 5.000000e-01 : f32
    %156 = vector.broadcast %cst_71 : f32 to vector<16x128xf32>
    %157 = arith.mulf %156, %155 : vector<16x128xf32>
    %158 = math.tanh %157 : vector<16x128xf32>
    %cst_72 = arith.constant 5.000000e-01 : f32
    %159 = vector.broadcast %cst_72 : f32 to vector<16x128xf32>
    %160 = arith.mulf %159, %158 : vector<16x128xf32>
    %cst_73 = arith.constant 5.000000e-01 : f32
    %161 = vector.broadcast %cst_73 : f32 to vector<16x128xf32>
    %162 = arith.addf %160, %161 : vector<16x128xf32>
    %163 = arith.mulf %152, %126 : vector<16x128xf32>
    %164 = arith.mulf %144, %154 : vector<16x128xf32>
    %165 = arith.addf %163, %164 : vector<16x128xf32>
    %166 = math.tanh %165 : vector<16x128xf32>
    %167 = arith.mulf %162, %166 : vector<16x128xf32>
    %168 = arith.truncf %167 : vector<16x128xf32> to vector<16x128xbf16>
    %c3_74 = arith.constant 3 : index
    %c0_75 = arith.constant 0 : index
    %c0_76 = arith.constant 0 : index
    %169 = vector.load %arg14[%c3_74, %c0_75, %c0_76] : memref<8x16x128xbf16, #tpu.memory_space<vmem>>, vector<1x16x128xbf16>
    %170 = vector.shape_cast %169 : vector<1x16x128xbf16> to vector<16x128xbf16>
    %171 = vector.shape_cast %168 : vector<16x128xbf16> to vector<1x16x128xbf16>
    tpu.vector_store %arg14[%c3_74, %c0_75, %c0_76], %171 {strides = array<i32>} : memref<8x16x128xbf16, #tpu.memory_space<vmem>>, vector<1x16x128xbf16>,
    %c4 = arith.constant 4 : index
    %c0_77 = arith.constant 0 : index
    %c0_78 = arith.constant 0 : index
    %172 = vector.load %arg13[%c4, %c0_77, %c0_78] : memref<8x16x512xf32, #tpu.memory_space<vmem>>, vector<1x16x512xf32>
    %173 = vector.shape_cast %172 : vector<1x16x512xf32> to vector<16x512xf32>
    %cst_79 = arith.constant dense<0.000000e+00> : vector<16x512xf32>
    %174 = tpu.matmul %168, %12, %cst_79 {dimension_numbers = #tpu.dot_dimension_numbers<[1], [0], [0], [1], [0, 0, 1, 1], [], []>} : vector<16x128xbf16>, vector<128x512xbf16>, vector<16x512xf32> -> vector<16x512xf32>
    %175 = arith.addf %173, %174 : vector<16x512xf32>
    %176 = vector.extract_strided_slice %175 {offsets = [0, 0], sizes = [16, 128], strides = [1, 1]} : vector<16x512xf32> to vector<16x128xf32>
    %cst_80 = arith.constant 5.000000e-01 : f32
    %177 = vector.broadcast %cst_80 : f32 to vector<16x128xf32>
    %178 = arith.mulf %177, %176 : vector<16x128xf32>
    %179 = math.tanh %178 : vector<16x128xf32>
    %cst_81 = arith.constant 5.000000e-01 : f32
    %180 = vector.broadcast %cst_81 : f32 to vector<16x128xf32>
    %181 = arith.mulf %180, %179 : vector<16x128xf32>
    %cst_82 = arith.constant 5.000000e-01 : f32
    %182 = vector.broadcast %cst_82 : f32 to vector<16x128xf32>
    %183 = arith.addf %181, %182 : vector<16x128xf32>
    %184 = vector.extract_strided_slice %175 {offsets = [0, 128], sizes = [16, 128], strides = [1, 1]} : vector<16x512xf32> to vector<16x128xf32>
    %cst_83 = arith.constant 5.000000e-01 : f32
    %185 = vector.broadcast %cst_83 : f32 to vector<16x128xf32>
    %186 = arith.mulf %185, %184 : vector<16x128xf32>
    %187 = math.tanh %186 : vector<16x128xf32>
    %cst_84 = arith.constant 5.000000e-01 : f32
    %188 = vector.broadcast %cst_84 : f32 to vector<16x128xf32>
    %189 = arith.mulf %188, %187 : vector<16x128xf32>
    %cst_85 = arith.constant 5.000000e-01 : f32
    %190 = vector.broadcast %cst_85 : f32 to vector<16x128xf32>
    %191 = arith.addf %189, %190 : vector<16x128xf32>
    %192 = vector.extract_strided_slice %175 {offsets = [0, 256], sizes = [16, 128], strides = [1, 1]} : vector<16x512xf32> to vector<16x128xf32>
    %193 = math.tanh %192 : vector<16x128xf32>
    %194 = vector.extract_strided_slice %175 {offsets = [0, 384], sizes = [16, 128], strides = [1, 1]} : vector<16x512xf32> to vector<16x128xf32>
    %cst_86 = arith.constant 5.000000e-01 : f32
    %195 = vector.broadcast %cst_86 : f32 to vector<16x128xf32>
    %196 = arith.mulf %195, %194 : vector<16x128xf32>
    %197 = math.tanh %196 : vector<16x128xf32>
    %cst_87 = arith.constant 5.000000e-01 : f32
    %198 = vector.broadcast %cst_87 : f32 to vector<16x128xf32>
    %199 = arith.mulf %198, %197 : vector<16x128xf32>
    %cst_88 = arith.constant 5.000000e-01 : f32
    %200 = vector.broadcast %cst_88 : f32 to vector<16x128xf32>
    %201 = arith.addf %199, %200 : vector<16x128xf32>
    %202 = arith.mulf %191, %165 : vector<16x128xf32>
    %203 = arith.mulf %183, %193 : vector<16x128xf32>
    %204 = arith.addf %202, %203 : vector<16x128xf32>
    %205 = math.tanh %204 : vector<16x128xf32>
    %206 = arith.mulf %201, %205 : vector<16x128xf32>
    %207 = arith.truncf %206 : vector<16x128xf32> to vector<16x128xbf16>
    %c4_89 = arith.constant 4 : index
    %c0_90 = arith.constant 0 : index
    %c0_91 = arith.constant 0 : index
    %208 = vector.load %arg14[%c4_89, %c0_90, %c0_91] : memref<8x16x128xbf16, #tpu.memory_space<vmem>>, vector<1x16x128xbf16>
    %209 = vector.shape_cast %208 : vector<1x16x128xbf16> to vector<16x128xbf16>
    %210 = vector.shape_cast %207 : vector<16x128xbf16> to vector<1x16x128xbf16>
    tpu.vector_store %arg14[%c4_89, %c0_90, %c0_91], %210 {strides = array<i32>} : memref<8x16x128xbf16, #tpu.memory_space<vmem>>, vector<1x16x128xbf16>,
    %c5 = arith.constant 5 : index
    %c0_92 = arith.constant 0 : index
    %c0_93 = arith.constant 0 : index
    %211 = vector.load %arg13[%c5, %c0_92, %c0_93] : memref<8x16x512xf32, #tpu.memory_space<vmem>>, vector<1x16x512xf32>
    %212 = vector.shape_cast %211 : vector<1x16x512xf32> to vector<16x512xf32>
    %cst_94 = arith.constant dense<0.000000e+00> : vector<16x512xf32>
    %213 = tpu.matmul %207, %12, %cst_94 {dimension_numbers = #tpu.dot_dimension_numbers<[1], [0], [0], [1], [0, 0, 1, 1], [], []>} : vector<16x128xbf16>, vector<128x512xbf16>, vector<16x512xf32> -> vector<16x512xf32>
    %214 = arith.addf %212, %213 : vector<16x512xf32>
    %215 = vector.extract_strided_slice %214 {offsets = [0, 0], sizes = [16, 128], strides = [1, 1]} : vector<16x512xf32> to vector<16x128xf32>
    %cst_95 = arith.constant 5.000000e-01 : f32
    %216 = vector.broadcast %cst_95 : f32 to vector<16x128xf32>
    %217 = arith.mulf %216, %215 : vector<16x128xf32>
    %218 = math.tanh %217 : vector<16x128xf32>
    %cst_96 = arith.constant 5.000000e-01 : f32
    %219 = vector.broadcast %cst_96 : f32 to vector<16x128xf32>
    %220 = arith.mulf %219, %218 : vector<16x128xf32>
    %cst_97 = arith.constant 5.000000e-01 : f32
    %221 = vector.broadcast %cst_97 : f32 to vector<16x128xf32>
    %222 = arith.addf %220, %221 : vector<16x128xf32>
    %223 = vector.extract_strided_slice %214 {offsets = [0, 128], sizes = [16, 128], strides = [1, 1]} : vector<16x512xf32> to vector<16x128xf32>
    %cst_98 = arith.constant 5.000000e-01 : f32
    %224 = vector.broadcast %cst_98 : f32 to vector<16x128xf32>
    %225 = arith.mulf %224, %223 : vector<16x128xf32>
    %226 = math.tanh %225 : vector<16x128xf32>
    %cst_99 = arith.constant 5.000000e-01 : f32
    %227 = vector.broadcast %cst_99 : f32 to vector<16x128xf32>
    %228 = arith.mulf %227, %226 : vector<16x128xf32>
    %cst_100 = arith.constant 5.000000e-01 : f32
    %229 = vector.broadcast %cst_100 : f32 to vector<16x128xf32>
    %230 = arith.addf %228, %229 : vector<16x128xf32>
    %231 = vector.extract_strided_slice %214 {offsets = [0, 256], sizes = [16, 128], strides = [1, 1]} : vector<16x512xf32> to vector<16x128xf32>
    %232 = math.tanh %231 : vector<16x128xf32>
    %233 = vector.extract_strided_slice %214 {offsets = [0, 384], sizes = [16, 128], strides = [1, 1]} : vector<16x512xf32> to vector<16x128xf32>
    %cst_101 = arith.constant 5.000000e-01 : f32
    %234 = vector.broadcast %cst_101 : f32 to vector<16x128xf32>
    %235 = arith.mulf %234, %233 : vector<16x128xf32>
    %236 = math.tanh %235 : vector<16x128xf32>
    %cst_102 = arith.constant 5.000000e-01 : f32
    %237 = vector.broadcast %cst_102 : f32 to vector<16x128xf32>
    %238 = arith.mulf %237, %236 : vector<16x128xf32>
    %cst_103 = arith.constant 5.000000e-01 : f32
    %239 = vector.broadcast %cst_103 : f32 to vector<16x128xf32>
    %240 = arith.addf %238, %239 : vector<16x128xf32>
    %241 = arith.mulf %230, %204 : vector<16x128xf32>
    %242 = arith.mulf %222, %232 : vector<16x128xf32>
    %243 = arith.addf %241, %242 : vector<16x128xf32>
    %244 = math.tanh %243 : vector<16x128xf32>
    %245 = arith.mulf %240, %244 : vector<16x128xf32>
    %246 = arith.truncf %245 : vector<16x128xf32> to vector<16x128xbf16>
    %c5_104 = arith.constant 5 : index
    %c0_105 = arith.constant 0 : index
    %c0_106 = arith.constant 0 : index
    %247 = vector.load %arg14[%c5_104, %c0_105, %c0_106] : memref<8x16x128xbf16, #tpu.memory_space<vmem>>, vector<1x16x128xbf16>
    %248 = vector.shape_cast %247 : vector<1x16x128xbf16> to vector<16x128xbf16>
    %249 = vector.shape_cast %246 : vector<16x128xbf16> to vector<1x16x128xbf16>
    tpu.vector_store %arg14[%c5_104, %c0_105, %c0_106], %249 {strides = array<i32>} : memref<8x16x128xbf16, #tpu.memory_space<vmem>>, vector<1x16x128xbf16>,
    %c6 = arith.constant 6 : index
    %c0_107 = arith.constant 0 : index
    %c0_108 = arith.constant 0 : index
    %250 = vector.load %arg13[%c6, %c0_107, %c0_108] : memref<8x16x512xf32, #tpu.memory_space<vmem>>, vector<1x16x512xf32>
    %251 = vector.shape_cast %250 : vector<1x16x512xf32> to vector<16x512xf32>
    %cst_109 = arith.constant dense<0.000000e+00> : vector<16x512xf32>
    %252 = tpu.matmul %246, %12, %cst_109 {dimension_numbers = #tpu.dot_dimension_numbers<[1], [0], [0], [1], [0, 0, 1, 1], [], []>} : vector<16x128xbf16>, vector<128x512xbf16>, vector<16x512xf32> -> vector<16x512xf32>
    %253 = arith.addf %251, %252 : vector<16x512xf32>
    %254 = vector.extract_strided_slice %253 {offsets = [0, 0], sizes = [16, 128], strides = [1, 1]} : vector<16x512xf32> to vector<16x128xf32>
    %cst_110 = arith.constant 5.000000e-01 : f32
    %255 = vector.broadcast %cst_110 : f32 to vector<16x128xf32>
    %256 = arith.mulf %255, %254 : vector<16x128xf32>
    %257 = math.tanh %256 : vector<16x128xf32>
    %cst_111 = arith.constant 5.000000e-01 : f32
    %258 = vector.broadcast %cst_111 : f32 to vector<16x128xf32>
    %259 = arith.mulf %258, %257 : vector<16x128xf32>
    %cst_112 = arith.constant 5.000000e-01 : f32
    %260 = vector.broadcast %cst_112 : f32 to vector<16x128xf32>
    %261 = arith.addf %259, %260 : vector<16x128xf32>
    %262 = vector.extract_strided_slice %253 {offsets = [0, 128], sizes = [16, 128], strides = [1, 1]} : vector<16x512xf32> to vector<16x128xf32>
    %cst_113 = arith.constant 5.000000e-01 : f32
    %263 = vector.broadcast %cst_113 : f32 to vector<16x128xf32>
    %264 = arith.mulf %263, %262 : vector<16x128xf32>
    %265 = math.tanh %264 : vector<16x128xf32>
    %cst_114 = arith.constant 5.000000e-01 : f32
    %266 = vector.broadcast %cst_114 : f32 to vector<16x128xf32>
    %267 = arith.mulf %266, %265 : vector<16x128xf32>
    %cst_115 = arith.constant 5.000000e-01 : f32
    %268 = vector.broadcast %cst_115 : f32 to vector<16x128xf32>
    %269 = arith.addf %267, %268 : vector<16x128xf32>
    %270 = vector.extract_strided_slice %253 {offsets = [0, 256], sizes = [16, 128], strides = [1, 1]} : vector<16x512xf32> to vector<16x128xf32>
    %271 = math.tanh %270 : vector<16x128xf32>
    %272 = vector.extract_strided_slice %253 {offsets = [0, 384], sizes = [16, 128], strides = [1, 1]} : vector<16x512xf32> to vector<16x128xf32>
    %cst_116 = arith.constant 5.000000e-01 : f32
    %273 = vector.broadcast %cst_116 : f32 to vector<16x128xf32>
    %274 = arith.mulf %273, %272 : vector<16x128xf32>
    %275 = math.tanh %274 : vector<16x128xf32>
    %cst_117 = arith.constant 5.000000e-01 : f32
    %276 = vector.broadcast %cst_117 : f32 to vector<16x128xf32>
    %277 = arith.mulf %276, %275 : vector<16x128xf32>
    %cst_118 = arith.constant 5.000000e-01 : f32
    %278 = vector.broadcast %cst_118 : f32 to vector<16x128xf32>
    %279 = arith.addf %277, %278 : vector<16x128xf32>
    %280 = arith.mulf %269, %243 : vector<16x128xf32>
    %281 = arith.mulf %261, %271 : vector<16x128xf32>
    %282 = arith.addf %280, %281 : vector<16x128xf32>
    %283 = math.tanh %282 : vector<16x128xf32>
    %284 = arith.mulf %279, %283 : vector<16x128xf32>
    %285 = arith.truncf %284 : vector<16x128xf32> to vector<16x128xbf16>
    %c6_119 = arith.constant 6 : index
    %c0_120 = arith.constant 0 : index
    %c0_121 = arith.constant 0 : index
    %286 = vector.load %arg14[%c6_119, %c0_120, %c0_121] : memref<8x16x128xbf16, #tpu.memory_space<vmem>>, vector<1x16x128xbf16>
    %287 = vector.shape_cast %286 : vector<1x16x128xbf16> to vector<16x128xbf16>
    %288 = vector.shape_cast %285 : vector<16x128xbf16> to vector<1x16x128xbf16>
    tpu.vector_store %arg14[%c6_119, %c0_120, %c0_121], %288 {strides = array<i32>} : memref<8x16x128xbf16, #tpu.memory_space<vmem>>, vector<1x16x128xbf16>,
    %c7 = arith.constant 7 : index
    %c0_122 = arith.constant 0 : index
    %c0_123 = arith.constant 0 : index
    %289 = vector.load %arg13[%c7, %c0_122, %c0_123] : memref<8x16x512xf32, #tpu.memory_space<vmem>>, vector<1x16x512xf32>
    %290 = vector.shape_cast %289 : vector<1x16x512xf32> to vector<16x512xf32>
    %cst_124 = arith.constant dense<0.000000e+00> : vector<16x512xf32>
    %291 = tpu.matmul %285, %12, %cst_124 {dimension_numbers = #tpu.dot_dimension_numbers<[1], [0], [0], [1], [0, 0, 1, 1], [], []>} : vector<16x128xbf16>, vector<128x512xbf16>, vector<16x512xf32> -> vector<16x512xf32>
    %292 = arith.addf %290, %291 : vector<16x512xf32>
    %293 = vector.extract_strided_slice %292 {offsets = [0, 0], sizes = [16, 128], strides = [1, 1]} : vector<16x512xf32> to vector<16x128xf32>
    %cst_125 = arith.constant 5.000000e-01 : f32
    %294 = vector.broadcast %cst_125 : f32 to vector<16x128xf32>
    %295 = arith.mulf %294, %293 : vector<16x128xf32>
    %296 = math.tanh %295 : vector<16x128xf32>
    %cst_126 = arith.constant 5.000000e-01 : f32
    %297 = vector.broadcast %cst_126 : f32 to vector<16x128xf32>
    %298 = arith.mulf %297, %296 : vector<16x128xf32>
    %cst_127 = arith.constant 5.000000e-01 : f32
    %299 = vector.broadcast %cst_127 : f32 to vector<16x128xf32>
    %300 = arith.addf %298, %299 : vector<16x128xf32>
    %301 = vector.extract_strided_slice %292 {offsets = [0, 128], sizes = [16, 128], strides = [1, 1]} : vector<16x512xf32> to vector<16x128xf32>
    %cst_128 = arith.constant 5.000000e-01 : f32
    %302 = vector.broadcast %cst_128 : f32 to vector<16x128xf32>
    %303 = arith.mulf %302, %301 : vector<16x128xf32>
    %304 = math.tanh %303 : vector<16x128xf32>
    %cst_129 = arith.constant 5.000000e-01 : f32
    %305 = vector.broadcast %cst_129 : f32 to vector<16x128xf32>
    %306 = arith.mulf %305, %304 : vector<16x128xf32>
    %cst_130 = arith.constant 5.000000e-01 : f32
    %307 = vector.broadcast %cst_130 : f32 to vector<16x128xf32>
    %308 = arith.addf %306, %307 : vector<16x128xf32>
    %309 = vector.extract_strided_slice %292 {offsets = [0, 256], sizes = [16, 128], strides = [1, 1]} : vector<16x512xf32> to vector<16x128xf32>
    %310 = math.tanh %309 : vector<16x128xf32>
    %311 = vector.extract_strided_slice %292 {offsets = [0, 384], sizes = [16, 128], strides = [1, 1]} : vector<16x512xf32> to vector<16x128xf32>
    %cst_131 = arith.constant 5.000000e-01 : f32
    %312 = vector.broadcast %cst_131 : f32 to vector<16x128xf32>
    %313 = arith.mulf %312, %311 : vector<16x128xf32>
    %314 = math.tanh %313 : vector<16x128xf32>
    %cst_132 = arith.constant 5.000000e-01 : f32
    %315 = vector.broadcast %cst_132 : f32 to vector<16x128xf32>
    %316 = arith.mulf %315, %314 : vector<16x128xf32>
    %cst_133 = arith.constant 5.000000e-01 : f32
    %317 = vector.broadcast %cst_133 : f32 to vector<16x128xf32>
    %318 = arith.addf %316, %317 : vector<16x128xf32>
    %319 = arith.mulf %308, %282 : vector<16x128xf32>
    %320 = arith.mulf %300, %310 : vector<16x128xf32>
    %321 = arith.addf %319, %320 : vector<16x128xf32>
    %322 = math.tanh %321 : vector<16x128xf32>
    %323 = arith.mulf %318, %322 : vector<16x128xf32>
    %324 = arith.truncf %323 : vector<16x128xf32> to vector<16x128xbf16>
    %c7_134 = arith.constant 7 : index
    %c0_135 = arith.constant 0 : index
    %c0_136 = arith.constant 0 : index
    %325 = vector.load %arg14[%c7_134, %c0_135, %c0_136] : memref<8x16x128xbf16, #tpu.memory_space<vmem>>, vector<1x16x128xbf16>
    %326 = vector.shape_cast %325 : vector<1x16x128xbf16> to vector<16x128xbf16>
    %327 = vector.shape_cast %324 : vector<16x128xbf16> to vector<1x16x128xbf16>
    tpu.vector_store %arg14[%c7_134, %c0_135, %c0_136], %327 {strides = array<i32>} : memref<8x16x128xbf16, #tpu.memory_space<vmem>>, vector<1x16x128xbf16>,
    %328 = arith.extf %324 : vector<16x128xbf16> to vector<16x128xf32>
    %c0_137 = arith.constant 0 : index
    %c0_138 = arith.constant 0 : index
    %329 = vector.load %arg11[%c0_137, %c0_138] : memref<16x128xf32, #tpu.memory_space<vmem>>, vector<16x128xf32>
    tpu.vector_store %arg11[%c0_137, %c0_138], %328 {strides = array<i32>} : memref<16x128xf32, #tpu.memory_space<vmem>>, vector<16x128xf32>,
    %c0_139 = arith.constant 0 : index
    %c0_140 = arith.constant 0 : index
    %330 = vector.load %arg12[%c0_139, %c0_140] : memref<16x128xf32, #tpu.memory_space<vmem>>, vector<16x128xf32>
    tpu.vector_store %arg12[%c0_139, %c0_140], %321 {strides = array<i32>} : memref<16x128xf32, #tpu.memory_space<vmem>>, vector<16x128xf32>,
    %c0_141 = arith.constant 0 : index
    %c0_142 = arith.constant 0 : index
    %c0_143 = arith.constant 0 : index
    %331 = vector.load %arg14[%c0_141, %c0_142, %c0_143] : memref<8x16x128xbf16, #tpu.memory_space<vmem>>, vector<8x16x128xbf16>
    %332 = vector.shape_cast %331 : vector<8x16x128xbf16> to vector<128x128xbf16>
    %c0_144 = arith.constant 0 : index
    %c0_145 = arith.constant 0 : index
    %333 = vector.load %arg6[%c0_144, %c0_145] : memref<128x128xbf16, #tpu.memory_space<vmem>>, vector<128x128xbf16>
    %cst_146 = arith.constant dense<0.000000e+00> : vector<128x128xf32>
    %334 = tpu.matmul %332, %333, %cst_146 {dimension_numbers = #tpu.dot_dimension_numbers<[1], [0], [0], [1], [0, 0, 1, 1], [], []>} : vector<128x128xbf16>, vector<128x128xbf16>, vector<128x128xf32> -> vector<128x128xf32>
    %c0_147 = arith.constant 0 : index
    %c0_148 = arith.constant 0 : index
    %335 = vector.load %arg7[%c0_147, %c0_148] : memref<1x128xf32, #tpu.memory_space<vmem>>, vector<1x128xf32>
    %336 = vector.broadcast %335 : vector<1x128xf32> to vector<128x128xf32>
    %337 = arith.addf %334, %336 : vector<128x128xf32>
    %338 = vector.shape_cast %337 : vector<128x128xf32> to vector<8x16x128xf32>
    %339 = vector.extract_strided_slice %338 {offsets = [0, 0, 0], sizes = [1, 16, 128], strides = [1, 1, 1]} : vector<8x16x128xf32> to vector<1x16x128xf32>
    %340 = vector.shape_cast %339 : vector<1x16x128xf32> to vector<16x128xf32>
    %c0_149 = arith.constant 0 : index
    %c0_150 = arith.constant 0 : index
    %c0_151 = arith.constant 0 : index
    %341 = vector.load %arg10[%c0_149, %c0_150, %c0_151] : memref<16x8x128xf32, #tpu.memory_space<vmem>>, vector<16x1x128xf32>
    %342 = vector.shape_cast %341 : vector<16x1x128xf32> to vector<16x128xf32>
    %343 = vector.shape_cast %340 : vector<16x128xf32> to vector<16x1x128xf32>
    tpu.vector_store %arg10[%c0_149, %c0_150, %c0_151], %343 {strides = array<i32>} : memref<16x8x128xf32, #tpu.memory_space<vmem>>, vector<16x1x128xf32>,
    %344 = vector.extract_strided_slice %338 {offsets = [1, 0, 0], sizes = [1, 16, 128], strides = [1, 1, 1]} : vector<8x16x128xf32> to vector<1x16x128xf32>
    %345 = vector.shape_cast %344 : vector<1x16x128xf32> to vector<16x128xf32>
    %c0_152 = arith.constant 0 : index
    %c1_153 = arith.constant 1 : index
    %c0_154 = arith.constant 0 : index
    %346 = vector.load %arg10[%c0_152, %c1_153, %c0_154] : memref<16x8x128xf32, #tpu.memory_space<vmem>>, vector<16x1x128xf32>
    %347 = vector.shape_cast %346 : vector<16x1x128xf32> to vector<16x128xf32>
    %348 = vector.shape_cast %345 : vector<16x128xf32> to vector<16x1x128xf32>
    tpu.vector_store %arg10[%c0_152, %c1_153, %c0_154], %348 {strides = array<i32>} : memref<16x8x128xf32, #tpu.memory_space<vmem>>, vector<16x1x128xf32>,
    %349 = vector.extract_strided_slice %338 {offsets = [2, 0, 0], sizes = [1, 16, 128], strides = [1, 1, 1]} : vector<8x16x128xf32> to vector<1x16x128xf32>
    %350 = vector.shape_cast %349 : vector<1x16x128xf32> to vector<16x128xf32>
    %c0_155 = arith.constant 0 : index
    %c2_156 = arith.constant 2 : index
    %c0_157 = arith.constant 0 : index
    %351 = vector.load %arg10[%c0_155, %c2_156, %c0_157] : memref<16x8x128xf32, #tpu.memory_space<vmem>>, vector<16x1x128xf32>
    %352 = vector.shape_cast %351 : vector<16x1x128xf32> to vector<16x128xf32>
    %353 = vector.shape_cast %350 : vector<16x128xf32> to vector<16x1x128xf32>
    tpu.vector_store %arg10[%c0_155, %c2_156, %c0_157], %353 {strides = array<i32>} : memref<16x8x128xf32, #tpu.memory_space<vmem>>, vector<16x1x128xf32>,
    %354 = vector.extract_strided_slice %338 {offsets = [3, 0, 0], sizes = [1, 16, 128], strides = [1, 1, 1]} : vector<8x16x128xf32> to vector<1x16x128xf32>
    %355 = vector.shape_cast %354 : vector<1x16x128xf32> to vector<16x128xf32>
    %c0_158 = arith.constant 0 : index
    %c3_159 = arith.constant 3 : index
    %c0_160 = arith.constant 0 : index
    %356 = vector.load %arg10[%c0_158, %c3_159, %c0_160] : memref<16x8x128xf32, #tpu.memory_space<vmem>>, vector<16x1x128xf32>
    %357 = vector.shape_cast %356 : vector<16x1x128xf32> to vector<16x128xf32>
    %358 = vector.shape_cast %355 : vector<16x128xf32> to vector<16x1x128xf32>
    tpu.vector_store %arg10[%c0_158, %c3_159, %c0_160], %358 {strides = array<i32>} : memref<16x8x128xf32, #tpu.memory_space<vmem>>, vector<16x1x128xf32>,
    %359 = vector.extract_strided_slice %338 {offsets = [4, 0, 0], sizes = [1, 16, 128], strides = [1, 1, 1]} : vector<8x16x128xf32> to vector<1x16x128xf32>
    %360 = vector.shape_cast %359 : vector<1x16x128xf32> to vector<16x128xf32>
    %c0_161 = arith.constant 0 : index
    %c4_162 = arith.constant 4 : index
    %c0_163 = arith.constant 0 : index
    %361 = vector.load %arg10[%c0_161, %c4_162, %c0_163] : memref<16x8x128xf32, #tpu.memory_space<vmem>>, vector<16x1x128xf32>
    %362 = vector.shape_cast %361 : vector<16x1x128xf32> to vector<16x128xf32>
    %363 = vector.shape_cast %360 : vector<16x128xf32> to vector<16x1x128xf32>
    tpu.vector_store %arg10[%c0_161, %c4_162, %c0_163], %363 {strides = array<i32>} : memref<16x8x128xf32, #tpu.memory_space<vmem>>, vector<16x1x128xf32>,
    %364 = vector.extract_strided_slice %338 {offsets = [5, 0, 0], sizes = [1, 16, 128], strides = [1, 1, 1]} : vector<8x16x128xf32> to vector<1x16x128xf32>
    %365 = vector.shape_cast %364 : vector<1x16x128xf32> to vector<16x128xf32>
    %c0_164 = arith.constant 0 : index
    %c5_165 = arith.constant 5 : index
    %c0_166 = arith.constant 0 : index
    %366 = vector.load %arg10[%c0_164, %c5_165, %c0_166] : memref<16x8x128xf32, #tpu.memory_space<vmem>>, vector<16x1x128xf32>
    %367 = vector.shape_cast %366 : vector<16x1x128xf32> to vector<16x128xf32>
    %368 = vector.shape_cast %365 : vector<16x128xf32> to vector<16x1x128xf32>
    tpu.vector_store %arg10[%c0_164, %c5_165, %c0_166], %368 {strides = array<i32>} : memref<16x8x128xf32, #tpu.memory_space<vmem>>, vector<16x1x128xf32>,
    %369 = vector.extract_strided_slice %338 {offsets = [6, 0, 0], sizes = [1, 16, 128], strides = [1, 1, 1]} : vector<8x16x128xf32> to vector<1x16x128xf32>
    %370 = vector.shape_cast %369 : vector<1x16x128xf32> to vector<16x128xf32>
    %c0_167 = arith.constant 0 : index
    %c6_168 = arith.constant 6 : index
    %c0_169 = arith.constant 0 : index
    %371 = vector.load %arg10[%c0_167, %c6_168, %c0_169] : memref<16x8x128xf32, #tpu.memory_space<vmem>>, vector<16x1x128xf32>
    %372 = vector.shape_cast %371 : vector<16x1x128xf32> to vector<16x128xf32>
    %373 = vector.shape_cast %370 : vector<16x128xf32> to vector<16x1x128xf32>
    tpu.vector_store %arg10[%c0_167, %c6_168, %c0_169], %373 {strides = array<i32>} : memref<16x8x128xf32, #tpu.memory_space<vmem>>, vector<16x1x128xf32>,
    %374 = vector.extract_strided_slice %338 {offsets = [7, 0, 0], sizes = [1, 16, 128], strides = [1, 1, 1]} : vector<8x16x128xf32> to vector<1x16x128xf32>
    %375 = vector.shape_cast %374 : vector<1x16x128xf32> to vector<16x128xf32>
    %c0_170 = arith.constant 0 : index
    %c7_171 = arith.constant 7 : index
    %c0_172 = arith.constant 0 : index
    %376 = vector.load %arg10[%c0_170, %c7_171, %c0_172] : memref<16x8x128xf32, #tpu.memory_space<vmem>>, vector<16x1x128xf32>
    %377 = vector.shape_cast %376 : vector<16x1x128xf32> to vector<16x128xf32>
    %378 = vector.shape_cast %375 : vector<16x128xf32> to vector<16x1x128xf32>
    tpu.vector_store %arg10[%c0_170, %c7_171, %c0_172], %378 {strides = array<i32>} : memref<16x8x128xf32, #tpu.memory_space<vmem>>, vector<16x1x128xf32>,
    return
  }
  func.func @transform_0(%arg0: i32, %arg1: i32) -> (i32, i32, i32) {
    %c0_i32 = arith.constant 0 : i32
    %c0_i32_0 = arith.constant 0 : i32
    return %arg1, %arg0, %c0_i32 : i32, i32, i32
  }
  func.func @transform_1(%arg0: i32, %arg1: i32) -> (i32, i32) {
    %c0_i32 = arith.constant 0 : i32
    %c0_i32_0 = arith.constant 0 : i32
    %c0_i32_1 = arith.constant 0 : i32
    return %c0_i32, %c0_i32_0 : i32, i32
  }
  func.func @transform_2(%arg0: i32, %arg1: i32) -> (i32, i32) {
    %c0_i32 = arith.constant 0 : i32
    %c0_i32_0 = arith.constant 0 : i32
    %c0_i32_1 = arith.constant 0 : i32
    return %c0_i32, %c0_i32_0 : i32, i32
  }
  func.func @transform_3(%arg0: i32, %arg1: i32) -> (i32, i32) {
    %c0_i32 = arith.constant 0 : i32
    %c0_i32_0 = arith.constant 0 : i32
    %c0_i32_1 = arith.constant 0 : i32
    return %c0_i32, %c0_i32_0 : i32, i32
  }
  func.func @transform_4(%arg0: i32, %arg1: i32) -> (i32, i32) {
    %c0_i32 = arith.constant 0 : i32
    %c0_i32_0 = arith.constant 0 : i32
    %c0_i32_1 = arith.constant 0 : i32
    return %c0_i32, %c0_i32_0 : i32, i32
  }
  func.func @transform_5(%arg0: i32, %arg1: i32) -> (i32, i32) {
    %c0_i32 = arith.constant 0 : i32
    %c0_i32_0 = arith.constant 0 : i32
    %c0_i32_1 = arith.constant 0 : i32
    return %c0_i32, %c0_i32_0 : i32, i32
  }
  func.func @transform_6(%arg0: i32, %arg1: i32) -> (i32, i32) {
    %c0_i32 = arith.constant 0 : i32
    %c0_i32_0 = arith.constant 0 : i32
    return %arg0, %c0_i32 : i32, i32
  }
  func.func @transform_7(%arg0: i32, %arg1: i32) -> (i32, i32) {
    %c0_i32 = arith.constant 0 : i32
    %c0_i32_0 = arith.constant 0 : i32
    return %arg0, %c0_i32 : i32, i32
  }
  func.func @transform_8(%arg0: i32, %arg1: i32) -> (i32, i32, i32) {
    %c0_i32 = arith.constant 0 : i32
    %c0_i32_0 = arith.constant 0 : i32
    return %arg0, %arg1, %c0_i32 : i32, i32, i32
  }
  func.func @transform_9(%arg0: i32, %arg1: i32) -> (i32, i32) {
    %c0_i32 = arith.constant 0 : i32
    %c0_i32_0 = arith.constant 0 : i32
    return %arg0, %c0_i32 : i32, i32
  }
  func.func @transform_10(%arg0: i32, %arg1: i32) -> (i32, i32) {
    %c0_i32 = arith.constant 0 : i32
    %c0_i32_0 = arith.constant 0 : i32
    return %arg0, %c0_i32 : i32, i32
  }
}

</mosaic_0001>

<bundles_post_ra>
// kernel: lstm_model_forward.1
= control target key start
LH: loop header
LB: loop body
LE: loop exit
PB: predicated region body
PF: predicated region fallthrough
CT: control target
= control target key end

     0   :  { %s4556_s1 = inlined_call_operand.vmem [shape: bf16[128,512], index: 1, kind: input, shape index: {}]   ;;  %s4557_s2 = inlined_call_operand.vmem [shape: bf16[128,512], index: 2, kind: input, shape index: {}]   ;;  %s4558_s0 = inlined_call_operand.vmem [shape: bf16[8,16,128], index: 0, kind: input, shape index: {}]   ;;  %s4559_s6 = inlined_call_operand.vmem [shape: f32[16,128], index: 6, kind: input, shape index: {}, may-alias: {6,7}]   ;;  %s4560_s3 = inlined_call_operand.vmem [shape: f32[1,512], index: 3, kind: input, shape index: {}]   ;;  %s4561_s7 = inlined_call_operand.vmem [shape: f32[16,128], index: 7, kind: input, shape index: {}, may-alias: {6,7}]   ;;  %s4562_s4 = inlined_call_operand.vmem [shape: bf16[128,128], index: 4, kind: input, shape index: {}]   ;;  %s4563_s5 = inlined_call_operand.vmem [shape: f32[1,128], index: 5, kind: input, shape index: {}]   ;;  %s4564_s8 = inlined_call_operand.vmem [shape: f32[16,8,128], index: 8, kind: output, shape index: {0}]   ;;  %s4565_s10 = inlined_call_operand.vmem [shape: f32[16,128], index: 10, kind: output, shape index: {2}]   ;;  %s4566_s9 = inlined_call_operand.vmem [shape: f32[16,128], index: 9, kind: output, shape index: {1}]  }
   0x1   :  { %v2432_v0 = vld [vmem:[%s4556_s1 + $0xe0] sm:$0xf]  ;;  %v2676_v1 = vld [vmem:[%s4556_s1 + $0xec] sm:$0xf0]  ;;  %v2674_v46 = vld [vmem:[%s4556_s1 + $0xe4] sm:$0xf] }
   0x2   :  { %v2560_v2 = vld [vmem:[%s4557_s2 + $0xe0] sm:$0xf]  ;;  %v2433_v3 = vor.u32 %v2676_v1, %v2432_v0  ;;  %v2708_v4 = vld [vmem:[%s4557_s2 + $0xec] sm:$0xf0]  ;;  %v2434_v47 = vld [vmem:[%s4556_s1 + $0xf0] sm:$0xf0] }
   0x3   :  { %v2416_v5 = vld [vmem:[%s4556_s1 + $0xc0] sm:$0xf]  ;;  %v2672_v6 = vld [vmem:[%s4556_s1 + $0xcc] sm:$0xf0]  ;;  %v3016_v7 = vor.u32 %v2708_v4, %v2560_v2  ;;  %v2440_v48 = vld [vmem:[%s4556_s1 + $0xe8] sm:$0xf]  ;;  %v2437_v56 = vor.u32 %v2674_v46, %v2434_v47 }
   0x4   :  { %v2544_v8 = vld [vmem:[%s4557_s2 + $0xc0] sm:$0xf]  ;;  %v2704_v9 = vld [vmem:[%s4557_s2 + $0xcc] sm:$0xf0]  ;;  %310 = vmatpush.bf16.msra.mxu1 %v2433_v3  ;;  %2766 = vmatpush.bf16.msra.mxu2 %v2433_v3  ;;  %v2417_v10 = vor.u32 %v2672_v6, %v2416_v5  ;;  %v2677_v49 = vld [vmem:[%s4556_s1 + $0xf4] sm:$0xf0] }
   0x5   :  { %2767 = vmatpush.bf16.msra.mxu3 %v2433_v3  ;;  %775 = vmatpush.bf16.msra.mxu0 %v3016_v7  ;;  %v3025_v11 = vor.u32 %v2704_v9, %v2544_v8  ;;  %v2400_v12 = vld [vmem:[%s4556_s1 + $0xa0] sm:$0xf]  ;;  %v2668_v13 = vld [vmem:[%s4556_s1 + $0xac] sm:$0xf0]  ;;  %v3137_v53 = vld [vmem:[%s4558_s0 + $0x18] sm:$0xff]  ;;  %v2441_v57 = vor.u32 %v2677_v49, %v2440_v48 }
   0x6   :  { %v2528_v14 = vld [vmem:[%s4557_s2 + $0xa0] sm:$0xf]  ;;  %v2700_v15 = vld [vmem:[%s4557_s2 + $0xac] sm:$0xf0]  ;;  %v2401_v16 = vor.u32 %v2668_v13, %v2400_v12  ;;  %v37_v55 = vld [vmem:[%s4559_s6 + $0x8] sm:$0xff] }
   0x7   :  { %v3040_v17 = vor.u32 %v2700_v15, %v2528_v14  ;;  %v2384_v18 = vld [vmem:[%s4556_s1 + $0x80] sm:$0xf]  ;;  %v2664_v19 = vld [vmem:[%s4556_s1 + $0x8c] sm:$0xf0]  ;;  %v2675_v58 = vld [vmem:[%s4556_s1 + $0xec] sm:$0xf] }
   0x8   :  { %311 = vmatpush.bf16.msra.mxu1 %v2417_v10  ;;  %2768 = vmatpush.bf16.msra.mxu2 %v2417_v10  ;;  %v2512_v20 = vld [vmem:[%s4557_s2 + $0x80] sm:$0xf]  ;;  %v2696_v21 = vld [vmem:[%s4557_s2 + $0x8c] sm:$0xf0]  ;;  %v2385_v22 = vor.u32 %v2664_v19, %v2384_v18  ;;  %v2442_v59 = vld [vmem:[%s4556_s1 + $0xf8] sm:$0xf0] }
   0x9   :  { %2769 = vmatpush.bf16.msra.mxu3 %v2417_v10  ;;  %776 = vmatpush.bf16.msra.mxu0 %v3025_v11  ;;  %v3055_v23 = vor.u32 %v2696_v21, %v2512_v20  ;;  %v2368_v24 = vld [vmem:[%s4556_s1 + $0x60] sm:$0xf]  ;;  %v2660_v25 = vld [vmem:[%s4556_s1 + $0x6c] sm:$0xf0]  ;;  %v2670_v60 = vld [vmem:[%s4556_s1 + $0xc4] sm:$0xf]  ;;  %v2445_v2 = vor.u32 %v2675_v58, %v2442_v59 }
   0xa   :  { %v2496_v26 = vld [vmem:[%s4557_s2 + $0x60] sm:$0xf]  ;;  %v2692_v27 = vld [vmem:[%s4557_s2 + $0x6c] sm:$0xf0]  ;;  %v2369_v28 = vor.u32 %v2660_v25, %v2368_v24  ;;  %v2418_v61 = vld [vmem:[%s4556_s1 + $0xd0] sm:$0xf0] }
   0xb   :  { %v3070_v29 = vor.u32 %v2692_v27, %v2496_v26  ;;  %v2352_v30 = vld [vmem:[%s4556_s1 + $0x40] sm:$0xf]  ;;  %v2656_v31 = vld [vmem:[%s4556_s1 + $0x4c] sm:$0xf0]  ;;  %v2424_v62 = vld [vmem:[%s4556_s1 + $0xc8] sm:$0xf]  ;;  %v2421_v5 = vor.u32 %v2670_v60, %v2418_v61 }
   0xc   :  { %312 = vmatpush.bf16.msra.mxu1 %v2401_v16  ;;  %2770 = vmatpush.bf16.msra.mxu2 %v2401_v16  ;;  %v2480_v32 = vld [vmem:[%s4557_s2 + $0x40] sm:$0xf]  ;;  %v2688_v33 = vld [vmem:[%s4557_s2 + $0x4c] sm:$0xf0]  ;;  %v2353_v34 = vor.u32 %v2656_v31, %v2352_v30  ;;  %v2673_v63 = vld [vmem:[%s4556_s1 + $0xd4] sm:$0xf0] }
   0xd   :  { %2771 = vmatpush.bf16.msra.mxu3 %v2401_v16  ;;  %777 = vmatpush.bf16.msra.mxu0 %v3040_v17  ;;  %v3085_v35 = vor.u32 %v2688_v33, %v2480_v32  ;;  %v2336_v36 = vld [vmem:[%s4556_s1 + $0x20] sm:$0xf]  ;;  %v2652_v37 = vld [vmem:[%s4556_s1 + $0x2c] sm:$0xf0]  ;;  %v2671_v3 = vld [vmem:[%s4556_s1 + $0xcc] sm:$0xf]  ;;  %v2425_v6 = vor.u32 %v2673_v63, %v2424_v62 }
   0xe   :  { %v2464_v38 = vld [vmem:[%s4557_s2 + $0x20] sm:$0xf]  ;;  %v2684_v39 = vld [vmem:[%s4557_s2 + $0x2c] sm:$0xf0]  ;;  %v2337_v40 = vor.u32 %v2652_v37, %v2336_v36  ;;  %v2426_v4 = vld [vmem:[%s4556_s1 + $0xd8] sm:$0xf0] }
   0xf   :  { %v3100_v41 = vor.u32 %v2684_v39, %v2464_v38  ;;  %v2320_v42 = vld [vmem:[%s4556_s1] sm:$0xf]  ;;  %v2648_v43 = vld [vmem:[%s4556_s1 + $0xc] sm:$0xf0]  ;;  %v2666_v8 = vld [vmem:[%s4556_s1 + $0xa4] sm:$0xf]  ;;  %v2429_v13 = vor.u32 %v2671_v3, %v2426_v4 }
  0x10   :  { %313 = vmatpush.bf16.msra.mxu1 %v2385_v22  ;;  %2772 = vmatpush.bf16.msra.mxu2 %v2385_v22  ;;  %v2448_v44 = vld [vmem:[%s4557_s2] sm:$0xf]  ;;  %v2680_v45 = vld [vmem:[%s4557_s2 + $0xc] sm:$0xf0]  ;;  %v2321_v50 = vor.u32 %v2648_v43, %v2320_v42  ;;  %v2402_v9 = vld [vmem:[%s4556_s1 + $0xb0] sm:$0xf0] }
  0x11   :  { %2773 = vmatpush.bf16.msra.mxu3 %v2385_v22  ;;  %778 = vmatpush.bf16.msra.mxu0 %v3055_v23  ;;  %v3127_v51 = vor.u32 %v2680_v45, %v2448_v44  ;;  %v3132_v52 = vld [vmem:[%s4558_s0] sm:$0xff]  ;;  %v3166_v0 = vld [vmem:[%s4558_s0 + $0x30] sm:$0xff]  ;;  %v2408_v10 = vld [vmem:[%s4556_s1 + $0xa8] sm:$0xf]  ;;  %v2405_v16 = vor.u32 %v2666_v8, %v2402_v9 }
  0x12   :  { %v36_v54 = vld [vmem:[%s4559_s6] sm:$0xff]  ;;  %v2669_v12 = vld [vmem:[%s4556_s1 + $0xb4] sm:$0xf0]  ;;  %v2667_v14 = vld [vmem:[%s4556_s1 + $0xac] sm:$0xf] }
  0x13   :  { %v3168_v1 = vpack.c.bf16 %v37_v55, %v36_v54  ;;  %v2410_v15 = vld [vmem:[%s4556_s1 + $0xb8] sm:$0xf0]  ;;  %v2409_v18 = vor.u32 %v2669_v12, %v2408_v10  ;;  %v2662_v19 = vld [vmem:[%s4556_s1 + $0x84] sm:$0xf]  ;;  %v2386_v20 = vld [vmem:[%s4556_s1 + $0x90] sm:$0xf0] }
  0x14   :  { %314 = vmatpush.bf16.msra.mxu1 %v2369_v28  ;;  %2774 = vmatpush.bf16.msra.mxu2 %v2369_v28  ;;  %v2392_v21 = vld [vmem:[%s4556_s1 + $0x88] sm:$0xf]  ;;  %v2665_v22 = vld [vmem:[%s4556_s1 + $0x94] sm:$0xf0]  ;;  %v2413_v24 = vor.u32 %v2667_v14, %v2410_v15  ;;  %v2663_v25 = vld [vmem:[%s4556_s1 + $0x8c] sm:$0xf]  ;;  %v2389_v27 = vor.u32 %v2662_v19, %v2386_v20 }
  0x15   :  { %2775 = vmatpush.bf16.msra.mxu3 %v2369_v28  ;;  %779 = vmatpush.bf16.msra.mxu0 %v3070_v29  ;;  %v2394_v26 = vld [vmem:[%s4556_s1 + $0x98] sm:$0xf0]  ;;  %v2393_v28 = vor.u32 %v2665_v22, %v2392_v21  ;;  %v2658_v30 = vld [vmem:[%s4556_s1 + $0x64] sm:$0xf]  ;;  %v2370_v31 = vld [vmem:[%s4556_s1 + $0x70] sm:$0xf0] }
  0x16   :  { %v2376_v32 = vld [vmem:[%s4556_s1 + $0x68] sm:$0xf]  ;;  %v2661_v33 = vld [vmem:[%s4556_s1 + $0x74] sm:$0xf0]  ;;  %v3239_v37 = vld [vmem:[%s4558_s0 + $0x20] sm:$0xff] }
  0x17   :  { %v3234_v36 = vld [vmem:[%s4558_s0 + $0x8] sm:$0xff]  ;;  %v2378_v39 = vld [vmem:[%s4556_s1 + $0x78] sm:$0xf0]  ;;  %v2377_v42 = vor.u32 %v2661_v33, %v2376_v32  ;;  %v2654_v43 = vld [vmem:[%s4556_s1 + $0x44] sm:$0xf] }
  0x18   :  { %315 = vmatpush.bf16.msra.mxu1 %v2353_v34  ;;  %2776 = vmatpush.bf16.msra.mxu2 %v2353_v34  ;;  %v2659_v38 = vld [vmem:[%s4556_s1 + $0x6c] sm:$0xf]  ;;  %v2354_v44 = vld [vmem:[%s4556_s1 + $0x50] sm:$0xf0]  ;;  %v2360_v45 = vld [vmem:[%s4556_s1 + $0x48] sm:$0xf] }
  0x19   :  { %2777 = vmatpush.bf16.msra.mxu3 %v2353_v34  ;;  %780 = vmatpush.bf16.msra.mxu0 %v3085_v35  ;;  %v2397_v34 = vor.u32 %v2663_v25, %v2394_v26  ;;  %v2657_v46 = vld [vmem:[%s4556_s1 + $0x54] sm:$0xf0]  ;;  %v2381_v48 = vor.u32 %v2659_v38, %v2378_v39  ;;  %v2655_v49 = vld [vmem:[%s4556_s1 + $0x4c] sm:$0xf]  ;;  %v2357_v54 = vor.u32 %v2654_v43, %v2354_v44  ;;  %v2344_v58 = vld [vmem:[%s4556_s1 + $0x28] sm:$0xf] }
  0x1a   :  { %v3263_v47 = vld [vmem:[%s4558_s0 + $0x38] sm:$0xff]  ;;  %v2361_v55 = vor.u32 %v2657_v46, %v2360_v45  ;;  %v2651_v61 = vld [vmem:[%s4556_s1 + $0x2c] sm:$0xf]  ;;  %v2646_v3 = vld [vmem:[%s4556_s1 + $0x4] sm:$0xf] }
  0x1b   :  { %v2653_v59 = vld [vmem:[%s4556_s1 + $0x34] sm:$0xf0]  ;;  %v2346_v62 = vld [vmem:[%s4556_s1 + $0x38] sm:$0xf0]  ;;  %v2322_v4 = vld [vmem:[%s4556_s1 + $0x10] sm:$0xf0] }
  0x1c   :  { %316 = vmatpush.bf16.msra.mxu1 %v2337_v40  ;;  %2778 = vmatpush.bf16.msra.mxu2 %v2337_v40  ;;  %v2706_v8 = vld [vmem:[%s4557_s2 + $0xe4] sm:$0xf]  ;;  %v2562_v9 = vld [vmem:[%s4557_s2 + $0xf0] sm:$0xf0]  ;;  %v2568_v10 = vld [vmem:[%s4557_s2 + $0xe8] sm:$0xf] }
  0x1d   :  { %2779 = vmatpush.bf16.msra.mxu3 %v2337_v40  ;;  %781 = vmatpush.bf16.msra.mxu0 %v3100_v41  ;;  %v2373_v40 = vor.u32 %v2658_v30, %v2370_v31  ;;  %v2709_v12 = vld [vmem:[%s4557_s2 + $0xf4] sm:$0xf0]  ;;  %v2647_v14 = vld [vmem:[%s4556_s1 + $0xc] sm:$0xf]  ;;  %v2330_v15 = vld [vmem:[%s4556_s1 + $0x18] sm:$0xf0]  ;;  %v3325_v19 = vor.u32 %v2706_v8, %v2562_v9 }
  0x1e   :  { %v3327_v20 = vor.u32 %v2709_v12, %v2568_v10  ;;  %v2707_v21 = vld [vmem:[%s4557_s2 + $0xec] sm:$0xf]  ;;  %v2570_v22 = vld [vmem:[%s4557_s2 + $0xf8] sm:$0xf0]  ;;  %v2640_v26 = vld [vmem:[%s4558_s0 + $0x10] sm:$0xff] }
  0x1f   :  { %v3336_v25 = vor.u32 %v2707_v21, %v2570_v22  ;;  %v2546_v30 = vld [vmem:[%s4557_s2 + $0xd0] sm:$0xf0]  ;;  %v2552_v31 = vld [vmem:[%s4557_s2 + $0xc8] sm:$0xf]  ;;  %v2705_v33 = vld [vmem:[%s4557_s2 + $0xd4] sm:$0xf0] }
  0x20   :  { %317 = vmatpush.bf16.msra.mxu1 %v2321_v50  ;;  %2780 = vmatpush.bf16.msra.mxu2 %v2321_v50  ;;  %v2554_v38 = vld [vmem:[%s4557_s2 + $0xd8] sm:$0xf0]  ;;  %v3373_v39 = vor.u32 %v2705_v33, %v2552_v31  ;;  %v2530_v43 = vld [vmem:[%s4557_s2 + $0xb0] sm:$0xf0]  ;;  %v2536_v44 = vld [vmem:[%s4557_s2 + $0xa8] sm:$0xf] }
  0x21   :  { %2781 = vmatpush.bf16.msra.mxu3 %v2321_v50  ;;  %782 = vmatpush.bf16.msra.mxu0 %v3127_v51  ;;  %v2362_v50 = vld [vmem:[%s4556_s1 + $0x58] sm:$0xf0]  ;;  %v2699_v46 = vld [vmem:[%s4557_s2 + $0xac] sm:$0xf]  ;;  %v2686_v10 = vld [vmem:[%s4557_s2 + $0x44] sm:$0xf] }
  0x22   :  { %v2365_v60 = vor.u32 %v2655_v49, %v2362_v50  ;;  %v2482_v12 = vld [vmem:[%s4557_s2 + $0x50] sm:$0xf0]  ;;  %v2682_v22 = vld [vmem:[%s4557_s2 + $0x24] sm:$0xf]  ;;  %v2474_v31 = vld [vmem:[%s4557_s2 + $0x38] sm:$0xf0] }
  0x23   :  { %318 = vmatmul.bf16.vlgmr.msra.gmra.mxu1 %v3132_v52  ;;  %333 = vmatmul.bf16.vlgmr.msra.gmra.mxu2 %v3137_v53 }
  0x24   :  { %359 = vmatpush.bf16.msrb.mxu1 %v2437_v56  ;;  %408 = vmatpush.bf16.msrb.mxu2 %v2441_v57  ;;  %v2650_v56 = vld [vmem:[%s4556_s1 + $0x24] sm:$0xf]  ;;  %v2338_v57 = vld [vmem:[%s4556_s1 + $0x30] sm:$0xf0] }
  0x25   :  { %348 = vmatmul.bf16.vlgmr.msra.gmra.mxu3 %v3166_v0  ;;  %783 = vmatmul.bf16.vlgmr.msra.gmra.mxu0 %v3168_v1  ;;  %v2341_v63 = vor.u32 %v2650_v56, %v2338_v57  ;;  %v2520_v56 = vld [vmem:[%s4557_s2 + $0x88] sm:$0xf] }
  0x26   :  { %457 = vmatpush.bf16.msrb.mxu3 %v2445_v2  ;;  %894 = vmatpush.bf16.msrb.mxu0 %v3016_v7  ;;  %v2345_v2 = vor.u32 %v2653_v59, %v2344_v58  ;;  %v2697_v58 = vld [vmem:[%s4557_s2 + $0x94] sm:$0xf0]  ;;  %v2522_v59 = vld [vmem:[%s4557_s2 + $0x98] sm:$0xf0] }
  0x28   :  { %360 = vmatpush.bf16.msrb.mxu1 %v2421_v5  ;;  %409 = vmatpush.bf16.msrb.mxu2 %v2425_v6  ;;  %v2328_v5 = vld [vmem:[%s4556_s1 + $0x8] sm:$0xf]  ;;  %v2649_v6 = vld [vmem:[%s4556_s1 + $0x14] sm:$0xf0] }
  0x2a   :  { %458 = vmatpush.bf16.msrb.mxu3 %v2429_v13  ;;  %895 = vmatpush.bf16.msrb.mxu0 %v3025_v11  ;;  %v2349_v13 = vor.u32 %v2651_v61, %v2346_v62  ;;  %v2690_v62 = vld [vmem:[%s4557_s2 + $0x64] sm:$0xf] }
  0x2c   :  { %361 = vmatpush.bf16.msrb.mxu1 %v2405_v16  ;;  %410 = vmatpush.bf16.msrb.mxu2 %v2409_v18  ;;  %v2325_v16 = vor.u32 %v2646_v3, %v2322_v4  ;;  %v2329_v18 = vor.u32 %v2649_v6, %v2328_v5  ;;  %v2693_v4 = vld [vmem:[%s4557_s2 + $0x74] sm:$0xf0]  ;;  %v2691_v5 = vld [vmem:[%s4557_s2 + $0x6c] sm:$0xf]  ;;  %v2506_v6 = vld [vmem:[%s4557_s2 + $0x78] sm:$0xf0] }
  0x2d   :  { %v3469_v9 = vor.u32 %v2691_v5, %v2506_v6 }
  0x2e   :  { %459 = vmatpush.bf16.msrb.mxu3 %v2413_v24  ;;  %896 = vmatpush.bf16.msrb.mxu0 %v3040_v17  ;;  %v2333_v24 = vor.u32 %v2647_v14, %v2330_v15  ;;  %v3486_v14 = vor.u32 %v2686_v10, %v2482_v12  ;;  %v2687_v15 = vld [vmem:[%s4557_s2 + $0x4c] sm:$0xf] }
  0x30   :  { %362 = vmatpush.bf16.msrb.mxu1 %v2389_v27  ;;  %411 = vmatpush.bf16.msrb.mxu2 %v2393_v28  ;;  %v3344_v27 = vld [vmem:[%s4558_s0 + $0x28] sm:$0xff]  ;;  %v2702_v28 = vld [vmem:[%s4557_s2 + $0xc4] sm:$0xf] }
  0x31   :  { %v3362_v32 = vor.u32 %v2702_v28, %v2546_v30  ;;  %v2685_v28 = vld [vmem:[%s4557_s2 + $0x34] sm:$0xf0]  ;;  %v2683_v30 = vld [vmem:[%s4557_s2 + $0x2c] sm:$0xf] }
  0x32   :  { %460 = vmatpush.bf16.msrb.mxu3 %v2397_v34  ;;  %897 = vmatpush.bf16.msrb.mxu0 %v3055_v23  ;;  %v2703_v34 = vld [vmem:[%s4557_s2 + $0xcc] sm:$0xf] }
  0x33   :  { %323 = vmatmul.bf16.gmra.mxu1 %v3234_v36  ;;  %338 = vmatmul.bf16.gmra.mxu2 %v3239_v37 }
  0x34   :  { %363 = vmatpush.bf16.msrb.mxu1 %v2373_v40  ;;  %412 = vmatpush.bf16.msrb.mxu2 %v2377_v42  ;;  %v3375_v40 = vor.u32 %v2703_v34, %v2554_v38  ;;  %v2698_v42 = vld [vmem:[%s4557_s2 + $0xa4] sm:$0xf]  ;;  %v3529_v34 = vor.u32 %v2683_v30, %v2474_v31  ;;  %v2679_v38 = vld [vmem:[%s4557_s2 + $0xc] sm:$0xf] }
  0x35   :  { %353 = vmatmul.bf16.gmra.mxu3 %v3263_v47  ;;  %v3396_v45 = vor.u32 %v2698_v42, %v2530_v43  ;;  %v2458_v42 = vld [vmem:[%s4557_s2 + $0x18] sm:$0xf0] }
  0x36   :  { %461 = vmatpush.bf16.msrb.mxu3 %v2381_v48  ;;  %898 = vmatpush.bf16.msrb.mxu0 %v3070_v29  ;;  %v2538_v48 = vld [vmem:[%s4557_s2 + $0xb8] sm:$0xf0]  ;;  %v3540_v43 = vor.u32 %v2679_v38, %v2458_v42 }
  0x37   :  { %v3409_v50 = vor.u32 %v2699_v46, %v2538_v48  ;;  %v2678_v46 = vld [vmem:[%s4557_s2 + $0x4] sm:$0xf]  ;;  %v2450_v48 = vld [vmem:[%s4557_s2 + $0x10] sm:$0xf0] }
  0x38   :  { %364 = vmatpush.bf16.msrb.mxu1 %v2357_v54  ;;  %413 = vmatpush.bf16.msrb.mxu2 %v2361_v55  ;;  %v2694_v54 = vld [vmem:[%s4557_s2 + $0x84] sm:$0xf]  ;;  %v2514_v55 = vld [vmem:[%s4557_s2 + $0x90] sm:$0xf0] }
  0x39   :  { %v3428_v57 = vor.u32 %v2694_v54, %v2514_v55  ;;  %v2456_v54 = vld [vmem:[%s4557_s2 + $0x8] sm:$0xf]  ;;  %v3563_v55 = vor.u32 %v2678_v46, %v2450_v48 }
  0x3a   :  { %462 = vmatpush.bf16.msrb.mxu3 %v2365_v60  ;;  %899 = vmatpush.bf16.msrb.mxu0 %v3085_v35  ;;  %v3439_v60 = vor.u32 %v2697_v58, %v2520_v56 }
  0x3c   :  { %365 = vmatpush.bf16.msrb.mxu1 %v2341_v63  ;;  %414 = vmatpush.bf16.msrb.mxu2 %v2345_v2  ;;  %v2498_v63 = vld [vmem:[%s4557_s2 + $0x70] sm:$0xf0]  ;;  %v2504_v2 = vld [vmem:[%s4557_s2 + $0x68] sm:$0xf] }
  0x3d   :  { %v3456_v3 = vor.u32 %v2690_v62, %v2498_v63  ;;  %v3467_v8 = vor.u32 %v2693_v4, %v2504_v2 }
  0x3e   :  { %463 = vmatpush.bf16.msrb.mxu3 %v2349_v13  ;;  %900 = vmatpush.bf16.msrb.mxu0 %v3100_v41  ;;  %v2488_v13 = vld [vmem:[%s4557_s2 + $0x48] sm:$0xf] }
  0x40   :  { %366 = vmatpush.bf16.msrb.mxu1 %v2325_v16  ;;  %415 = vmatpush.bf16.msrb.mxu2 %v2329_v18  ;;  %v2490_v16 = vld [vmem:[%s4557_s2 + $0x58] sm:$0xf0] }
  0x41   :  { %v3499_v21 = vor.u32 %v2687_v15, %v2490_v16 }
  0x42   :  { %464 = vmatpush.bf16.msrb.mxu3 %v2333_v24  ;;  %901 = vmatpush.bf16.msrb.mxu0 %v3127_v51  ;;  %v2466_v24 = vld [vmem:[%s4557_s2 + $0x30] sm:$0xf0] }
  0x43   :  { %328 = vmatmul.bf16.gmra.mxu1 %v2640_v26  ;;  %343 = vmatmul.bf16.gmra.mxu2 %v3344_v27 }
  0x44   :  { %789 = vmatpush.bf16.msra.mxu1 %v3325_v19  ;;  %803 = vmatpush.bf16.msra.mxu2 %v3327_v20 }
  0x45   :  { %465 = vmatmul.bf16.vlgmr.msrb.gmra.mxu3 %v3132_v52 }
  0x46   :  { %817 = vmatpush.bf16.msra.mxu3 %v3336_v25  ;;  %1014 = vmatpush.bf16.msra.mxu0 %v3016_v7 }
  0x48   :  { %790 = vmatpush.bf16.msra.mxu1 %v3362_v32  ;;  %804 = vmatpush.bf16.msra.mxu2 %v3373_v39 }
  0x4a   :  { %1015 = vmatpush.bf16.msra.mxu0 %v3025_v11  ;;  %818 = vmatpush.bf16.msra.mxu3 %v3375_v40 }
  0x4c   :  { %791 = vmatpush.bf16.msra.mxu1 %v3396_v45 }
  0x4e   :  { %1016 = vmatpush.bf16.msra.mxu0 %v3040_v17  ;;  %819 = vmatpush.bf16.msra.mxu3 %v3409_v50 }
  0x50   :  { %792 = vmatpush.bf16.msra.mxu1 %v3428_v57 }
  0x52   :  { %1017 = vmatpush.bf16.msra.mxu0 %v3055_v23 }
  0x53   :  { %367 = vmatmul.bf16.vlgmr.msrb.gmra.mxu1 %v3132_v52  ;;  %416 = vmatmul.bf16.vlgmr.msrb.gmra.mxu2 %v3132_v52  ;;  %v2701_v52 = vld [vmem:[%s4557_s2 + $0xb4] sm:$0xf0] }
  0x54   :  { %v3407_v49 = vor.u32 %v2701_v52, %v2536_v44  ;;  %793 = vmatpush.bf16.msra.mxu1 %v3456_v3  ;;  %v3548_v52 = vld [vmem:[%s4560_s3] sm:$0xf] }
  0x55   :  { %470 = vmatmul.bf16.gmra.mxu3 %v3234_v36  ;;  %v3569_v56 = vperm.slane %v3548_v52, 0 }
  0x56   :  { %1018 = vmatpush.bf16.msra.mxu0 %v3070_v29  ;;  %805 = vmatpush.bf16.msra.mxu2 %v3407_v49 }
  0x58   :  { %794 = vmatpush.bf16.msra.mxu1 %v3486_v14 }
  0x5a   :  { %1019 = vmatpush.bf16.msra.mxu0 %v3085_v35  ;;  %806 = vmatpush.bf16.msra.mxu2 %v3439_v60 }
  0x5e   :  { %1020 = vmatpush.bf16.msra.mxu0 %v3100_v41  ;;  %807 = vmatpush.bf16.msra.mxu2 %v3467_v8 }
  0x62   :  { %1021 = vmatpush.bf16.msra.mxu0 %v3127_v51 }
  0x63   :  { %372 = vmatmul.bf16.gmra.mxu1 %v3234_v36  ;;  %421 = vmatmul.bf16.gmra.mxu2 %v3234_v36  ;;  %v2695_v36 = vld [vmem:[%s4557_s2 + $0x8c] sm:$0xf] }
  0x64   :  { %v3441_v61 = vor.u32 %v2695_v36, %v2522_v59 }
  0x65   :  { %475 = vmatmul.bf16.gmra.mxu3 %v2640_v26 }
  0x66   :  { %820 = vmatpush.bf16.msra.mxu3 %v3441_v61 }
  0x6a   :  { %821 = vmatpush.bf16.msra.mxu3 %v3469_v9 }
  0x6e   :  { %822 = vmatpush.bf16.msra.mxu3 %v3499_v21 }
  0x72   :  { %823 = vmatpush.bf16.msra.mxu3 %v3529_v34 }
  0x73   :  { %377 = vmatmul.bf16.gmra.mxu1 %v2640_v26  ;;  %426 = vmatmul.bf16.gmra.mxu2 %v2640_v26  ;;  %v3516_v26 = vor.u32 %v2682_v22, %v2466_v24 }
  0x75   :  { %480 = vmatmul.bf16.gmra.mxu3 %v3137_v53  ;;  %795 = vmatpush.bf16.msra.mxu1 %v3516_v26 }
  0x76   :  { %824 = vmatpush.bf16.msra.mxu3 %v3540_v43 }
  0x79   :  { %796 = vmatpush.bf16.msra.mxu1 %v3563_v55 }
  0x7a   :  { %936 = vmatpush.bf16.msrb.mxu3 %v3336_v25 }
  0x7d   :  { %908 = vmatpush.bf16.msrb.mxu1 %v3325_v19 }
  0x7e   :  { %937 = vmatpush.bf16.msrb.mxu3 %v3375_v40 }
  0x81   :  { %909 = vmatpush.bf16.msrb.mxu1 %v3362_v32 }
  0x82   :  { %938 = vmatpush.bf16.msrb.mxu3 %v3409_v50 }
  0x83   :  { %382 = vmatmul.bf16.gmra.mxu1 %v3137_v53  ;;  %431 = vmatmul.bf16.gmra.mxu2 %v3137_v53  ;;  %v2689_v53 = vld [vmem:[%s4557_s2 + $0x54] sm:$0xf0] }
  0x84   :  { %v3497_v18 = vor.u32 %v2689_v53, %v2488_v13 }
  0x85   :  { %485 = vmatmul.bf16.gmra.mxu3 %v3239_v37  ;;  %910 = vmatpush.bf16.msrb.mxu1 %v3396_v45 }
  0x86   :  { %808 = vmatpush.bf16.msra.mxu2 %v3497_v18  ;;  %939 = vmatpush.bf16.msrb.mxu3 %v3441_v61 }
  0x89   :  { %911 = vmatpush.bf16.msrb.mxu1 %v3428_v57 }
  0x8a   :  { %940 = vmatpush.bf16.msrb.mxu3 %v3469_v9 }
  0x8d   :  { %912 = vmatpush.bf16.msrb.mxu1 %v3456_v3 }
  0x8e   :  { %941 = vmatpush.bf16.msrb.mxu3 %v3499_v21 }
  0x91   :  { %913 = vmatpush.bf16.msrb.mxu1 %v3486_v14 }
  0x92   :  { %942 = vmatpush.bf16.msrb.mxu3 %v3529_v34 }
  0x93   :  { %387 = vmatmul.bf16.gmra.mxu1 %v3239_v37  ;;  %436 = vmatmul.bf16.gmra.mxu2 %v3239_v37  ;;  %v2472_v37 = vld [vmem:[%s4557_s2 + $0x28] sm:$0xf] }
  0x94   :  { %v3527_v33 = vor.u32 %v2685_v28, %v2472_v37 }
  0x95   :  { %490 = vmatmul.bf16.gmra.mxu3 %v3344_v27  ;;  %914 = vmatpush.bf16.msrb.mxu1 %v3516_v26 }
  0x96   :  { %809 = vmatpush.bf16.msra.mxu2 %v3527_v33  ;;  %943 = vmatpush.bf16.msrb.mxu3 %v3540_v43 }
  0x99   :  { %915 = vmatpush.bf16.msrb.mxu1 %v3563_v55 }
  0xa0   :  { %v3542_v44 = vpop.f32.mrf.mxu1 }
  0xa3   :  { %392 = vmatmul.bf16.gmra.mxu1 %v3344_v27  ;;  %441 = vmatmul.bf16.gmra.mxu2 %v3344_v27  ;;  %v2681_v27 = vld [vmem:[%s4557_s2 + $0x14] sm:$0xf0] }
  0xa4   :  { %v3571_v58 = vor.u32 %v2681_v27, %v2456_v54 }
  0xa5   :  { %495 = vmatmul.bf16.gmra.mxu3 %v3166_v0 }
  0xa6   :  { %v334_v36 = vpop.f32.mrf.mxu2  ;;  %810 = vmatpush.bf16.msra.mxu2 %v3571_v58 }
  0xa7   :  { %v3576_v59 = vadd.f32 %v334_v36, %v3569_v56 }
  0xa8   :  { %v349_v62 = vpop.f32.mrf.mxu3  ;;  %v3583_v2 = vpop.f32.mrf.mxu1 }
  0xa9   :  { %4567 = vst [vmem:[#allocation4_spill] sm:$0xff] %v3576_v59  ;;  %v3581_v63 = vadd.f32 %v349_v62, %v3569_v56 }
  0xaa   :  { %922 = vmatpush.bf16.msrb.mxu2 %v3327_v20 }
  0xab   :  { %4568 = vst [vmem:[#allocation5_spill] sm:$0xff] %v3581_v63 }
  0xae   :  { %923 = vmatpush.bf16.msrb.mxu2 %v3373_v39  ;;  %v3589_v4 = vpop.f32.mrf.mxu2 }
  0xaf   :  { %4569 = vst [vmem:[#allocation6_spill] sm:$0xff] %v3589_v4 }
  0xb0   :  { %v3592_v5 = vpop.f32.mrf.mxu3  ;;  %v324_v6 = vpop.f32.mrf.mxu1 }
  0xb1   :  { %4570 = vst [vmem:[#allocation7_spill] sm:$0xff] %v3592_v5  ;;  %v3597_v10 = vadd.f32 %v324_v6, %v3569_v56 }
  0xb2   :  { %924 = vmatpush.bf16.msrb.mxu2 %v3407_v49 }
  0xb3   :  { %397 = vmatmul.bf16.gmra.mxu1 %v3166_v0  ;;  %446 = vmatmul.bf16.gmra.mxu2 %v3166_v0 }
  0xb5   :  { %500 = vmatmul.bf16.gmra.mxu3 %v3263_v47 }
  0xb6   :  { %925 = vmatpush.bf16.msrb.mxu2 %v3439_v60  ;;  %v339_v12 = vpop.f32.mrf.mxu2 }
  0xb7   :  { %v3607_v13 = vadd.f32 %v339_v12, %v3569_v56 }
  0xb8   :  { %v354_v53 = vpop.f32.mrf.mxu3  ;;  %v3612_v16 = vpop.f32.mrf.mxu1 }
  0xb9   :  { %4571 = vst [vmem:[#allocation8_spill] sm:$0xff] %v3607_v13  ;;  %v3610_v15 = vadd.f32 %v354_v53, %v3569_v56 }
  0xba   :  { %926 = vmatpush.bf16.msrb.mxu2 %v3467_v8 }
  0xbb   :  { %4572 = vst [vmem:[#allocation9_spill] sm:$0xff] %v3610_v15 }
  0xbe   :  { %927 = vmatpush.bf16.msrb.mxu2 %v3497_v18  ;;  %v3619_v0 = vpop.f32.mrf.mxu2 }
  0xbf   :  { %4573 = vst [vmem:[#allocation10_spill] sm:$0xff] %v3619_v0 }
  0xc0   :  { %v3622_v22 = vpop.f32.mrf.mxu3  ;;  %v329_v24 = vpop.f32.mrf.mxu1 }
  0xc1   :  { %4574 = vst [vmem:[#allocation11_spill] sm:$0xff] %v3622_v22  ;;  %v3626_v37 = vadd.f32 %v329_v24, %v3569_v56 }
  0xc2   :  { %928 = vmatpush.bf16.msrb.mxu2 %v3527_v33 }
  0xc3   :  { %4575 = vst [vmem:[#allocation12_spill] sm:$0xff] %v3626_v37  ;;  %402 = vmatmul.bf16.gmra.mxu1 %v3263_v47  ;;  %451 = vmatmul.bf16.gmra.mxu2 %v3263_v47 }
  0xc5   :  { %825 = vmatmul.bf16.vlgmr.msra.gmra.mxu3 %v3168_v1 }
  0xc6   :  { %929 = vmatpush.bf16.msrb.mxu2 %v3571_v58  ;;  %1056 = vmatpush.bf16.msra.mxu3 %v3336_v25  ;;  %v344_v28 = vpop.f32.mrf.mxu2 }
  0xc7   :  { %v3636_v30 = vadd.f32 %v344_v28, %v3569_v56 }
  0xc8   :  { %v3638_v31 = vpop.f32.mrf.mxu3  ;;  %v3640_v38 = vpop.f32.mrf.mxu1 }
  0xc9   :  { %4576 = vst [vmem:[#allocation13_spill] sm:$0xff] %v3636_v30 }
  0xca   :  { %4577 = vst [vmem:[#allocation14_spill] sm:$0xff] %v3640_v38  ;;  %1057 = vmatpush.bf16.msra.mxu3 %v3375_v40 }
  0xce   :  { %1058 = vmatpush.bf16.msra.mxu3 %v3409_v50  ;;  %v3644_v47 = vpop.f32.mrf.mxu2 }
  0xcf   :  { %4578 = vst [vmem:[#allocation15_spill] sm:$0xff] %v3644_v47 }
  0xd0   :  { %v3646_v42 = vpop.f32.mrf.mxu3  ;;  %v3648_v46 = vpop.f32.mrf.mxu1 }
  0xd2   :  { %1059 = vmatpush.bf16.msra.mxu3 %v3441_v61 }
  0xd3   :  { %797 = vmatmul.bf16.vlgmr.msra.gmra.mxu1 %v3168_v1  ;;  %811 = vmatmul.bf16.vlgmr.msra.gmra.mxu2 %v3168_v1 }
  0xd4   :  { %1028 = vmatpush.bf16.msra.mxu1 %v3325_v19  ;;  %1042 = vmatpush.bf16.msra.mxu2 %v3327_v20 }
  0xd6   :  { %1060 = vmatpush.bf16.msra.mxu3 %v3469_v9  ;;  %v3656_v48 = vpop.f32.mrf.mxu2 }
  0xd8   :  { %v3658_v54 = vpop.f32.mrf.mxu3  ;;  %v3660_v27 = vpop.f32.mrf.mxu1  ;;  %1029 = vmatpush.bf16.msra.mxu1 %v3362_v32  ;;  %1043 = vmatpush.bf16.msra.mxu2 %v3373_v39 }
  0xda   :  { %1061 = vmatpush.bf16.msra.mxu3 %v3499_v21 }
  0xdc   :  { %1030 = vmatpush.bf16.msra.mxu1 %v3396_v45  ;;  %1044 = vmatpush.bf16.msra.mxu2 %v3407_v49 }
  0xde   :  { %1062 = vmatpush.bf16.msra.mxu3 %v3529_v34  ;;  %v3668_v1 = vpop.f32.mrf.mxu2 }
  0xe0   :  { %v3670_v36 = vpop.f32.mrf.mxu3  ;;  %v3672_v62 = vpop.f32.mrf.mxu1  ;;  %1031 = vmatpush.bf16.msra.mxu1 %v3428_v57  ;;  %1045 = vmatpush.bf16.msra.mxu2 %v3439_v60 }
  0xe1   :  { %4579 = vst [vmem:[#allocation16_spill] sm:$0xff] %v3670_v36 }
  0xe2   :  { %1063 = vmatpush.bf16.msra.mxu3 %v3540_v43 }
  0xe4   :  { %1032 = vmatpush.bf16.msra.mxu1 %v3456_v3  ;;  %1046 = vmatpush.bf16.msra.mxu2 %v3467_v8 }
  0xe6   :  { %v3679_v6 = vpop.f32.mrf.mxu2 }
  0xe8   :  { %v3681_v12 = vpop.f32.mrf.mxu3  ;;  %v3683_v53 = vpop.f32.mrf.mxu1  ;;  %1033 = vmatpush.bf16.msra.mxu1 %v3486_v14  ;;  %1047 = vmatpush.bf16.msra.mxu2 %v3497_v18 }
  0xe9   :  { %4580 = vst [vmem:[#allocation17_spill] sm:$0xff] %v3681_v12 }
  0xea   :  { %4581 = vst [vmem:[#allocation18_spill] sm:$0xff] %v3683_v53 }
  0xec   :  { %1034 = vmatpush.bf16.msra.mxu1 %v3516_v26  ;;  %1048 = vmatpush.bf16.msra.mxu2 %v3527_v33 }
  0xee   :  { %v3689_v24 = vpop.f32.mrf.mxu2 }
  0xef   :  { %4582 = vst [vmem:[#allocation19_spill] sm:$0xff] %v3689_v24 }
  0xf0   :  { %v3691_v28 = vpop.f32.mrf.mxu3  ;;  %v3693_v22 = vpop.f32.mrf.mxu1  ;;  %1035 = vmatpush.bf16.msra.mxu1 %v3563_v55  ;;  %1049 = vmatpush.bf16.msra.mxu2 %v3571_v58 }
  0xf1   :  { %4583 = vst [vmem:[#allocation20_spill] sm:$0xff] %v3691_v28 }
  0xf2   :  { %4584 = vst [vmem:[#allocation21_spill] sm:$0xff] %v3693_v22 }
  0xf6   :  { %v3697_v15 = vpop.f32.mrf.mxu2 }
  0xf7   :  { %4585 = vst [vmem:[#allocation22_spill] sm:$0xff] %v3697_v15 }
  0xf8   :  { %v3699_v5 = vpop.f32.mrf.mxu3  ;;  %v3701_v63 = vpop.f32.mrf.mxu1 }
  0xf9   :  { %4586 = vst [vmem:[#allocation23_spill] sm:$0xff] %v3699_v5 }
  0xfa   :  { %4587 = vst [vmem:[#allocation24_spill] sm:$0xff] %v3701_v63 }
  0xfe   :  { %v3703_v47 = vpop.f32.mrf.mxu2 }
  0xff   :  { %4588 = vst [vmem:[#allocation25_spill] sm:$0xff] %v3703_v47 }
 0x100   :  { %v3705_v30 = vpop.f32.mrf.mxu3  ;;  %v3707_v0 = vpop.f32.mrf.mxu1 }
 0x101   :  { %4589 = vst [vmem:[#allocation26_spill] sm:$0xff] %v3705_v30 }
 0x102   :  { %4590 = vst [vmem:[#allocation27_spill] sm:$0xff] %v3707_v0 }
 0x106   :  { %v3709_v13 = vpop.f32.mrf.mxu2 }
 0x107   :  { %4591 = vst [vmem:[#allocation28_spill] sm:$0xff] %v3709_v13 }
 0x108   :  { %v3711_v4 = vpop.f32.mrf.mxu3  ;;  %v3713_v59 = vpop.f32.mrf.mxu1 }
 0x109   :  { %4592 = vst [vmem:[#allocation29_spill] sm:$0xff] %v3711_v4 }
 0x10a   :  { %4593 = vst [vmem:[#allocation30_spill] sm:$0xff] %v3713_v59 }
 0x10e   :  { %v3715_v28 = vpop.f32.mrf.mxu2 }
 0x10f   :  { %4594 = vst [vmem:[#allocation31_spill] sm:$0xff] %v3715_v28 }
 0x110   :  { %v3717_v12 = vpop.f32.mrf.mxu3  ;;  %v3719_v38 = vpop.f32.mrf.mxu1 }
 0x111   :  { %4595 = vst [vmem:[#allocation32_spill] sm:$0xff] %v3717_v12 }
 0x112   :  { %4596 = vst [vmem:[#allocation33_spill] sm:$0xff] %v3719_v38 }
 0x116   :  { %v3721_v5 = vpop.f32.mrf.mxu2 }
 0x117   :  { %4597 = vst [vmem:[#allocation34_spill] sm:$0xff] %v3721_v5 }
 0x118   :  { %v3723_v63 = vpop.f32.mrf.mxu3  ;;  %v3725_v47 = vpop.f32.mrf.mxu1 }
 0x119   :  { %4598 = vst [vmem:[#allocation35_spill] sm:$0xff] %v3723_v63 }
 0x11a   :  { %4599 = vst [vmem:[#allocation36_spill] sm:$0xff] %v3725_v47 }
 0x11e   :  { %v3727_v30 = vpop.f32.mrf.mxu2 }
 0x11f   :  { %4600 = vst [vmem:[#allocation37_spill] sm:$0xff] %v3727_v30 }
 0x120   :  { %v3729_v0 = vpop.f32.mrf.mxu3  ;;  %v3731_v13 = vpop.f32.mrf.mxu1 }
 0x121   :  { %4601 = vst [vmem:[#allocation38_spill] sm:$0xff] %v3729_v0 }
 0x122   :  { %4602 = vst [vmem:[#allocation39_spill] sm:$0xff] %v3731_v13 }
 0x126   :  { %v3733_v4 = vpop.f32.mrf.mxu2 }
 0x127   :  { %4603 = vst [vmem:[#allocation40_spill] sm:$0xff] %v3733_v4  ;;  %v784_v4 = vpop.f32.mrf.mxu0 }
 0x128   :  { %v3735_v59 = vpop.f32.mrf.mxu3  ;;  %v3737_v28 = vpop.f32.mrf.mxu1 }
 0x129   :  { %4604 = vst [vmem:[#allocation41_spill] sm:$0xff] %v3735_v59  ;;  %v320_v59 = vadd.f32 %v3542_v44, %v3569_v56 }
 0x12a   :  { %4605 = vst [vmem:[#allocation42_spill] sm:$0xff] %v3737_v28 }
 0x12e   :  { %v3739_v12 = vpop.f32.mrf.mxu2 }
 0x12f   :  { %4606 = vst [vmem:[#allocation43_spill] sm:$0xff] %v3739_v12 }
 0x130   :  { %v3741_v38 = vpop.f32.mrf.mxu1  ;;  %v3743_v5 = vpop.f32.mrf.mxu3 }
 0x131   :  { %4607 = vst [vmem:[#allocation44_spill] sm:$0xff] %v3741_v38 }
 0x132   :  { %4608 = vst [vmem:[#allocation45_spill] sm:$0xff] %v3743_v5  ;;  %v831_v5 = vadd.f32 %v784_v4, %v320_v59  ;;  %v3776_v4 = vperm.slane %v3548_v52, 3 }
 0x136   :  { %v3745_v63 = vpop.f32.mrf.mxu2 }
 0x137   :  { %4609 = vst [vmem:[#allocation46_spill] sm:$0xff] %v3745_v63  ;;  %v3764_v63 = vperm.slane %v3548_v52, 1 }
 0x138   :  { %v3747_v47 = vpop.f32.mrf.mxu1  ;;  %v3749_v30 = vpop.f32.mrf.mxu3 }
 0x139   :  { %4610 = vst [vmem:[#allocation47_spill] sm:$0xff] %v3747_v47  ;;  %v786_v47 = vpop.f32.mrf.mxu0  ;;  %v369_v44 = vadd.f32 %v3648_v46, %v3764_v63  ;;  %v467_v46 = vadd.f32 %v3638_v31, %v3776_v4 }
 0x13a   :  { %4611 = vst [vmem:[#allocation48_spill] sm:$0xff] %v3749_v30  ;;  %v322_v30 = vadd.f32 %v3583_v2, %v3569_v56 }
 0x13e   :  { %v3751_v0 = vpop.f32.mrf.mxu2 }
 0x13f   :  { %4612 = vst [vmem:[#allocation49_spill] sm:$0xff] %v3751_v0  ;;  %v839_v0 = vmul.f32 0.5, %v831_v5 }
 0x140   :  { %v3753_v13 = vpop.f32.mrf.mxu1  ;;  %v3757_v28 = vpop.f32.mrf.mxu3 }
 0x141   :  { %4613 = vst [vmem:[#allocation50_spill] sm:$0xff] %v3753_v13  ;;  %2783 = vtanh.f32 %v839_v0  ;;  %v371_v0 = vadd.f32 %v3660_v27, %v3764_v63 }
 0x142   :  { %4614 = vst [vmem:[#allocation51_spill] sm:$0xff] %v3757_v28  ;;  %v835_v28 = vadd.f32 %v786_v47, %v322_v30 }
 0x144   :  { %v840_v2 = vmul.f32 0.5, %v835_v28 }
 0x146   :  { %v3759_v12 = vpop.f32.mrf.mxu2 }
 0x147   :  { %4615 = vst [vmem:[#allocation52_spill] sm:$0xff] %v3759_v12  ;;  %v2784_v30 = vpop.eup %2783 }
 0x148   :  { %v3761_v38 = vpop.f32.mrf.mxu1  ;;  %v826_v15 = vpop.f32.mrf.mxu3  ;;  %v843_v28 = vmul.f32 0.5, %v2784_v30 }
 0x149   :  { %4616 = vst [vmem:[#allocation53_spill] sm:$0xff] %v3761_v38  ;;  %v3773_v38 = vperm.slane %v3548_v52, 2 }
 0x14a   :  { %v845_v27 = vadd.f32 0.5, %v843_v28 }
 0x14b   :  { %v418_v5 = vadd.f32 %v3656_v48, %v3773_v38  ;;  %v469_v48 = vadd.f32 %v3646_v42, %v3776_v4  ;;  %v420_v53 = vadd.f32 %v3668_v1, %v3773_v38 }
 0x14e   :  { %v3768_v13 = vpop.f32.mrf.mxu2 }
 0x14f   :  { %4617 = vst [vmem:[#allocation54_spill] sm:$0xff] %v3768_v13 }
 0x150   :  { %v798_v37 = vpop.f32.mrf.mxu1  ;;  %v828_v52 = vpop.f32.mrf.mxu3 }
 0x151   :  { %v832_v59 = vadd.f32 %v798_v37, %v369_v44  ;;  %v834_v37 = vadd.f32 %v826_v15, %v467_v46  ;;  %v838_v31 = vadd.f32 %v828_v52, %v469_v48 }
 0x153   :  { %v847_v12 = vmul.f32 0.5, %v832_v59  ;;  %v857_v24 = vmul.f32 0.5, %v834_v37  ;;  %v858_v42 = vmul.f32 0.5, %v838_v31 }
 0x155   :  { %2785 = vtanh.f32 %v847_v12 }
 0x156   :  { %v812_v13 = vpop.f32.mrf.mxu2  ;;  %2787 = vtanh.f32 %v840_v2 }
 0x157   :  { %v833_v47 = vadd.f32 %v812_v13, %v418_v5  ;;  %v40_v13 = vld [vmem:[%s4561_s7] sm:$0xff] }
 0x158   :  { %v800_v44 = vpop.f32.mrf.mxu1 }
 0x159   :  { %2789 = vtanh.f32 %v833_v47  ;;  %v836_v59 = vadd.f32 %v800_v44, %v371_v0 }
 0x15b   :  { %v2786_v12 = vpop.eup %2785  ;;  %v848_v22 = vmul.f32 0.5, %v836_v59 }
 0x15c   :  { %v851_v36 = vmul.f32 0.5, %v2786_v12  ;;  %v2788_v15 = vpop.eup %2787 }
 0x15d   :  { %2791 = vtanh.f32 %v848_v22  ;;  %v844_v37 = vmul.f32 0.5, %v2788_v15  ;;  %v41_v22 = vld [vmem:[%s4561_s7 + $0x8] sm:$0xff] }
 0x15e   :  { %v853_v2 = vadd.f32 0.5, %v851_v36  ;;  %v814_v5 = vpop.f32.mrf.mxu2  ;;  %2793 = vtanh.f32 %v857_v24 }
 0x15f   :  { %v2790_v46 = vpop.eup %2789  ;;  %v837_v30 = vadd.f32 %v814_v5, %v420_v53  ;;  %v846_v36 = vadd.f32 0.5, %v844_v37 }
 0x160   :  { %v865_v0 = vmul.f32 %v853_v2, %v40_v13  ;;  %v867_v47 = vmul.f32 %v2790_v46, %v845_v27 }
 0x161   :  { %2795 = vtanh.f32 %v837_v30 }
 0x162   :  { %v3791_v44 = vadd.f32 %v867_v47, %v865_v0  ;;  %2797 = vtanh.f32 %v858_v42 }
 0x163   :  { %v2792_v1 = vpop.eup %2791 }
 0x164   :  { %v852_v52 = vmul.f32 0.5, %v2792_v1  ;;  %v2794_v59 = vpop.eup %2793  ;;  %2799 = vtanh.f32 %v3791_v44 }
 0x165   :  { %v861_v12 = vmul.f32 0.5, %v2794_v59  ;;  %v374_v59 = vadd.f32 %v3672_v62, %v3764_v63  ;;  %v4618_v62 = vld [vmem:[#allocation18_spill] sm:$0xff] }
 0x166   :  { %v854_v53 = vadd.f32 0.5, %v852_v52 }
 0x167   :  { %v2796_v24 = vpop.eup %2795  ;;  %v863_v27 = vadd.f32 0.5, %v861_v12 }
 0x168   :  { %v866_v28 = vmul.f32 %v854_v53, %v41_v22  ;;  %v868_v48 = vmul.f32 %v2796_v24, %v846_v36  ;;  %v2798_v31 = vpop.eup %2797 }
 0x169   :  { %v862_v2 = vmul.f32 0.5, %v2798_v31  ;;  %v423_v31 = vadd.f32 %v3679_v6, %v3773_v38 }
 0x16a   :  { %v3797_v13 = vadd.f32 %v868_v48, %v866_v28  ;;  %v2800_v15 = vpop.eup %2799 }
 0x16b   :  { %v873_v5 = vmul.f32 %v2800_v15, %v863_v27  ;;  %v864_v46 = vadd.f32 0.5, %v862_v2  ;;  %v327_v15 = vadd.f32 %v3612_v16, %v3569_v56  ;;  %v472_v27 = vadd.f32 %v3658_v54, %v3776_v4  ;;  %v4619_v54 = vld [vmem:[#allocation16_spill] sm:$0xff] }
 0x16c   :  { %2801 = vtanh.f32 %v3797_v13  ;;  %v376_v2 = vadd.f32 %v4618_v62, %v3764_v63 }
 0x16d   :  { %v875_v0 = vpack.c.bf16 %v873_v5, %v873_v5 }
 0x16f   :  { %v890_v1 = vunpack.c.l.b16 %v875_v0 }
 0x172   :  { %v2802_v30 = vpop.eup %2801 }
 0x173   :  { %v874_v42 = vmul.f32 %v2802_v30, %v864_v46 }
 0x175   :  { %v876_v47 = vpack.c.bf16 %v874_v42, %v874_v42  ;;  %v2729_v37 = vpack.c.bf16 %v874_v42, %v873_v5 }
 0x177   :  { %2730 = vst [vmem:[#allocation3 + $0x30] sm:$0xff] %v2729_v37   ;;  %v891_v52 = vunpack.c.l.b16 %v876_v47 }
 0x179   :  { %v892_v22 = vpack.c.b16 %v891_v52, %v890_v1 }
 0x17b   :  { %902 = vmatmul.bf16.vlgmr.msrb.gmra.mxu0 %v892_v22  ;;  %916 = vmatmul.bf16.vlgmr.msrb.gmra.mxu1 %v892_v22 }
 0x17c   :  { %930 = vmatmul.bf16.vlgmr.msrb.gmra.mxu2 %v892_v22  ;;  %944 = vmatmul.bf16.vlgmr.msrb.gmra.mxu3 %v892_v22 }
 0x17d   :  { %1134 = vmatpush.bf16.msrb.mxu0 %v3016_v7  ;;  %1148 = vmatpush.bf16.msrb.mxu1 %v3325_v19 }
 0x17e   :  { %1162 = vmatpush.bf16.msrb.mxu2 %v3327_v20  ;;  %1176 = vmatpush.bf16.msrb.mxu3 %v3336_v25 }
 0x181   :  { %1135 = vmatpush.bf16.msrb.mxu0 %v3025_v11  ;;  %1149 = vmatpush.bf16.msrb.mxu1 %v3362_v32 }
 0x182   :  { %1163 = vmatpush.bf16.msrb.mxu2 %v3373_v39  ;;  %1177 = vmatpush.bf16.msrb.mxu3 %v3375_v40 }
 0x185   :  { %1136 = vmatpush.bf16.msrb.mxu0 %v3040_v17  ;;  %1150 = vmatpush.bf16.msrb.mxu1 %v3396_v45 }
 0x186   :  { %1164 = vmatpush.bf16.msrb.mxu2 %v3407_v49  ;;  %1178 = vmatpush.bf16.msrb.mxu3 %v3409_v50 }
 0x189   :  { %1137 = vmatpush.bf16.msrb.mxu0 %v3055_v23  ;;  %1151 = vmatpush.bf16.msrb.mxu1 %v3428_v57 }
 0x18a   :  { %1165 = vmatpush.bf16.msrb.mxu2 %v3439_v60  ;;  %1179 = vmatpush.bf16.msrb.mxu3 %v3441_v61 }
 0x18d   :  { %1138 = vmatpush.bf16.msrb.mxu0 %v3070_v29  ;;  %1152 = vmatpush.bf16.msrb.mxu1 %v3456_v3 }
 0x18e   :  { %1166 = vmatpush.bf16.msrb.mxu2 %v3467_v8  ;;  %1180 = vmatpush.bf16.msrb.mxu3 %v3469_v9 }
 0x191   :  { %1139 = vmatpush.bf16.msrb.mxu0 %v3085_v35  ;;  %1153 = vmatpush.bf16.msrb.mxu1 %v3486_v14 }
 0x192   :  { %1167 = vmatpush.bf16.msrb.mxu2 %v3497_v18  ;;  %1181 = vmatpush.bf16.msrb.mxu3 %v3499_v21 }
 0x195   :  { %1140 = vmatpush.bf16.msrb.mxu0 %v3100_v41  ;;  %1154 = vmatpush.bf16.msrb.mxu1 %v3516_v26 }
 0x196   :  { %1168 = vmatpush.bf16.msrb.mxu2 %v3527_v33  ;;  %1182 = vmatpush.bf16.msrb.mxu3 %v3529_v34 }
 0x199   :  { %1141 = vmatpush.bf16.msrb.mxu0 %v3127_v51  ;;  %1155 = vmatpush.bf16.msrb.mxu1 %v3563_v55 }
 0x19a   :  { %1169 = vmatpush.bf16.msrb.mxu2 %v3571_v58  ;;  %1183 = vmatpush.bf16.msrb.mxu3 %v3540_v43 }
 0x1f8   :  { %v903_v36 = vpop.f32.mrf.mxu0  ;;  %v917_v53 = vpop.f32.mrf.mxu1 }
 0x1f9   :  { %v950_v24 = vadd.f32 %v903_v36, %v3597_v10  ;;  %v951_v28 = vadd.f32 %v917_v53, %v374_v59  ;;  %v474_v53 = vadd.f32 %v4619_v54, %v3776_v4 }
 0x1fb   :  { %v958_v48 = vmul.f32 0.5, %v950_v24  ;;  %v966_v12 = vmul.f32 0.5, %v951_v28  ;;  %v4620_v24 = vld [vmem:[#allocation19_spill] sm:$0xff] }
 0x1fc   :  { %v425_v28 = vadd.f32 %v4620_v24, %v3773_v38 }
 0x1fd   :  { %2803 = vtanh.f32 %v958_v48 }
 0x1fe   :  { %2805 = vtanh.f32 %v966_v12 }
 0x1ff   :  { %v931_v5 = vpop.f32.mrf.mxu2  ;;  %v945_v46 = vpop.f32.mrf.mxu3 }
 0x200   :  { %v952_v10 = vadd.f32 %v931_v5, %v423_v31  ;;  %v905_v30 = vpop.f32.mrf.mxu0  ;;  %v919_v42 = vpop.f32.mrf.mxu1  ;;  %v953_v0 = vadd.f32 %v945_v46, %v472_v27 }
 0x201   :  { %v954_v47 = vadd.f32 %v905_v30, %v327_v15  ;;  %v955_v37 = vadd.f32 %v919_v42, %v376_v2 }
 0x202   :  { %2807 = vtanh.f32 %v952_v10  ;;  %v976_v36 = vmul.f32 0.5, %v953_v0 }
 0x203   :  { %v2804_v6 = vpop.eup %2803  ;;  %v959_v1 = vmul.f32 0.5, %v954_v47  ;;  %v967_v52 = vmul.f32 0.5, %v955_v37 }
 0x204   :  { %v2806_v22 = vpop.eup %2805  ;;  %v962_v16 = vmul.f32 0.5, %v2804_v6 }
 0x205   :  { %v970_v59 = vmul.f32 0.5, %v2806_v22  ;;  %2809 = vtanh.f32 %v959_v1 }
 0x206   :  { %v964_v48 = vadd.f32 0.5, %v962_v16  ;;  %2811 = vtanh.f32 %v967_v52 }
 0x207   :  { %v972_v12 = vadd.f32 0.5, %v970_v59  ;;  %v933_v31 = vpop.f32.mrf.mxu2  ;;  %v947_v15 = vpop.f32.mrf.mxu3  ;;  %2813 = vtanh.f32 %v976_v36 }
 0x208   :  { %v2808_v27 = vpop.eup %2807  ;;  %v956_v62 = vadd.f32 %v933_v31, %v425_v28  ;;  %v957_v2 = vadd.f32 %v947_v15, %v474_v53 }
 0x209   :  { %v984_v5 = vmul.f32 %v972_v12, %v3791_v44  ;;  %v986_v46 = vmul.f32 %v2808_v27, %v964_v48 }
 0x20a   :  { %2815 = vtanh.f32 %v956_v62  ;;  %v977_v10 = vmul.f32 0.5, %v957_v2 }
 0x20b   :  { %v2810_v30 = vpop.eup %2809  ;;  %v3848_v42 = vadd.f32 %v986_v46, %v984_v5 }
 0x20c   :  { %v2812_v0 = vpop.eup %2811  ;;  %v963_v47 = vmul.f32 0.5, %v2810_v30  ;;  %2817 = vtanh.f32 %v977_v10  ;;  %v4621_v10 = vld [vmem:[#allocation21_spill] sm:$0xff] }
 0x20d   :  { %v971_v37 = vmul.f32 0.5, %v2812_v0  ;;  %v2814_v1 = vpop.eup %2813  ;;  %2819 = vtanh.f32 %v3848_v42  ;;  %v379_v30 = vadd.f32 %v4621_v10, %v3764_v63 }
 0x20e   :  { %v965_v6 = vadd.f32 0.5, %v963_v47  ;;  %v980_v59 = vmul.f32 0.5, %v2814_v1 }
 0x20f   :  { %v973_v52 = vadd.f32 0.5, %v971_v37  ;;  %v4622_v37 = vld [vmem:[#allocation12_spill] sm:$0xff] }
 0x210   :  { %v2816_v22 = vpop.eup %2815  ;;  %v982_v24 = vadd.f32 0.5, %v980_v59  ;;  %v4624_v59 = vld [vmem:[#allocation14_spill] sm:$0xff] }
 0x211   :  { %v985_v16 = vmul.f32 %v973_v52, %v3797_v13  ;;  %v987_v44 = vmul.f32 %v2816_v22, %v965_v6 }
 0x212   :  { %v2818_v36 = vpop.eup %2817 }
 0x213   :  { %v3852_v54 = vadd.f32 %v987_v44, %v985_v16  ;;  %v2820_v53 = vpop.eup %2819  ;;  %v981_v28 = vmul.f32 0.5, %v2818_v36  ;;  %v4623_v16 = vld [vmem:[#allocation22_spill] sm:$0xff]  ;;  %v332_v36 = vadd.f32 %v4624_v59, %v3569_v56 }
 0x214   :  { %v992_v48 = vmul.f32 %v2820_v53, %v982_v24  ;;  %v428_v44 = vadd.f32 %v4623_v16, %v3773_v38  ;;  %v4625_v53 = vld [vmem:[#allocation17_spill] sm:$0xff] }
 0x215   :  { %2821 = vtanh.f32 %v3852_v54  ;;  %v983_v12 = vadd.f32 0.5, %v981_v28  ;;  %v477_v24 = vadd.f32 %v4625_v53, %v3776_v4  ;;  %v4626_v28 = vld [vmem:[#allocation24_spill] sm:$0xff] }
 0x216   :  { %v994_v15 = vpack.c.bf16 %v992_v48, %v992_v48 }
 0x218   :  { %v1010_v5 = vunpack.c.l.b16 %v994_v15 }
 0x21b   :  { %v2822_v31 = vpop.eup %2821 }
 0x21c   :  { %v993_v27 = vmul.f32 %v2822_v31, %v983_v12 }
 0x21e   :  { %v995_v62 = vpack.c.bf16 %v993_v27, %v993_v27  ;;  %v2734_v2 = vpack.c.bf16 %v993_v27, %v992_v48  ;;  %v381_v48 = vadd.f32 %v4626_v28, %v3764_v63 }
 0x220   :  { %2735 = vst [vmem:[#allocation3] sm:$0xff] %v2734_v2   ;;  %v1011_v13 = vunpack.c.l.b16 %v995_v62 }
 0x222   :  { %v1012_v46 = vpack.c.b16 %v1011_v13, %v1010_v5 }
 0x224   :  { %1022 = vmatmul.bf16.vlgmr.msra.gmra.mxu0 %v1012_v46  ;;  %1036 = vmatmul.bf16.vlgmr.msra.gmra.mxu1 %v1012_v46 }
 0x225   :  { %1050 = vmatmul.bf16.vlgmr.msra.gmra.mxu2 %v1012_v46  ;;  %1064 = vmatmul.bf16.vlgmr.msra.gmra.mxu3 %v1012_v46 }
 0x226   :  { %1254 = vmatpush.bf16.msra.mxu0 %v3016_v7  ;;  %1268 = vmatpush.bf16.msra.mxu1 %v3325_v19 }
 0x227   :  { %1282 = vmatpush.bf16.msra.mxu2 %v3327_v20  ;;  %1296 = vmatpush.bf16.msra.mxu3 %v3336_v25 }
 0x22a   :  { %1255 = vmatpush.bf16.msra.mxu0 %v3025_v11  ;;  %1269 = vmatpush.bf16.msra.mxu1 %v3362_v32 }
 0x22b   :  { %1283 = vmatpush.bf16.msra.mxu2 %v3373_v39  ;;  %1297 = vmatpush.bf16.msra.mxu3 %v3375_v40 }
 0x22e   :  { %1256 = vmatpush.bf16.msra.mxu0 %v3040_v17  ;;  %1270 = vmatpush.bf16.msra.mxu1 %v3396_v45 }
 0x22f   :  { %1284 = vmatpush.bf16.msra.mxu2 %v3407_v49  ;;  %1298 = vmatpush.bf16.msra.mxu3 %v3409_v50 }
 0x232   :  { %1257 = vmatpush.bf16.msra.mxu0 %v3055_v23  ;;  %1271 = vmatpush.bf16.msra.mxu1 %v3428_v57 }
 0x233   :  { %1285 = vmatpush.bf16.msra.mxu2 %v3439_v60  ;;  %1299 = vmatpush.bf16.msra.mxu3 %v3441_v61 }
 0x236   :  { %1258 = vmatpush.bf16.msra.mxu0 %v3070_v29  ;;  %1272 = vmatpush.bf16.msra.mxu1 %v3456_v3 }
 0x237   :  { %1286 = vmatpush.bf16.msra.mxu2 %v3467_v8  ;;  %1300 = vmatpush.bf16.msra.mxu3 %v3469_v9 }
 0x23a   :  { %1259 = vmatpush.bf16.msra.mxu0 %v3085_v35  ;;  %1273 = vmatpush.bf16.msra.mxu1 %v3486_v14 }
 0x23b   :  { %1287 = vmatpush.bf16.msra.mxu2 %v3497_v18  ;;  %1301 = vmatpush.bf16.msra.mxu3 %v3499_v21 }
 0x23e   :  { %1260 = vmatpush.bf16.msra.mxu0 %v3100_v41  ;;  %1274 = vmatpush.bf16.msra.mxu1 %v3516_v26 }
 0x23f   :  { %1288 = vmatpush.bf16.msra.mxu2 %v3527_v33  ;;  %1302 = vmatpush.bf16.msra.mxu3 %v3529_v34 }
 0x242   :  { %1261 = vmatpush.bf16.msra.mxu0 %v3127_v51  ;;  %1275 = vmatpush.bf16.msra.mxu1 %v3563_v55 }
 0x243   :  { %1289 = vmatpush.bf16.msra.mxu2 %v3571_v58  ;;  %1303 = vmatpush.bf16.msra.mxu3 %v3540_v43 }
 0x2a1   :  { %v1023_v0 = vpop.f32.mrf.mxu0  ;;  %v1037_v47 = vpop.f32.mrf.mxu1 }
 0x2a2   :  { %v1070_v6 = vadd.f32 %v1023_v0, %v4622_v37  ;;  %v1071_v1 = vadd.f32 %v1037_v47, %v379_v30 }
 0x2a4   :  { %v1078_v52 = vmul.f32 0.5, %v1070_v6  ;;  %v1086_v22 = vmul.f32 0.5, %v1071_v1  ;;  %v4627_v1 = vld [vmem:[#allocation20_spill] sm:$0xff] }
 0x2a6   :  { %2823 = vtanh.f32 %v1078_v52  ;;  %v479_v52 = vadd.f32 %v4627_v1, %v3776_v4 }
 0x2a7   :  { %2825 = vtanh.f32 %v1086_v22  ;;  %v4628_v22 = vld [vmem:[#allocation25_spill] sm:$0xff] }
 0x2a8   :  { %v1051_v12 = vpop.f32.mrf.mxu2  ;;  %v1065_v31 = vpop.f32.mrf.mxu3  ;;  %v430_v16 = vadd.f32 %v4628_v22, %v3773_v38 }
 0x2a9   :  { %v1072_v15 = vadd.f32 %v1051_v12, %v428_v44  ;;  %v1025_v27 = vpop.f32.mrf.mxu0  ;;  %v1039_v62 = vpop.f32.mrf.mxu1  ;;  %v1073_v2 = vadd.f32 %v1065_v31, %v477_v24 }
 0x2aa   :  { %v1074_v5 = vadd.f32 %v1025_v27, %v332_v36  ;;  %v1075_v13 = vadd.f32 %v1039_v62, %v381_v48 }
 0x2ab   :  { %2827 = vtanh.f32 %v1072_v15  ;;  %v1096_v6 = vmul.f32 0.5, %v1073_v2 }
 0x2ac   :  { %v2824_v46 = vpop.eup %2823  ;;  %v1079_v10 = vmul.f32 0.5, %v1074_v5  ;;  %v1087_v30 = vmul.f32 0.5, %v1075_v13 }
 0x2ad   :  { %v2826_v0 = vpop.eup %2825  ;;  %v1082_v47 = vmul.f32 0.5, %v2824_v46 }
 0x2ae   :  { %v1090_v37 = vmul.f32 0.5, %v2826_v0  ;;  %2829 = vtanh.f32 %v1079_v10 }
 0x2af   :  { %v1084_v44 = vadd.f32 0.5, %v1082_v47  ;;  %2831 = vtanh.f32 %v1087_v30 }
 0x2b0   :  { %v1092_v59 = vadd.f32 0.5, %v1090_v37  ;;  %v1053_v36 = vpop.f32.mrf.mxu2  ;;  %v1067_v53 = vpop.f32.mrf.mxu3  ;;  %2833 = vtanh.f32 %v1096_v6 }
 0x2b1   :  { %v2828_v24 = vpop.eup %2827  ;;  %v1076_v28 = vadd.f32 %v1053_v36, %v430_v16  ;;  %v1077_v48 = vadd.f32 %v1067_v53, %v479_v52 }
 0x2b2   :  { %v1104_v12 = vmul.f32 %v1092_v59, %v3848_v42  ;;  %v1106_v31 = vmul.f32 %v2828_v24, %v1084_v44 }
 0x2b3   :  { %2835 = vtanh.f32 %v1076_v28  ;;  %v1097_v15 = vmul.f32 0.5, %v1077_v48 }
 0x2b4   :  { %v2830_v27 = vpop.eup %2829  ;;  %v3903_v62 = vadd.f32 %v1106_v31, %v1104_v12 }
 0x2b5   :  { %v2832_v2 = vpop.eup %2831  ;;  %v1083_v5 = vmul.f32 0.5, %v2830_v27  ;;  %2837 = vtanh.f32 %v1097_v15  ;;  %v4629_v15 = vld [vmem:[#allocation27_spill] sm:$0xff] }
 0x2b6   :  { %v1091_v13 = vmul.f32 0.5, %v2832_v2  ;;  %v2834_v10 = vpop.eup %2833  ;;  %2839 = vtanh.f32 %v3903_v62  ;;  %v384_v27 = vadd.f32 %v4629_v15, %v3764_v63 }
 0x2b7   :  { %v1085_v46 = vadd.f32 0.5, %v1083_v5  ;;  %v1100_v37 = vmul.f32 0.5, %v2834_v10 }
 0x2b8   :  { %v1093_v30 = vadd.f32 0.5, %v1091_v13  ;;  %v4630_v13 = vld [vmem:[#allocation4_spill] sm:$0xff] }
 0x2b9   :  { %v2836_v0 = vpop.eup %2835  ;;  %v1102_v22 = vadd.f32 0.5, %v1100_v37  ;;  %v4632_v37 = vld [vmem:[#allocation6_spill] sm:$0xff] }
 0x2ba   :  { %v1105_v47 = vmul.f32 %v1093_v30, %v3852_v54  ;;  %v1107_v42 = vmul.f32 %v2836_v0, %v1085_v46 }
 0x2bb   :  { %v2838_v6 = vpop.eup %2837 }
 0x2bc   :  { %v3907_v1 = vadd.f32 %v1107_v42, %v1105_v47  ;;  %v2840_v52 = vpop.eup %2839  ;;  %v1101_v16 = vmul.f32 0.5, %v2838_v6  ;;  %v4631_v47 = vld [vmem:[#allocation28_spill] sm:$0xff]  ;;  %v337_v6 = vadd.f32 %v4632_v37, %v3569_v56 }
 0x2bd   :  { %v1112_v44 = vmul.f32 %v2840_v52, %v1102_v22  ;;  %v433_v42 = vadd.f32 %v4631_v47, %v3773_v38  ;;  %v4633_v52 = vld [vmem:[#allocation23_spill] sm:$0xff] }
 0x2be   :  { %2841 = vtanh.f32 %v3907_v1  ;;  %v1103_v59 = vadd.f32 0.5, %v1101_v16  ;;  %v482_v22 = vadd.f32 %v4633_v52, %v3776_v4  ;;  %v4634_v16 = vld [vmem:[#allocation30_spill] sm:$0xff] }
 0x2bf   :  { %v1114_v53 = vpack.c.bf16 %v1112_v44, %v1112_v44 }
 0x2c1   :  { %v1130_v12 = vunpack.c.l.b16 %v1114_v53 }
 0x2c4   :  { %v2842_v36 = vpop.eup %2841 }
 0x2c5   :  { %v1113_v24 = vmul.f32 %v2842_v36, %v1103_v59 }
 0x2c7   :  { %v1115_v28 = vpack.c.bf16 %v1113_v24, %v1113_v24  ;;  %v2739_v48 = vpack.c.bf16 %v1113_v24, %v1112_v44  ;;  %v386_v44 = vadd.f32 %v4634_v16, %v3764_v63 }
 0x2c9   :  { %2740 = vst [vmem:[#allocation3 + $0x18] sm:$0xff] %v2739_v48   ;;  %v1131_v54 = vunpack.c.l.b16 %v1115_v28 }
 0x2cb   :  { %v1132_v31 = vpack.c.b16 %v1131_v54, %v1130_v12 }
 0x2cd   :  { %1142 = vmatmul.bf16.vlgmr.msrb.gmra.mxu0 %v1132_v31  ;;  %1156 = vmatmul.bf16.vlgmr.msrb.gmra.mxu1 %v1132_v31 }
 0x2ce   :  { %1170 = vmatmul.bf16.vlgmr.msrb.gmra.mxu2 %v1132_v31  ;;  %1184 = vmatmul.bf16.vlgmr.msrb.gmra.mxu3 %v1132_v31 }
 0x2cf   :  { %1374 = vmatpush.bf16.msrb.mxu0 %v3016_v7  ;;  %1388 = vmatpush.bf16.msrb.mxu1 %v3325_v19 }
 0x2d0   :  { %1402 = vmatpush.bf16.msrb.mxu2 %v3327_v20  ;;  %1416 = vmatpush.bf16.msrb.mxu3 %v3336_v25 }
 0x2d3   :  { %1375 = vmatpush.bf16.msrb.mxu0 %v3025_v11  ;;  %1389 = vmatpush.bf16.msrb.mxu1 %v3362_v32 }
 0x2d4   :  { %1403 = vmatpush.bf16.msrb.mxu2 %v3373_v39  ;;  %1417 = vmatpush.bf16.msrb.mxu3 %v3375_v40 }
 0x2d7   :  { %1376 = vmatpush.bf16.msrb.mxu0 %v3040_v17  ;;  %1390 = vmatpush.bf16.msrb.mxu1 %v3396_v45 }
 0x2d8   :  { %1404 = vmatpush.bf16.msrb.mxu2 %v3407_v49  ;;  %1418 = vmatpush.bf16.msrb.mxu3 %v3409_v50 }
 0x2db   :  { %1377 = vmatpush.bf16.msrb.mxu0 %v3055_v23  ;;  %1391 = vmatpush.bf16.msrb.mxu1 %v3428_v57 }
 0x2dc   :  { %1405 = vmatpush.bf16.msrb.mxu2 %v3439_v60  ;;  %1419 = vmatpush.bf16.msrb.mxu3 %v3441_v61 }
 0x2df   :  { %1378 = vmatpush.bf16.msrb.mxu0 %v3070_v29  ;;  %1392 = vmatpush.bf16.msrb.mxu1 %v3456_v3 }
 0x2e0   :  { %1406 = vmatpush.bf16.msrb.mxu2 %v3467_v8  ;;  %1420 = vmatpush.bf16.msrb.mxu3 %v3469_v9 }
 0x2e3   :  { %1379 = vmatpush.bf16.msrb.mxu0 %v3085_v35  ;;  %1393 = vmatpush.bf16.msrb.mxu1 %v3486_v14 }
 0x2e4   :  { %1407 = vmatpush.bf16.msrb.mxu2 %v3497_v18  ;;  %1421 = vmatpush.bf16.msrb.mxu3 %v3499_v21 }
 0x2e7   :  { %1380 = vmatpush.bf16.msrb.mxu0 %v3100_v41  ;;  %1394 = vmatpush.bf16.msrb.mxu1 %v3516_v26 }
 0x2e8   :  { %1408 = vmatpush.bf16.msrb.mxu2 %v3527_v33  ;;  %1422 = vmatpush.bf16.msrb.mxu3 %v3529_v34 }
 0x2eb   :  { %1381 = vmatpush.bf16.msrb.mxu0 %v3127_v51  ;;  %1395 = vmatpush.bf16.msrb.mxu1 %v3563_v55 }
 0x2ec   :  { %1409 = vmatpush.bf16.msrb.mxu2 %v3571_v58  ;;  %1423 = vmatpush.bf16.msrb.mxu3 %v3540_v43 }
 0x34a   :  { %v1143_v2 = vpop.f32.mrf.mxu0  ;;  %v1157_v5 = vpop.f32.mrf.mxu1 }
 0x34b   :  { %v1190_v46 = vadd.f32 %v1143_v2, %v4630_v13  ;;  %v1191_v10 = vadd.f32 %v1157_v5, %v384_v27 }
 0x34d   :  { %v1198_v30 = vmul.f32 0.5, %v1190_v46  ;;  %v1206_v0 = vmul.f32 0.5, %v1191_v10  ;;  %v4635_v10 = vld [vmem:[#allocation26_spill] sm:$0xff] }
 0x34f   :  { %2843 = vtanh.f32 %v1198_v30  ;;  %v484_v30 = vadd.f32 %v4635_v10, %v3776_v4 }
 0x350   :  { %2845 = vtanh.f32 %v1206_v0  ;;  %v4636_v0 = vld [vmem:[#allocation31_spill] sm:$0xff] }
 0x351   :  { %v1171_v59 = vpop.f32.mrf.mxu2  ;;  %v1185_v36 = vpop.f32.mrf.mxu3  ;;  %v435_v47 = vadd.f32 %v4636_v0, %v3773_v38 }
 0x352   :  { %v1192_v53 = vadd.f32 %v1171_v59, %v433_v42  ;;  %v1145_v24 = vpop.f32.mrf.mxu0  ;;  %v1159_v28 = vpop.f32.mrf.mxu1  ;;  %v1193_v48 = vadd.f32 %v1185_v36, %v482_v22 }
 0x353   :  { %v1194_v12 = vadd.f32 %v1145_v24, %v337_v6  ;;  %v1195_v54 = vadd.f32 %v1159_v28, %v386_v44 }
 0x354   :  { %2847 = vtanh.f32 %v1192_v53  ;;  %v1216_v46 = vmul.f32 0.5, %v1193_v48 }
 0x355   :  { %v2844_v31 = vpop.eup %2843  ;;  %v1199_v15 = vmul.f32 0.5, %v1194_v12  ;;  %v1207_v27 = vmul.f32 0.5, %v1195_v54 }
 0x356   :  { %v2846_v2 = vpop.eup %2845  ;;  %v1202_v5 = vmul.f32 0.5, %v2844_v31 }
 0x357   :  { %v1210_v13 = vmul.f32 0.5, %v2846_v2  ;;  %2849 = vtanh.f32 %v1199_v15 }
 0x358   :  { %v1204_v42 = vadd.f32 0.5, %v1202_v5  ;;  %2851 = vtanh.f32 %v1207_v27 }
 0x359   :  { %v1212_v37 = vadd.f32 0.5, %v1210_v13  ;;  %v1173_v6 = vpop.f32.mrf.mxu2  ;;  %v1187_v52 = vpop.f32.mrf.mxu3  ;;  %2853 = vtanh.f32 %v1216_v46 }
 0x35a   :  { %v2848_v22 = vpop.eup %2847  ;;  %v1196_v16 = vadd.f32 %v1173_v6, %v435_v47  ;;  %v1197_v44 = vadd.f32 %v1187_v52, %v484_v30 }
 0x35b   :  { %v1224_v59 = vmul.f32 %v1212_v37, %v3903_v62  ;;  %v1226_v36 = vmul.f32 %v2848_v22, %v1204_v42 }
 0x35c   :  { %2855 = vtanh.f32 %v1196_v16  ;;  %v1217_v53 = vmul.f32 0.5, %v1197_v44 }
 0x35d   :  { %v2850_v24 = vpop.eup %2849  ;;  %v3958_v28 = vadd.f32 %v1226_v36, %v1224_v59 }
 0x35e   :  { %v2852_v48 = vpop.eup %2851  ;;  %v1203_v12 = vmul.f32 0.5, %v2850_v24  ;;  %2857 = vtanh.f32 %v1217_v53  ;;  %v4637_v53 = vld [vmem:[#allocation33_spill] sm:$0xff] }
 0x35f   :  { %v1211_v54 = vmul.f32 0.5, %v2852_v48  ;;  %v2854_v15 = vpop.eup %2853  ;;  %2859 = vtanh.f32 %v3958_v28  ;;  %v389_v24 = vadd.f32 %v4637_v53, %v3764_v63 }
 0x360   :  { %v1205_v31 = vadd.f32 0.5, %v1203_v12  ;;  %v1220_v13 = vmul.f32 0.5, %v2854_v15 }
 0x361   :  { %v1213_v27 = vadd.f32 0.5, %v1211_v54  ;;  %v4638_v54 = vld [vmem:[#allocation8_spill] sm:$0xff] }
 0x362   :  { %v2856_v2 = vpop.eup %2855  ;;  %v1222_v0 = vadd.f32 0.5, %v1220_v13  ;;  %v4640_v13 = vld [vmem:[#allocation10_spill] sm:$0xff] }
 0x363   :  { %v1225_v5 = vmul.f32 %v1213_v27, %v3907_v1  ;;  %v1227_v62 = vmul.f32 %v2856_v2, %v1205_v31 }
 0x364   :  { %v2858_v46 = vpop.eup %2857 }
 0x365   :  { %v3962_v10 = vadd.f32 %v1227_v62, %v1225_v5  ;;  %v2860_v30 = vpop.eup %2859  ;;  %v1221_v47 = vmul.f32 0.5, %v2858_v46  ;;  %v4639_v5 = vld [vmem:[#allocation34_spill] sm:$0xff]  ;;  %v342_v46 = vadd.f32 %v4640_v13, %v3569_v56 }
 0x366   :  { %v1232_v42 = vmul.f32 %v2860_v30, %v1222_v0  ;;  %v438_v62 = vadd.f32 %v4639_v5, %v3773_v38  ;;  %v4641_v30 = vld [vmem:[#allocation29_spill] sm:$0xff] }
 0x367   :  { %2861 = vtanh.f32 %v3962_v10  ;;  %v1223_v37 = vadd.f32 0.5, %v1221_v47  ;;  %v487_v0 = vadd.f32 %v4641_v30, %v3776_v4  ;;  %v4642_v47 = vld [vmem:[#allocation36_spill] sm:$0xff] }
 0x368   :  { %v1234_v52 = vpack.c.bf16 %v1232_v42, %v1232_v42 }
 0x36a   :  { %v1250_v59 = vunpack.c.l.b16 %v1234_v52 }
 0x36d   :  { %v2862_v6 = vpop.eup %2861 }
 0x36e   :  { %v1233_v22 = vmul.f32 %v2862_v6, %v1223_v37 }
 0x370   :  { %v1235_v16 = vpack.c.bf16 %v1233_v22, %v1233_v22  ;;  %v2744_v44 = vpack.c.bf16 %v1233_v22, %v1232_v42  ;;  %v391_v42 = vadd.f32 %v4642_v47, %v3764_v63 }
 0x372   :  { %2745 = vst [vmem:[#allocation3 + $0x10] sm:$0xff] %v2744_v44   ;;  %v1251_v1 = vunpack.c.l.b16 %v1235_v16 }
 0x374   :  { %v1252_v36 = vpack.c.b16 %v1251_v1, %v1250_v59 }
 0x376   :  { %1262 = vmatmul.bf16.vlgmr.msra.gmra.mxu0 %v1252_v36  ;;  %1276 = vmatmul.bf16.vlgmr.msra.gmra.mxu1 %v1252_v36 }
 0x377   :  { %1290 = vmatmul.bf16.vlgmr.msra.gmra.mxu2 %v1252_v36  ;;  %1304 = vmatmul.bf16.vlgmr.msra.gmra.mxu3 %v1252_v36 }
 0x378   :  { %1494 = vmatpush.bf16.msra.mxu0 %v3016_v7  ;;  %1508 = vmatpush.bf16.msra.mxu1 %v3325_v19 }
 0x379   :  { %1522 = vmatpush.bf16.msra.mxu2 %v3327_v20  ;;  %1536 = vmatpush.bf16.msra.mxu3 %v3336_v25 }
 0x37c   :  { %1495 = vmatpush.bf16.msra.mxu0 %v3025_v11  ;;  %1509 = vmatpush.bf16.msra.mxu1 %v3362_v32 }
 0x37d   :  { %1523 = vmatpush.bf16.msra.mxu2 %v3373_v39  ;;  %1537 = vmatpush.bf16.msra.mxu3 %v3375_v40 }
 0x380   :  { %1496 = vmatpush.bf16.msra.mxu0 %v3040_v17  ;;  %1510 = vmatpush.bf16.msra.mxu1 %v3396_v45 }
 0x381   :  { %1524 = vmatpush.bf16.msra.mxu2 %v3407_v49  ;;  %1538 = vmatpush.bf16.msra.mxu3 %v3409_v50 }
 0x384   :  { %1497 = vmatpush.bf16.msra.mxu0 %v3055_v23  ;;  %1511 = vmatpush.bf16.msra.mxu1 %v3428_v57 }
 0x385   :  { %1525 = vmatpush.bf16.msra.mxu2 %v3439_v60  ;;  %1539 = vmatpush.bf16.msra.mxu3 %v3441_v61 }
 0x388   :  { %1498 = vmatpush.bf16.msra.mxu0 %v3070_v29  ;;  %1512 = vmatpush.bf16.msra.mxu1 %v3456_v3 }
 0x389   :  { %1526 = vmatpush.bf16.msra.mxu2 %v3467_v8  ;;  %1540 = vmatpush.bf16.msra.mxu3 %v3469_v9 }
 0x38c   :  { %1499 = vmatpush.bf16.msra.mxu0 %v3085_v35  ;;  %1513 = vmatpush.bf16.msra.mxu1 %v3486_v14 }
 0x38d   :  { %1527 = vmatpush.bf16.msra.mxu2 %v3497_v18  ;;  %1541 = vmatpush.bf16.msra.mxu3 %v3499_v21 }
 0x390   :  { %1500 = vmatpush.bf16.msra.mxu0 %v3100_v41  ;;  %1514 = vmatpush.bf16.msra.mxu1 %v3516_v26 }
 0x391   :  { %1528 = vmatpush.bf16.msra.mxu2 %v3527_v33  ;;  %1542 = vmatpush.bf16.msra.mxu3 %v3529_v34 }
 0x394   :  { %1501 = vmatpush.bf16.msra.mxu0 %v3127_v51  ;;  %1515 = vmatpush.bf16.msra.mxu1 %v3563_v55 }
 0x395   :  { %1529 = vmatpush.bf16.msra.mxu2 %v3571_v58  ;;  %1543 = vmatpush.bf16.msra.mxu3 %v3540_v43 }
 0x3f3   :  { %v1263_v48 = vpop.f32.mrf.mxu0  ;;  %v1277_v12 = vpop.f32.mrf.mxu1 }
 0x3f4   :  { %v1310_v31 = vadd.f32 %v1263_v48, %v4638_v54  ;;  %v1311_v15 = vadd.f32 %v1277_v12, %v389_v24 }
 0x3f6   :  { %v1318_v27 = vmul.f32 0.5, %v1310_v31  ;;  %v1326_v2 = vmul.f32 0.5, %v1311_v15  ;;  %v4643_v15 = vld [vmem:[#allocation32_spill] sm:$0xff] }
 0x3f8   :  { %2863 = vtanh.f32 %v1318_v27  ;;  %v489_v27 = vadd.f32 %v4643_v15, %v3776_v4 }
 0x3f9   :  { %2865 = vtanh.f32 %v1326_v2  ;;  %v4644_v2 = vld [vmem:[#allocation37_spill] sm:$0xff] }
 0x3fa   :  { %v1291_v37 = vpop.f32.mrf.mxu2  ;;  %v1305_v6 = vpop.f32.mrf.mxu3  ;;  %v440_v5 = vadd.f32 %v4644_v2, %v3773_v38 }
 0x3fb   :  { %v1312_v52 = vadd.f32 %v1291_v37, %v438_v62  ;;  %v1265_v22 = vpop.f32.mrf.mxu0  ;;  %v1279_v16 = vpop.f32.mrf.mxu1  ;;  %v1313_v44 = vadd.f32 %v1305_v6, %v487_v0 }
 0x3fc   :  { %v1314_v59 = vadd.f32 %v1265_v22, %v342_v46  ;;  %v1315_v1 = vadd.f32 %v1279_v16, %v391_v42 }
 0x3fd   :  { %2867 = vtanh.f32 %v1312_v52  ;;  %v1336_v31 = vmul.f32 0.5, %v1313_v44 }
 0x3fe   :  { %v2864_v36 = vpop.eup %2863  ;;  %v1319_v53 = vmul.f32 0.5, %v1314_v59  ;;  %v1327_v24 = vmul.f32 0.5, %v1315_v1 }
 0x3ff   :  { %v2866_v48 = vpop.eup %2865  ;;  %v1322_v12 = vmul.f32 0.5, %v2864_v36 }
 0x400   :  { %v1330_v54 = vmul.f32 0.5, %v2866_v48  ;;  %2869 = vtanh.f32 %v1319_v53 }
 0x401   :  { %v1324_v62 = vadd.f32 0.5, %v1322_v12  ;;  %2871 = vtanh.f32 %v1327_v24 }
 0x402   :  { %v1332_v13 = vadd.f32 0.5, %v1330_v54  ;;  %v1293_v46 = vpop.f32.mrf.mxu2  ;;  %v1307_v30 = vpop.f32.mrf.mxu3  ;;  %2873 = vtanh.f32 %v1336_v31 }
 0x403   :  { %v2868_v0 = vpop.eup %2867  ;;  %v1316_v47 = vadd.f32 %v1293_v46, %v440_v5  ;;  %v1317_v42 = vadd.f32 %v1307_v30, %v489_v27 }
 0x404   :  { %v1344_v37 = vmul.f32 %v1332_v13, %v3958_v28  ;;  %v1346_v6 = vmul.f32 %v2868_v0, %v1324_v62 }
 0x405   :  { %2875 = vtanh.f32 %v1316_v47  ;;  %v1337_v52 = vmul.f32 0.5, %v1317_v42 }
 0x406   :  { %v2870_v22 = vpop.eup %2869  ;;  %v4013_v16 = vadd.f32 %v1346_v6, %v1344_v37 }
 0x407   :  { %v2872_v44 = vpop.eup %2871  ;;  %v1323_v59 = vmul.f32 0.5, %v2870_v22  ;;  %2877 = vtanh.f32 %v1337_v52  ;;  %v4651_v52 = vld [vmem:[#allocation38_spill] sm:$0xff] }
 0x408   :  { %v1331_v1 = vmul.f32 0.5, %v2872_v44  ;;  %v2874_v53 = vpop.eup %2873  ;;  %2879 = vtanh.f32 %v4013_v16  ;;  %v494_v22 = vadd.f32 %v4651_v52, %v3776_v4  ;;  %v4652_v44 = vld [vmem:[#allocation43_spill] sm:$0xff] }
 0x409   :  { %v1325_v36 = vadd.f32 0.5, %v1323_v59  ;;  %v1340_v54 = vmul.f32 0.5, %v2874_v53  ;;  %v445_v59 = vadd.f32 %v4652_v44, %v3773_v38 }
 0x40a   :  { %v1333_v24 = vadd.f32 0.5, %v1331_v1 }
 0x40b   :  { %v2876_v48 = vpop.eup %2875  ;;  %v1342_v2 = vadd.f32 0.5, %v1340_v54 }
 0x40c   :  { %v1345_v12 = vmul.f32 %v1333_v24, %v3962_v10  ;;  %v1347_v28 = vmul.f32 %v2876_v48, %v1325_v36 }
 0x40d   :  { %v2878_v31 = vpop.eup %2877 }
 0x40e   :  { %v4017_v15 = vadd.f32 %v1347_v28, %v1345_v12  ;;  %v2880_v27 = vpop.eup %2879  ;;  %v1341_v5 = vmul.f32 0.5, %v2878_v31 }
 0x40f   :  { %v1352_v62 = vmul.f32 %v2880_v27, %v1342_v2 }
 0x410   :  { %2881 = vtanh.f32 %v4017_v15  ;;  %v1343_v13 = vadd.f32 0.5, %v1341_v5 }
 0x411   :  { %v1354_v30 = vpack.c.bf16 %v1352_v62, %v1352_v62 }
 0x413   :  { %v1370_v37 = vunpack.c.l.b16 %v1354_v30 }
 0x416   :  { %v2882_v46 = vpop.eup %2881 }
 0x417   :  { %v1353_v0 = vmul.f32 %v2882_v46, %v1343_v13 }
 0x419   :  { %v1355_v47 = vpack.c.bf16 %v1353_v0, %v1353_v0  ;;  %v2749_v42 = vpack.c.bf16 %v1353_v0, %v1352_v62 }
 0x41b   :  { %2750 = vst [vmem:[#allocation3 + $0x8] sm:$0xff] %v2749_v42   ;;  %v1371_v10 = vunpack.c.l.b16 %v1355_v47 }
 0x41d   :  { %v1372_v6 = vpack.c.b16 %v1371_v10, %v1370_v37 }
 0x41f   :  { %1382 = vmatmul.bf16.vlgmr.msrb.gmra.mxu0 %v1372_v6  ;;  %1396 = vmatmul.bf16.vlgmr.msrb.gmra.mxu1 %v1372_v6 }
 0x420   :  { %1410 = vmatmul.bf16.vlgmr.msrb.gmra.mxu2 %v1372_v6  ;;  %1424 = vmatmul.bf16.vlgmr.msrb.gmra.mxu3 %v1372_v6 }
 0x421   :  { %1614 = vmatpush.bf16.msrb.mxu0 %v3016_v7  ;;  %1628 = vmatpush.bf16.msrb.mxu1 %v3325_v19  ;;  %v4645_v7 = vld [vmem:[#allocation39_spill] sm:$0xff] }
 0x422   :  { %1642 = vmatpush.bf16.msrb.mxu2 %v3327_v20  ;;  %1656 = vmatpush.bf16.msrb.mxu3 %v3336_v25  ;;  %v4647_v25 = vld [vmem:[#allocation40_spill] sm:$0xff] }
 0x425   :  { %1615 = vmatpush.bf16.msrb.mxu0 %v3025_v11  ;;  %1629 = vmatpush.bf16.msrb.mxu1 %v3362_v32  ;;  %v394_v11 = vadd.f32 %v4645_v7, %v3764_v63  ;;  %v4648_v32 = vld [vmem:[#allocation15_spill] sm:$0xff] }
 0x426   :  { %1643 = vmatpush.bf16.msrb.mxu2 %v3373_v39  ;;  %1657 = vmatpush.bf16.msrb.mxu3 %v3375_v40  ;;  %v347_v39 = vadd.f32 %v4648_v32, %v3569_v56  ;;  %v4649_v40 = vld [vmem:[#allocation35_spill] sm:$0xff] }
 0x429   :  { %1616 = vmatpush.bf16.msrb.mxu0 %v3040_v17  ;;  %1630 = vmatpush.bf16.msrb.mxu1 %v3396_v45  ;;  %v492_v45 = vadd.f32 %v4649_v40, %v3776_v4  ;;  %v2725_v40 = vld [vmem:[%s4562_s4 + $0x38] sm:$0xff] }
 0x42a   :  { %1644 = vmatpush.bf16.msrb.mxu2 %v3407_v49  ;;  %1658 = vmatpush.bf16.msrb.mxu3 %v3409_v50  ;;  %v4650_v49 = vld [vmem:[#allocation42_spill] sm:$0xff] }
 0x42b   :  { %v396_v50 = vadd.f32 %v4650_v49, %v3764_v63 }
 0x42d   :  { %1617 = vmatpush.bf16.msrb.mxu0 %v3055_v23  ;;  %1631 = vmatpush.bf16.msrb.mxu1 %v3428_v57 }
 0x42e   :  { %1645 = vmatpush.bf16.msrb.mxu2 %v3439_v60  ;;  %1659 = vmatpush.bf16.msrb.mxu3 %v3441_v61 }
 0x431   :  { %1618 = vmatpush.bf16.msrb.mxu0 %v3070_v29  ;;  %1632 = vmatpush.bf16.msrb.mxu1 %v3456_v3  ;;  %v4646_v29 = vld [vmem:[#allocation13_spill] sm:$0xff] }
 0x432   :  { %1646 = vmatpush.bf16.msrb.mxu2 %v3467_v8  ;;  %1660 = vmatpush.bf16.msrb.mxu3 %v3469_v9 }
 0x435   :  { %1619 = vmatpush.bf16.msrb.mxu0 %v3085_v35  ;;  %1633 = vmatpush.bf16.msrb.mxu1 %v3486_v14 }
 0x436   :  { %1647 = vmatpush.bf16.msrb.mxu2 %v3497_v18  ;;  %1661 = vmatpush.bf16.msrb.mxu3 %v3499_v21 }
 0x439   :  { %1620 = vmatpush.bf16.msrb.mxu0 %v3100_v41  ;;  %1634 = vmatpush.bf16.msrb.mxu1 %v3516_v26 }
 0x43a   :  { %1648 = vmatpush.bf16.msrb.mxu2 %v3527_v33  ;;  %1662 = vmatpush.bf16.msrb.mxu3 %v3529_v34 }
 0x43d   :  { %1621 = vmatpush.bf16.msrb.mxu0 %v3127_v51  ;;  %1635 = vmatpush.bf16.msrb.mxu1 %v3563_v55  ;;  %v443_v51 = vadd.f32 %v4647_v25, %v3773_v38 }
 0x43e   :  { %1649 = vmatpush.bf16.msrb.mxu2 %v3571_v58  ;;  %1663 = vmatpush.bf16.msrb.mxu3 %v3540_v43 }
 0x49c   :  { %v1383_v17 = vpop.f32.mrf.mxu0  ;;  %v1397_v23 = vpop.f32.mrf.mxu1 }
 0x49d   :  { %v1430_v35 = vadd.f32 %v1383_v17, %v4646_v29  ;;  %v1431_v41 = vadd.f32 %v1397_v23, %v394_v11 }
 0x49f   :  { %v1438_v19 = vmul.f32 0.5, %v1430_v35  ;;  %v1446_v20 = vmul.f32 0.5, %v1431_v41 }
 0x4a1   :  { %2883 = vtanh.f32 %v1438_v19 }
 0x4a2   :  { %2885 = vtanh.f32 %v1446_v20 }
 0x4a3   :  { %v1411_v57 = vpop.f32.mrf.mxu2  ;;  %v1425_v60 = vpop.f32.mrf.mxu3 }
 0x4a4   :  { %v1432_v61 = vadd.f32 %v1411_v57, %v443_v51  ;;  %v1385_v3 = vpop.f32.mrf.mxu0  ;;  %v1399_v8 = vpop.f32.mrf.mxu1  ;;  %v1433_v9 = vadd.f32 %v1425_v60, %v492_v45  ;;  %v4653_v45 = vld [vmem:[#allocation44_spill] sm:$0xff] }
 0x4a5   :  { %v1434_v14 = vadd.f32 %v1385_v3, %v347_v39  ;;  %v1435_v18 = vadd.f32 %v1399_v8, %v396_v50  ;;  %v399_v49 = vadd.f32 %v4653_v45, %v3764_v63  ;;  %v2724_v50 = vld [vmem:[%s4562_s4 + $0x30] sm:$0xff] }
 0x4a6   :  { %2887 = vtanh.f32 %v1432_v61  ;;  %v1456_v58 = vmul.f32 0.5, %v1433_v9  ;;  %v4654_v61 = vld [vmem:[#allocation5_spill] sm:$0xff] }
 0x4a7   :  { %v2884_v21 = vpop.eup %2883  ;;  %v1439_v26 = vmul.f32 0.5, %v1434_v14  ;;  %v1447_v33 = vmul.f32 0.5, %v1435_v18  ;;  %v2723_v18 = vld [vmem:[%s4562_s4 + $0x28] sm:$0xff] }
 0x4a8   :  { %v2886_v34 = vpop.eup %2885  ;;  %v1442_v43 = vmul.f32 0.5, %v2884_v21  ;;  %v4655_v21 = vld [vmem:[#allocation46_spill] sm:$0xff] }
 0x4a9   :  { %v1450_v55 = vmul.f32 0.5, %v2886_v34  ;;  %2889 = vtanh.f32 %v1439_v26  ;;  %v448_v26 = vadd.f32 %v4655_v21, %v3773_v38 }
 0x4aa   :  { %v1444_v1 = vadd.f32 0.5, %v1442_v43  ;;  %2891 = vtanh.f32 %v1447_v33  ;;  %v4656_v33 = vld [vmem:[#allocation7_spill] sm:$0xff]  ;;  %v4657_v43 = vld [vmem:[#allocation41_spill] sm:$0xff] }
 0x4ab   :  { %v1452_v36 = vadd.f32 0.5, %v1450_v55  ;;  %v1413_v53 = vpop.f32.mrf.mxu2  ;;  %v1427_v24 = vpop.f32.mrf.mxu3  ;;  %2893 = vtanh.f32 %v1456_v58  ;;  %v352_v34 = vadd.f32 %v4656_v33, %v3569_v56  ;;  %v497_v55 = vadd.f32 %v4657_v43, %v3776_v4  ;;  %v4658_v58 = vld [vmem:[#allocation47_spill] sm:$0xff] }
 0x4ac   :  { %v2888_v48 = vpop.eup %2887  ;;  %v1436_v12 = vadd.f32 %v1413_v53, %v445_v59  ;;  %v1437_v28 = vadd.f32 %v1427_v24, %v494_v22  ;;  %v401_v52 = vadd.f32 %v4658_v58, %v3764_v63  ;;  %v2722_v59 = vld [vmem:[%s4562_s4 + $0x20] sm:$0xff] }
 0x4ad   :  { %v1464_v54 = vmul.f32 %v1452_v36, %v4013_v16  ;;  %v1466_v31 = vmul.f32 %v2888_v48, %v1444_v1 }
 0x4ae   :  { %2895 = vtanh.f32 %v1436_v12  ;;  %v1457_v27 = vmul.f32 0.5, %v1437_v28 }
 0x4af   :  { %v2890_v2 = vpop.eup %2889  ;;  %v4068_v5 = vadd.f32 %v1466_v31, %v1464_v54 }
 0x4b0   :  { %v2892_v62 = vpop.eup %2891  ;;  %v1443_v13 = vmul.f32 0.5, %v2890_v2  ;;  %2897 = vtanh.f32 %v1457_v27 }
 0x4b1   :  { %v1451_v46 = vmul.f32 0.5, %v2892_v62  ;;  %v2894_v0 = vpop.eup %2893  ;;  %2899 = vtanh.f32 %v4068_v5  ;;  %v2721_v62 = vld [vmem:[%s4562_s4 + $0x18] sm:$0xff] }
 0x4b2   :  { %v1445_v30 = vadd.f32 0.5, %v1443_v13  ;;  %v1460_v10 = vmul.f32 0.5, %v2894_v0 }
 0x4b3   :  { %v1453_v47 = vadd.f32 0.5, %v1451_v46 }
 0x4b4   :  { %v2896_v42 = vpop.eup %2895  ;;  %v1462_v17 = vadd.f32 0.5, %v1460_v10 }
 0x4b5   :  { %v1465_v37 = vmul.f32 %v1453_v47, %v4017_v15  ;;  %v1467_v16 = vmul.f32 %v2896_v42, %v1445_v30  ;;  %v4659_v30 = vld [vmem:[#allocation45_spill] sm:$0xff] }
 0x4b6   :  { %v2898_v6 = vpop.eup %2897  ;;  %v499_v0 = vadd.f32 %v4659_v30, %v3776_v4  ;;  %v4660_v47 = vld [vmem:[#allocation49_spill] sm:$0xff]  ;;  %v4663_v30 = vld [vmem:[#allocation48_spill] sm:$0xff] }
 0x4b7   :  { %v4072_v7 = vadd.f32 %v1467_v16, %v1465_v37  ;;  %v2900_v11 = vpop.eup %2899  ;;  %v1461_v23 = vmul.f32 0.5, %v2898_v6  ;;  %v450_v42 = vadd.f32 %v4660_v47, %v3773_v38  ;;  %v2720_v16 = vld [vmem:[%s4562_s4 + $0x10] sm:$0xff]  ;;  %v4664_v47 = vld [vmem:[#allocation52_spill] sm:$0xff] }
 0x4b8   :  { %v1472_v29 = vmul.f32 %v2900_v11, %v1462_v17 }
 0x4b9   :  { %2901 = vtanh.f32 %v4072_v7  ;;  %v1463_v35 = vadd.f32 0.5, %v1461_v23 }
 0x4ba   :  { %v1474_v19 = vpack.c.bf16 %v1472_v29, %v1472_v29 }
 0x4bc   :  { %v1490_v32 = vunpack.c.l.b16 %v1474_v19 }
 0x4bf   :  { %v2902_v41 = vpop.eup %2901 }
 0x4c0   :  { %v1473_v20 = vmul.f32 %v2902_v41, %v1463_v35 }
 0x4c2   :  { %v1475_v25 = vpack.c.bf16 %v1473_v20, %v1473_v20  ;;  %v2754_v51 = vpack.c.bf16 %v1473_v20, %v1472_v29  ;;  %v2719_v20 = vld [vmem:[%s4562_s4 + $0x8] sm:$0xff] }
 0x4c4   :  { %2755 = vst [vmem:[#allocation3 + $0x20] sm:$0xff] %v2754_v51   ;;  %v1491_v15 = vunpack.c.l.b16 %v1475_v25 }
 0x4c6   :  { %v1492_v39 = vpack.c.b16 %v1491_v15, %v1490_v32 }
 0x4c8   :  { %1502 = vmatmul.bf16.vlgmr.msra.gmra.mxu0 %v1492_v39  ;;  %1516 = vmatmul.bf16.vlgmr.msra.gmra.mxu1 %v1492_v39 }
 0x4c9   :  { %1530 = vmatmul.bf16.vlgmr.msra.gmra.mxu2 %v1492_v39  ;;  %1544 = vmatmul.bf16.vlgmr.msra.gmra.mxu3 %v1492_v39 }
 0x4ca   :  { %1857 = vmatpush.bf16.msra.mxu0 %v2725_v40 }
 0x4ce   :  { %1858 = vmatpush.bf16.msra.mxu0 %v2724_v50 }
 0x4d2   :  { %1859 = vmatpush.bf16.msra.mxu0 %v2723_v18 }
 0x4d6   :  { %1860 = vmatpush.bf16.msra.mxu0 %v2722_v59  ;;  %v2711_v59 = vld [vmem:[#allocation3] sm:$0xff] }
 0x4da   :  { %1861 = vmatpush.bf16.msra.mxu0 %v2721_v62 }
 0x4de   :  { %1862 = vmatpush.bf16.msra.mxu0 %v2720_v16 }
 0x4e2   :  { %1863 = vmatpush.bf16.msra.mxu0 %v2719_v20 }
 0x545   :  { %v1503_v57 = vpop.f32.mrf.mxu0  ;;  %v1517_v60 = vpop.f32.mrf.mxu1 }
 0x546   :  { %v1550_v3 = vadd.f32 %v1503_v57, %v4654_v61  ;;  %v1551_v8 = vadd.f32 %v1517_v60, %v399_v49 }
 0x548   :  { %v1558_v9 = vmul.f32 0.5, %v1550_v3  ;;  %v1566_v14 = vmul.f32 0.5, %v1551_v8 }
 0x54a   :  { %2903 = vtanh.f32 %v1558_v9 }
 0x54b   :  { %2905 = vtanh.f32 %v1566_v14 }
 0x54c   :  { %v1531_v22 = vpop.f32.mrf.mxu2  ;;  %v1545_v44 = vpop.f32.mrf.mxu3 }
 0x54d   :  { %v1552_v1 = vadd.f32 %v1531_v22, %v448_v26  ;;  %v1505_v36 = vpop.f32.mrf.mxu0  ;;  %v1519_v53 = vpop.f32.mrf.mxu1  ;;  %v1553_v24 = vadd.f32 %v1545_v44, %v497_v55  ;;  %v2710_v44 = vld [vmem:[#allocation3 + $0x30] sm:$0xff] }
 0x54e   :  { %v1554_v48 = vadd.f32 %v1505_v36, %v352_v34  ;;  %v1555_v12 = vadd.f32 %v1519_v53, %v401_v52  ;;  %v2713_v36 = vld [vmem:[#allocation3 + $0x10] sm:$0xff]  ;;  %v2714_v53 = vld [vmem:[#allocation3 + $0x8] sm:$0xff] }
 0x54f   :  { %2907 = vtanh.f32 %v1552_v1  ;;  %v1576_v46 = vmul.f32 0.5, %v1553_v24  ;;  %v2712_v1 = vld [vmem:[#allocation3 + $0x18] sm:$0xff]  ;;  %v2715_v24 = vld [vmem:[#allocation3 + $0x20] sm:$0xff] }
 0x550   :  { %v2904_v28 = vpop.eup %2903  ;;  %v1559_v54 = vmul.f32 0.5, %v1554_v48  ;;  %v1567_v31 = vmul.f32 0.5, %v1555_v12  ;;  %v4661_v12 = vld [vmem:[#allocation50_spill] sm:$0xff] }
 0x551   :  { %v2906_v27 = vpop.eup %2905  ;;  %v1562_v2 = vmul.f32 0.5, %v2904_v28  ;;  %v404_v28 = vadd.f32 %v4661_v12, %v3764_v63 }
 0x552   :  { %v1570_v13 = vmul.f32 0.5, %v2906_v27  ;;  %2909 = vtanh.f32 %v1559_v54  ;;  %v4662_v27 = vld [vmem:[#allocation9_spill] sm:$0xff] }
 0x553   :  { %v1564_v37 = vadd.f32 0.5, %v1562_v2  ;;  %2911 = vtanh.f32 %v1567_v31 }
 0x554   :  { %v1572_v10 = vadd.f32 0.5, %v1570_v13  ;;  %v1533_v6 = vpop.f32.mrf.mxu2  ;;  %v1547_v11 = vpop.f32.mrf.mxu3  ;;  %2913 = vtanh.f32 %v1576_v46 }
 0x555   :  { %v2908_v17 = vpop.eup %2907  ;;  %v1556_v23 = vadd.f32 %v1533_v6, %v450_v42  ;;  %v1557_v29 = vadd.f32 %v1547_v11, %v499_v0  ;;  %v502_v0 = vadd.f32 %v4663_v30, %v3776_v4  ;;  %v453_v42 = vadd.f32 %v4664_v47, %v3773_v38 }
 0x556   :  { %v1584_v35 = vmul.f32 %v1572_v10, %v4068_v5  ;;  %v1586_v41 = vmul.f32 %v2908_v17, %v1564_v37  ;;  %v2718_v5 = vld [vmem:[%s4562_s4] sm:$0xff]  ;;  %v4665_v37 = vld [vmem:[#allocation11_spill] sm:$0xff]  ;;  %v4666_v10 = vld [vmem:[#allocation53_spill] sm:$0xff] }
 0x557   :  { %2915 = vtanh.f32 %v1556_v23  ;;  %v1577_v19 = vmul.f32 0.5, %v1557_v29  ;;  %1864 = vmatpush.bf16.msra.mxu0 %v2718_v5  ;;  %v357_v16 = vadd.f32 %v4665_v37, %v3569_v56  ;;  %v406_v6 = vadd.f32 %v4666_v10, %v3764_v63  ;;  %v4136_v63 = vld [vmem:[%s4563_s5] ss:$0 sm:$0xff] }
 0x558   :  { %v2910_v25 = vpop.eup %2909  ;;  %v4112_v51 = vadd.f32 %v1586_v41, %v1584_v35 }
 0x559   :  { %v2912_v32 = vpop.eup %2911  ;;  %v1563_v15 = vmul.f32 0.5, %v2910_v25  ;;  %2917 = vtanh.f32 %v1577_v19 }
 0x55a   :  { %v1571_v39 = vmul.f32 0.5, %v2912_v32  ;;  %v2914_v45 = vpop.eup %2913  ;;  %2919 = vtanh.f32 %v4112_v51 }
 0x55b   :  { %v1565_v40 = vadd.f32 0.5, %v1563_v15  ;;  %v1580_v61 = vmul.f32 0.5, %v2914_v45  ;;  %v4667_v45 = vld [vmem:[#allocation51_spill] sm:$0xff] }
 0x55c   :  { %v1573_v49 = vadd.f32 0.5, %v1571_v39 }
 0x55d   :  { %v2916_v50 = vpop.eup %2915  ;;  %v1582_v14 = vadd.f32 0.5, %v1580_v61 }
 0x55e   :  { %v1585_v57 = vmul.f32 %v1573_v49, %v4072_v7  ;;  %v1587_v60 = vmul.f32 %v2916_v50, %v1565_v40  ;;  %v504_v49 = vadd.f32 %v4667_v45, %v3776_v4  ;;  %v4668_v50 = vld [vmem:[#allocation54_spill] sm:$0xff] }
 0x55f   :  { %v2918_v3 = vpop.eup %2917 }
 0x560   :  { %v4119_v8 = vadd.f32 %v1587_v60, %v1585_v57  ;;  %v2920_v9 = vpop.eup %2919  ;;  %v1581_v18 = vmul.f32 0.5, %v2918_v3  ;;  %v455_v57 = vadd.f32 %v4668_v50, %v3773_v38 }
 0x561   :  { %v1592_v21 = vmul.f32 %v2920_v9, %v1582_v14 }
 0x562   :  { %2921 = vtanh.f32 %v4119_v8  ;;  %v1583_v26 = vadd.f32 0.5, %v1581_v18 }
 0x563   :  { %v1594_v34 = vpack.c.bf16 %v1592_v21, %v1592_v21 }
 0x565   :  { %v1610_v52 = vunpack.c.l.b16 %v1594_v34 }
 0x568   :  { %v2922_v33 = vpop.eup %2921 }
 0x569   :  { %v1593_v43 = vmul.f32 %v2922_v33, %v1583_v26 }
 0x56b   :  { %v1595_v55 = vpack.c.bf16 %v1593_v43, %v1593_v43  ;;  %v2759_v58 = vpack.c.bf16 %v1593_v43, %v1592_v21 }
 0x56d   :  { %2760 = vst [vmem:[#allocation3 + $0x28] sm:$0xff] %v2759_v58   ;;  %v1611_v7 = vunpack.c.l.b16 %v1595_v55 }
 0x56f   :  { %v1612_v22 = vpack.c.b16 %v1611_v7, %v1610_v52 }
 0x571   :  { %1622 = vmatmul.bf16.vlgmr.msrb.gmra.mxu0 %v1612_v22  ;;  %1636 = vmatmul.bf16.vlgmr.msrb.gmra.mxu1 %v1612_v22 }
 0x572   :  { %1650 = vmatmul.bf16.vlgmr.msrb.gmra.mxu2 %v1612_v22  ;;  %1664 = vmatmul.bf16.vlgmr.msrb.gmra.mxu3 %v1612_v22 }
 0x574   :  { %v2716_v48 = vld [vmem:[#allocation3 + $0x28] sm:$0xff] }
 0x581   :  { %1865 = vmatmul.bf16.vlgmr.msra.gmra.mxu0 %v2710_v44 }
 0x591   :  { %1870 = vmatmul.bf16.gmra.mxu0 %v2711_v59 }
 0x5a1   :  { %1875 = vmatmul.bf16.gmra.mxu0 %v2712_v1 }
 0x5b1   :  { %1880 = vmatmul.bf16.gmra.mxu0 %v2713_v36 }
 0x5c1   :  { %1885 = vmatmul.bf16.gmra.mxu0 %v2714_v53 }
 0x5d1   :  { %1890 = vmatmul.bf16.gmra.mxu0 %v2715_v24 }
 0x5e1   :  { %1895 = vmatmul.bf16.gmra.mxu0 %v2716_v48 }
 0x5ee   :  { %v1623_v54 = vpop.f32.mrf.mxu0  ;;  %v1637_v31 = vpop.f32.mrf.mxu1 }
 0x5ef   :  { %v1670_v2 = vadd.f32 %v1623_v54, %v4662_v27  ;;  %v1671_v62 = vadd.f32 %v1637_v31, %v404_v28 }
 0x5f1   :  { %v1678_v13 = vmul.f32 0.5, %v1670_v2  ;;  %v1686_v46 = vmul.f32 0.5, %v1671_v62 }
 0x5f3   :  { %2923 = vtanh.f32 %v1678_v13 }
 0x5f4   :  { %2925 = vtanh.f32 %v1686_v46 }
 0x5f5   :  { %v1651_v11 = vpop.f32.mrf.mxu2  ;;  %v1665_v17 = vpop.f32.mrf.mxu3 }
 0x5f6   :  { %v1672_v23 = vadd.f32 %v1651_v11, %v453_v42  ;;  %v1673_v29 = vadd.f32 %v1665_v17, %v502_v0  ;;  %v1625_v35 = vpop.f32.mrf.mxu0  ;;  %v1639_v41 = vpop.f32.mrf.mxu1 }
 0x5f7   :  { %v1674_v19 = vadd.f32 %v1625_v35, %v357_v16  ;;  %v1675_v20 = vadd.f32 %v1639_v41, %v406_v6 }
 0x5f8   :  { %2927 = vtanh.f32 %v1672_v23  ;;  %v1696_v25 = vmul.f32 0.5, %v1673_v29 }
 0x5f9   :  { %v2924_v32 = vpop.eup %2923  ;;  %v1679_v15 = vmul.f32 0.5, %v1674_v19  ;;  %v1687_v39 = vmul.f32 0.5, %v1675_v20 }
 0x5fa   :  { %v2926_v40 = vpop.eup %2925  ;;  %v1682_v5 = vmul.f32 0.5, %v2924_v32  ;;  %2929 = vtanh.f32 %v1696_v25 }
 0x5fb   :  { %v1690_v56 = vmul.f32 0.5, %v2926_v40  ;;  %2931 = vtanh.f32 %v1679_v15 }
 0x5fc   :  { %v1684_v60 = vadd.f32 0.5, %v1682_v5  ;;  %2933 = vtanh.f32 %v1687_v39 }
 0x5fd   :  { %v1692_v61 = vadd.f32 0.5, %v1690_v56  ;;  %v1653_v3 = vpop.f32.mrf.mxu2  ;;  %v1667_v9 = vpop.f32.mrf.mxu3 }
 0x5fe   :  { %v2928_v14 = vpop.eup %2927  ;;  %v1676_v18 = vadd.f32 %v1653_v3, %v455_v57  ;;  %v1677_v21 = vadd.f32 %v1667_v9, %v504_v49  ;;  %v1866_v26 = vpop.f32.mrf.mxu0 }
 0x5ff   :  { %v1704_v33 = vmul.f32 %v1692_v61, %v4112_v51  ;;  %v1706_v34 = vmul.f32 %v2928_v14, %v1684_v60  ;;  %v1867_v43 = vadd.f32 %v4136_v63, %v1866_v26 }
 0x600   :  { %v2930_v55 = vpop.eup %2929  ;;  %2935 = vtanh.f32 %v1676_v18  ;;  %v1697_v4 = vmul.f32 0.5, %v1677_v21 }
 0x601   :  { %v2932_v58 = vpop.eup %2931  ;;  %v1708_v52 = vadd.f32 %v1706_v34, %v1704_v33  ;;  %v1908_v38 = vrot.slane %v1867_v43, 1  ;;  %v1909_v7 = vrot.slane %v1867_v43, 2  ;;  %1936 = vst [vmem:[%s4564_s8] sm:$0x1] %v1867_v43  ;;  %v1910_v59 = vrot.slane %v1867_v43, 3 }
 0x602   :  { %v2934_v22 = vpop.eup %2933  ;;  %v1683_v44 = vmul.f32 0.5, %v2932_v58  ;;  %2937 = vtanh.f32 %v1697_v4  ;;  %v1911_v1 = vrot.slane %v1867_v43, 4  ;;  %v1700_v36 = vmul.f32 0.5, %v2930_v55 }
 0x603   :  { %2939 = vtanh.f32 %v1708_v52  ;;  %1723 = vst [vmem:[%s4565_s10] sm:$0xff] %v1708_v52  ;;  %v1691_v51 = vmul.f32 0.5, %v2934_v22  ;;  %v1912_v24 = vrot.slane %v1867_v43, 5  ;;  %v1913_v12 = vrot.slane %v1867_v43, 6 }
 0x604   :  { %v1685_v53 = vadd.f32 0.5, %v1683_v44  ;;  %1937 = vst [vmem:[%s4564_s8 + $0x8] sm:$0x1] %v1908_v38  ;;  %v1914_v54 = vrot.slane %v1867_v43, 7  ;;  %v1702_v46 = vadd.f32 0.5, %v1700_v36 }
 0x605   :  { %v1693_v48 = vadd.f32 0.5, %v1691_v51  ;;  %1938 = vst [vmem:[%s4564_s8 + $0x10] sm:$0x1] %v1909_v7 }
 0x606   :  { %v2936_v28 = vpop.eup %2935  ;;  %1939 = vst [vmem:[%s4564_s8 + $0x18] sm:$0x1] %v1910_v59  ;;  %v1868_v31 = vpop.f32.mrf.mxu0 }
 0x607   :  { %v1705_v27 = vmul.f32 %v1693_v48, %v4119_v8  ;;  %v1707_v2 = vmul.f32 %v2936_v28, %v1685_v53  ;;  %1940 = vst [vmem:[%s4564_s8 + $0x20] sm:$0x1] %v1911_v1  ;;  %v1869_v62 = vadd.f32 %v4136_v63, %v1868_v31 }
 0x608   :  { %v2938_v13 = vpop.eup %2937  ;;  %1941 = vst [vmem:[%s4564_s8 + $0x28] sm:$0x1] %v1912_v24 }
 0x609   :  { %v2940_v30 = vpop.eup %2939  ;;  %v1709_v0 = vadd.f32 %v1707_v2, %v1705_v27  ;;  %1942 = vst [vmem:[%s4564_s8 + $0x30] sm:$0x1] %v1913_v12  ;;  %v1915_v8 = vrot.slane %v1869_v62, 1  ;;  %v1916_v42 = vrot.slane %v1869_v62, 2  ;;  %v1917_v37 = vrot.slane %v1869_v62, 3 }
 0x60a   :  { %v1712_v47 = vmul.f32 %v2940_v30, %v1702_v46  ;;  %1943 = vst [vmem:[%s4564_s8 + $0x38] sm:$0x1] %v1914_v54  ;;  %v1701_v10 = vmul.f32 0.5, %v2938_v13  ;;  %v1918_v6 = vrot.slane %v1869_v62, 4  ;;  %v1919_v17 = vrot.slane %v1869_v62, 5 }
 0x60b   :  { %2941 = vtanh.f32 %v1709_v0  ;;  %1724 = vst [vmem:[%s4565_s10 + $0x8] sm:$0xff] %v1709_v0  ;;  %v1920_v29 = vrot.slane %v1869_v62, 6  ;;  %v1921_v19 = vrot.slane %v1869_v62, 7 }
 0x60c   :  { %v1714_v16 = vpack.c.bf16 %v1712_v47, %v1712_v47  ;;  %1944 = vst [vmem:[%s4564_s8 + $0x40] sm:$0x1] %v1869_v62  ;;  %v1703_v41 = vadd.f32 0.5, %v1701_v10 }
 0x60d   :  { %1945 = vst [vmem:[%s4564_s8 + $0x48] sm:$0x1] %v1915_v8 }
 0x60e   :  { %v1719_v11 = vunpack.c.l.bf16 %v1714_v16  ;;  %1946 = vst [vmem:[%s4564_s8 + $0x50] sm:$0x1] %v1916_v42  ;;  %v1871_v23 = vpop.f32.mrf.mxu0 }
 0x60f   :  { %1947 = vst [vmem:[%s4564_s8 + $0x58] sm:$0x1] %v1917_v37  ;;  %v1872_v35 = vadd.f32 %v4136_v63, %v1871_v23 }
 0x610   :  { %1721 = vst [vmem:[%s4566_s9] sm:$0xff] %v1719_v11 }
 0x611   :  { %v2942_v20 = vpop.eup %2941  ;;  %1948 = vst [vmem:[%s4564_s8 + $0x60] sm:$0x1] %v1918_v6  ;;  %v1954_v32 = vrot.slane %v1872_v35, 1  ;;  %v1955_v40 = vrot.slane %v1872_v35, 2  ;;  %v1956_v56 = vrot.slane %v1872_v35, 3  ;;  %v1957_v49 = vrot.slane %v1872_v35, 4 }
 0x612   :  { %v1713_v25 = vmul.f32 %v2942_v20, %v1703_v41  ;;  %1949 = vst [vmem:[%s4564_s8 + $0x68] sm:$0x1] %v1919_v17  ;;  %v1958_v50 = vrot.slane %v1872_v35, 5  ;;  %v1959_v60 = vrot.slane %v1872_v35, 6  ;;  %v1960_v61 = vrot.slane %v1872_v35, 7 }
 0x613   :  { %1950 = vst [vmem:[%s4564_s8 + $0x70] sm:$0x1] %v1920_v29 }
 0x614   :  { %v1715_v15 = vpack.c.bf16 %v1713_v25, %v1713_v25  ;;  %v2764_v39 = vpack.c.bf16 %v1713_v25, %v1712_v47  ;;  %1951 = vst [vmem:[%s4564_s8 + $0x78] sm:$0x1] %v1921_v19 }
 0x615   :  { %1982 = vst [vmem:[%s4564_s8 + $0x1] sm:$0x1] %v1872_v35 }
 0x616   :  { %2765 = vst [vmem:[#allocation3 + $0x38] sm:$0xff] %v2764_v39   ;;  %v1720_v5 = vunpack.c.l.bf16 %v1715_v15  ;;  %v1873_v45 = vpop.f32.mrf.mxu0 }
 0x617   :  { %1983 = vst [vmem:[%s4564_s8 + $0x9] sm:$0x1] %v1954_v32  ;;  %v1874_v57 = vadd.f32 %v4136_v63, %v1873_v45 }
 0x618   :  { %1722 = vst [vmem:[%s4566_s9 + $0x8] sm:$0xff] %v1720_v5 }
 0x619   :  { %1984 = vst [vmem:[%s4564_s8 + $0x11] sm:$0x1] %v1955_v40  ;;  %v1961_v3 = vrot.slane %v1874_v57, 1  ;;  %v1962_v9 = vrot.slane %v1874_v57, 2  ;;  %v1963_v18 = vrot.slane %v1874_v57, 3  ;;  %v1964_v26 = vrot.slane %v1874_v57, 4 }
 0x61a   :  { %1985 = vst [vmem:[%s4564_s8 + $0x19] sm:$0x1] %v1956_v56  ;;  %v1965_v33 = vrot.slane %v1874_v57, 5  ;;  %v1966_v43 = vrot.slane %v1874_v57, 6  ;;  %v1967_v55 = vrot.slane %v1874_v57, 7 }
 0x61b   :  { %1986 = vst [vmem:[%s4564_s8 + $0x21] sm:$0x1] %v1957_v49 }
 0x61c   :  { %1987 = vst [vmem:[%s4564_s8 + $0x29] sm:$0x1] %v1958_v50 }
 0x61d   :  { %1988 = vst [vmem:[%s4564_s8 + $0x31] sm:$0x1] %v1959_v60  ;;  %v2717_v14 = vld [vmem:[#allocation3 + $0x38] sm:$0xff] }
 0x61e   :  { %1989 = vst [vmem:[%s4564_s8 + $0x39] sm:$0x1] %v1960_v61  ;;  %v1876_v21 = vpop.f32.mrf.mxu0  ;;  %1900 = vmatmul.bf16.gmra.mxu0 %v2717_v14 }
 0x61f   :  { %1990 = vst [vmem:[%s4564_s8 + $0x41] sm:$0x1] %v1874_v57  ;;  %v1877_v34 = vadd.f32 %v4136_v63, %v1876_v21 }
 0x620   :  { %1991 = vst [vmem:[%s4564_s8 + $0x49] sm:$0x1] %v1961_v3 }
 0x621   :  { %1992 = vst [vmem:[%s4564_s8 + $0x51] sm:$0x1] %v1962_v9  ;;  %v2000_v4 = vrot.slane %v1877_v34, 1  ;;  %v2001_v58 = vrot.slane %v1877_v34, 2  ;;  %v2002_v52 = vrot.slane %v1877_v34, 3  ;;  %v2003_v7 = vrot.slane %v1877_v34, 4 }
 0x622   :  { %1993 = vst [vmem:[%s4564_s8 + $0x59] sm:$0x1] %v1963_v18  ;;  %v2004_v22 = vrot.slane %v1877_v34, 5  ;;  %v2005_v59 = vrot.slane %v1877_v34, 6  ;;  %v2006_v51 = vrot.slane %v1877_v34, 7 }
 0x623   :  { %1994 = vst [vmem:[%s4564_s8 + $0x61] sm:$0x1] %v1964_v26 }
 0x624   :  { %1995 = vst [vmem:[%s4564_s8 + $0x69] sm:$0x1] %v1965_v33 }
 0x625   :  { %1996 = vst [vmem:[%s4564_s8 + $0x71] sm:$0x1] %v1966_v43 }
 0x626   :  { %1997 = vst [vmem:[%s4564_s8 + $0x79] sm:$0x1] %v1967_v55  ;;  %v1878_v38 = vpop.f32.mrf.mxu0 }
 0x627   :  { %2028 = vst [vmem:[%s4564_s8 + $0x2] sm:$0x1] %v1877_v34  ;;  %v1879_v44 = vadd.f32 %v4136_v63, %v1878_v38 }
 0x628   :  { %2029 = vst [vmem:[%s4564_s8 + $0xa] sm:$0x1] %v2000_v4 }
 0x629   :  { %2030 = vst [vmem:[%s4564_s8 + $0x12] sm:$0x1] %v2001_v58  ;;  %v2007_v1 = vrot.slane %v1879_v44, 1  ;;  %v2008_v36 = vrot.slane %v1879_v44, 2  ;;  %v2009_v53 = vrot.slane %v1879_v44, 3  ;;  %v2010_v48 = vrot.slane %v1879_v44, 4 }
 0x62a   :  { %2031 = vst [vmem:[%s4564_s8 + $0x1a] sm:$0x1] %v2002_v52  ;;  %v2011_v12 = vrot.slane %v1879_v44, 5  ;;  %v2012_v54 = vrot.slane %v1879_v44, 6  ;;  %v2013_v31 = vrot.slane %v1879_v44, 7 }
 0x62b   :  { %2032 = vst [vmem:[%s4564_s8 + $0x22] sm:$0x1] %v2003_v7 }
 0x62c   :  { %2033 = vst [vmem:[%s4564_s8 + $0x2a] sm:$0x1] %v2004_v22 }
 0x62d   :  { %2034 = vst [vmem:[%s4564_s8 + $0x32] sm:$0x1] %v2005_v59 }
 0x62e   :  { %2035 = vst [vmem:[%s4564_s8 + $0x3a] sm:$0x1] %v2006_v51  ;;  %v1881_v24 = vpop.f32.mrf.mxu0 }
 0x62f   :  { %2036 = vst [vmem:[%s4564_s8 + $0x42] sm:$0x1] %v1879_v44  ;;  %v1882_v28 = vadd.f32 %v4136_v63, %v1881_v24 }
 0x630   :  { %2037 = vst [vmem:[%s4564_s8 + $0x4a] sm:$0x1] %v2007_v1 }
 0x631   :  { %2038 = vst [vmem:[%s4564_s8 + $0x52] sm:$0x1] %v2008_v36  ;;  %v2046_v27 = vrot.slane %v1882_v28, 1  ;;  %v2047_v2 = vrot.slane %v1882_v28, 2  ;;  %v2048_v62 = vrot.slane %v1882_v28, 3  ;;  %v2049_v46 = vrot.slane %v1882_v28, 4 }
 0x632   :  { %2039 = vst [vmem:[%s4564_s8 + $0x5a] sm:$0x1] %v2009_v53  ;;  %v2050_v30 = vrot.slane %v1882_v28, 5  ;;  %v2051_v8 = vrot.slane %v1882_v28, 6  ;;  %v2052_v47 = vrot.slane %v1882_v28, 7 }
 0x633   :  { %2040 = vst [vmem:[%s4564_s8 + $0x62] sm:$0x1] %v2010_v48 }
 0x634   :  { %2041 = vst [vmem:[%s4564_s8 + $0x6a] sm:$0x1] %v2011_v12 }
 0x635   :  { %2042 = vst [vmem:[%s4564_s8 + $0x72] sm:$0x1] %v2012_v54 }
 0x636   :  { %2043 = vst [vmem:[%s4564_s8 + $0x7a] sm:$0x1] %v2013_v31  ;;  %v1883_v13 = vpop.f32.mrf.mxu0 }
 0x637   :  { %2074 = vst [vmem:[%s4564_s8 + $0x3] sm:$0x1] %v1882_v28  ;;  %v1884_v0 = vadd.f32 %v4136_v63, %v1883_v13 }
 0x638   :  { %2075 = vst [vmem:[%s4564_s8 + $0xb] sm:$0x1] %v2046_v27 }
 0x639   :  { %2076 = vst [vmem:[%s4564_s8 + $0x13] sm:$0x1] %v2047_v2  ;;  %v2053_v42 = vrot.slane %v1884_v0, 1  ;;  %v2054_v37 = vrot.slane %v1884_v0, 2  ;;  %v2055_v16 = vrot.slane %v1884_v0, 3  ;;  %v2056_v6 = vrot.slane %v1884_v0, 4 }
 0x63a   :  { %2077 = vst [vmem:[%s4564_s8 + $0x1b] sm:$0x1] %v2048_v62  ;;  %v2057_v11 = vrot.slane %v1884_v0, 5  ;;  %v2058_v23 = vrot.slane %v1884_v0, 6  ;;  %v2059_v29 = vrot.slane %v1884_v0, 7 }
 0x63b   :  { %2078 = vst [vmem:[%s4564_s8 + $0x23] sm:$0x1] %v2049_v46 }
 0x63c   :  { %2079 = vst [vmem:[%s4564_s8 + $0x2b] sm:$0x1] %v2050_v30 }
 0x63d   :  { %2080 = vst [vmem:[%s4564_s8 + $0x33] sm:$0x1] %v2051_v8 }
 0x63e   :  { %2081 = vst [vmem:[%s4564_s8 + $0x3b] sm:$0x1] %v2052_v47  ;;  %v1886_v10 = vpop.f32.mrf.mxu0 }
 0x63f   :  { %2082 = vst [vmem:[%s4564_s8 + $0x43] sm:$0x1] %v1884_v0  ;;  %v1887_v17 = vadd.f32 %v4136_v63, %v1886_v10 }
 0x640   :  { %2083 = vst [vmem:[%s4564_s8 + $0x4b] sm:$0x1] %v2053_v42 }
 0x641   :  { %2084 = vst [vmem:[%s4564_s8 + $0x53] sm:$0x1] %v2054_v37  ;;  %v2092_v35 = vrot.slane %v1887_v17, 1  ;;  %v2093_v41 = vrot.slane %v1887_v17, 2  ;;  %v2094_v19 = vrot.slane %v1887_v17, 3  ;;  %v2095_v25 = vrot.slane %v1887_v17, 4 }
 0x642   :  { %2085 = vst [vmem:[%s4564_s8 + $0x5b] sm:$0x1] %v2055_v16  ;;  %v2096_v32 = vrot.slane %v1887_v17, 5  ;;  %v2097_v39 = vrot.slane %v1887_v17, 6  ;;  %v2098_v40 = vrot.slane %v1887_v17, 7 }
 0x643   :  { %2086 = vst [vmem:[%s4564_s8 + $0x63] sm:$0x1] %v2056_v6 }
 0x644   :  { %2087 = vst [vmem:[%s4564_s8 + $0x6b] sm:$0x1] %v2057_v11 }
 0x645   :  { %2088 = vst [vmem:[%s4564_s8 + $0x73] sm:$0x1] %v2058_v23 }
 0x646   :  { %2089 = vst [vmem:[%s4564_s8 + $0x7b] sm:$0x1] %v2059_v29  ;;  %v1888_v20 = vpop.f32.mrf.mxu0 }
 0x647   :  { %2120 = vst [vmem:[%s4564_s8 + $0x4] sm:$0x1] %v1887_v17  ;;  %v1889_v15 = vadd.f32 %v4136_v63, %v1888_v20 }
 0x648   :  { %2121 = vst [vmem:[%s4564_s8 + $0xc] sm:$0x1] %v2092_v35 }
 0x649   :  { %2122 = vst [vmem:[%s4564_s8 + $0x14] sm:$0x1] %v2093_v41  ;;  %v2099_v5 = vrot.slane %v1889_v15, 1  ;;  %v2100_v56 = vrot.slane %v1889_v15, 2  ;;  %v2101_v45 = vrot.slane %v1889_v15, 3  ;;  %v2102_v50 = vrot.slane %v1889_v15, 4 }
 0x64a   :  { %2123 = vst [vmem:[%s4564_s8 + $0x1c] sm:$0x1] %v2094_v19  ;;  %v2103_v57 = vrot.slane %v1889_v15, 5  ;;  %v2104_v61 = vrot.slane %v1889_v15, 6  ;;  %v2105_v3 = vrot.slane %v1889_v15, 7 }
 0x64b   :  { %2124 = vst [vmem:[%s4564_s8 + $0x24] sm:$0x1] %v2095_v25 }
 0x64c   :  { %2125 = vst [vmem:[%s4564_s8 + $0x2c] sm:$0x1] %v2096_v32 }
 0x64d   :  { %2126 = vst [vmem:[%s4564_s8 + $0x34] sm:$0x1] %v2097_v39 }
 0x64e   :  { %2127 = vst [vmem:[%s4564_s8 + $0x3c] sm:$0x1] %v2098_v40  ;;  %v1891_v49 = vpop.f32.mrf.mxu0 }
 0x64f   :  { %2128 = vst [vmem:[%s4564_s8 + $0x44] sm:$0x1] %v1889_v15  ;;  %v1892_v60 = vadd.f32 %v4136_v63, %v1891_v49 }
 0x650   :  { %2129 = vst [vmem:[%s4564_s8 + $0x4c] sm:$0x1] %v2099_v5 }
 0x651   :  { %2130 = vst [vmem:[%s4564_s8 + $0x54] sm:$0x1] %v2100_v56  ;;  %v2138_v9 = vrot.slane %v1892_v60, 1  ;;  %v2139_v14 = vrot.slane %v1892_v60, 2  ;;  %v2140_v18 = vrot.slane %v1892_v60, 3  ;;  %v2141_v26 = vrot.slane %v1892_v60, 4 }
 0x652   :  { %2131 = vst [vmem:[%s4564_s8 + $0x5c] sm:$0x1] %v2101_v45  ;;  %v2142_v33 = vrot.slane %v1892_v60, 5  ;;  %v2143_v43 = vrot.slane %v1892_v60, 6  ;;  %v2144_v55 = vrot.slane %v1892_v60, 7 }
 0x653   :  { %2132 = vst [vmem:[%s4564_s8 + $0x64] sm:$0x1] %v2102_v50 }
 0x654   :  { %2133 = vst [vmem:[%s4564_s8 + $0x6c] sm:$0x1] %v2103_v57 }
 0x655   :  { %2134 = vst [vmem:[%s4564_s8 + $0x74] sm:$0x1] %v2104_v61 }
 0x656   :  { %2135 = vst [vmem:[%s4564_s8 + $0x7c] sm:$0x1] %v2105_v3  ;;  %v1893_v21 = vpop.f32.mrf.mxu0 }
 0x657   :  { %2166 = vst [vmem:[%s4564_s8 + $0x5] sm:$0x1] %v1892_v60  ;;  %v1894_v34 = vadd.f32 %v4136_v63, %v1893_v21 }
 0x658   :  { %2167 = vst [vmem:[%s4564_s8 + $0xd] sm:$0x1] %v2138_v9 }
 0x659   :  { %2168 = vst [vmem:[%s4564_s8 + $0x15] sm:$0x1] %v2139_v14  ;;  %v2145_v4 = vrot.slane %v1894_v34, 1  ;;  %v2146_v58 = vrot.slane %v1894_v34, 2  ;;  %v2147_v52 = vrot.slane %v1894_v34, 3  ;;  %v2148_v7 = vrot.slane %v1894_v34, 4 }
 0x65a   :  { %2169 = vst [vmem:[%s4564_s8 + $0x1d] sm:$0x1] %v2140_v18  ;;  %v2149_v22 = vrot.slane %v1894_v34, 5  ;;  %v2150_v59 = vrot.slane %v1894_v34, 6  ;;  %v2151_v51 = vrot.slane %v1894_v34, 7 }
 0x65b   :  { %2170 = vst [vmem:[%s4564_s8 + $0x25] sm:$0x1] %v2141_v26 }
 0x65c   :  { %2171 = vst [vmem:[%s4564_s8 + $0x2d] sm:$0x1] %v2142_v33 }
 0x65d   :  { %2172 = vst [vmem:[%s4564_s8 + $0x35] sm:$0x1] %v2143_v43 }
 0x65e   :  { %2173 = vst [vmem:[%s4564_s8 + $0x3d] sm:$0x1] %v2144_v55  ;;  %v1896_v38 = vpop.f32.mrf.mxu0 }
 0x65f   :  { %2174 = vst [vmem:[%s4564_s8 + $0x45] sm:$0x1] %v1894_v34  ;;  %v1897_v44 = vadd.f32 %v4136_v63, %v1896_v38 }
 0x660   :  { %2175 = vst [vmem:[%s4564_s8 + $0x4d] sm:$0x1] %v2145_v4 }
 0x661   :  { %2176 = vst [vmem:[%s4564_s8 + $0x55] sm:$0x1] %v2146_v58  ;;  %v2184_v1 = vrot.slane %v1897_v44, 1  ;;  %v2185_v36 = vrot.slane %v1897_v44, 2  ;;  %v2186_v53 = vrot.slane %v1897_v44, 3  ;;  %v2187_v48 = vrot.slane %v1897_v44, 4 }
 0x662   :  { %2177 = vst [vmem:[%s4564_s8 + $0x5d] sm:$0x1] %v2147_v52  ;;  %v2188_v12 = vrot.slane %v1897_v44, 5  ;;  %v2189_v54 = vrot.slane %v1897_v44, 6  ;;  %v2190_v31 = vrot.slane %v1897_v44, 7 }
 0x663   :  { %2178 = vst [vmem:[%s4564_s8 + $0x65] sm:$0x1] %v2148_v7 }
 0x664   :  { %2179 = vst [vmem:[%s4564_s8 + $0x6d] sm:$0x1] %v2149_v22 }
 0x665   :  { %2180 = vst [vmem:[%s4564_s8 + $0x75] sm:$0x1] %v2150_v59 }
 0x666   :  { %2181 = vst [vmem:[%s4564_s8 + $0x7d] sm:$0x1] %v2151_v51  ;;  %v1898_v24 = vpop.f32.mrf.mxu0 }
 0x667   :  { %2212 = vst [vmem:[%s4564_s8 + $0x6] sm:$0x1] %v1897_v44  ;;  %v1899_v28 = vadd.f32 %v4136_v63, %v1898_v24 }
 0x668   :  { %2213 = vst [vmem:[%s4564_s8 + $0xe] sm:$0x1] %v2184_v1 }
 0x669   :  { %2214 = vst [vmem:[%s4564_s8 + $0x16] sm:$0x1] %v2185_v36  ;;  %v2191_v27 = vrot.slane %v1899_v28, 1  ;;  %v2192_v2 = vrot.slane %v1899_v28, 2  ;;  %v2193_v62 = vrot.slane %v1899_v28, 3  ;;  %v2194_v13 = vrot.slane %v1899_v28, 4 }
 0x66a   :  { %2215 = vst [vmem:[%s4564_s8 + $0x1e] sm:$0x1] %v2186_v53  ;;  %v2195_v46 = vrot.slane %v1899_v28, 5  ;;  %v2196_v30 = vrot.slane %v1899_v28, 6  ;;  %v2197_v0 = vrot.slane %v1899_v28, 7 }
 0x66b   :  { %2216 = vst [vmem:[%s4564_s8 + $0x26] sm:$0x1] %v2187_v48 }
 0x66c   :  { %2217 = vst [vmem:[%s4564_s8 + $0x2e] sm:$0x1] %v2188_v12 }
 0x66d   :  { %2218 = vst [vmem:[%s4564_s8 + $0x36] sm:$0x1] %v2189_v54 }
 0x66e   :  { %2219 = vst [vmem:[%s4564_s8 + $0x3e] sm:$0x1] %v2190_v31 }
 0x66f   :  { %2220 = vst [vmem:[%s4564_s8 + $0x46] sm:$0x1] %v1899_v28 }
 0x670   :  { %2221 = vst [vmem:[%s4564_s8 + $0x4e] sm:$0x1] %v2191_v27 }
 0x671   :  { %2222 = vst [vmem:[%s4564_s8 + $0x56] sm:$0x1] %v2192_v2 }
 0x672   :  { %2223 = vst [vmem:[%s4564_s8 + $0x5e] sm:$0x1] %v2193_v62 }
 0x673   :  { %2224 = vst [vmem:[%s4564_s8 + $0x66] sm:$0x1] %v2194_v13 }
 0x674   :  { %2225 = vst [vmem:[%s4564_s8 + $0x6e] sm:$0x1] %v2195_v46 }
 0x675   :  { %2226 = vst [vmem:[%s4564_s8 + $0x76] sm:$0x1] %v2196_v30 }
 0x676   :  { %2227 = vst [vmem:[%s4564_s8 + $0x7e] sm:$0x1] %v2197_v0 }
 0x69b   :  { %v1901_v8 = vpop.f32.mrf.mxu0 }
 0x69c   :  { %v1902_v47 = vadd.f32 %v4136_v63, %v1901_v8 }
 0x69e   :  { %v2230_v42 = vrot.slane %v1902_v47, 1  ;;  %v2231_v37 = vrot.slane %v1902_v47, 2  ;;  %v2232_v16 = vrot.slane %v1902_v47, 3  ;;  %2258 = vst [vmem:[%s4564_s8 + $0x7] sm:$0x1] %v1902_v47  ;;  %v2233_v10 = vrot.slane %v1902_v47, 4 }
 0x69f   :  { %v2234_v6 = vrot.slane %v1902_v47, 5  ;;  %v2235_v11 = vrot.slane %v1902_v47, 6  ;;  %v2236_v17 = vrot.slane %v1902_v47, 7 }
 0x6a0   :  { %2259 = vst [vmem:[%s4564_s8 + $0xf] sm:$0x1] %v2230_v42 }
 0x6a1   :  { %2260 = vst [vmem:[%s4564_s8 + $0x17] sm:$0x1] %v2231_v37 }
 0x6a2   :  { %2261 = vst [vmem:[%s4564_s8 + $0x1f] sm:$0x1] %v2232_v16 }
 0x6a3   :  { %2262 = vst [vmem:[%s4564_s8 + $0x27] sm:$0x1] %v2233_v10  ;;  %v1903_v23 = vpop.f32.mrf.mxu0 }
 0x6a4   :  { %2263 = vst [vmem:[%s4564_s8 + $0x2f] sm:$0x1] %v2234_v6  ;;  %v1904_v29 = vadd.f32 %v4136_v63, %v1903_v23 }
 0x6a5   :  { %2264 = vst [vmem:[%s4564_s8 + $0x37] sm:$0x1] %v2235_v11 }
 0x6a6   :  { %2265 = vst [vmem:[%s4564_s8 + $0x3f] sm:$0x1] %v2236_v17  ;;  %v2237_v35 = vrot.slane %v1904_v29, 1  ;;  %v2238_v41 = vrot.slane %v1904_v29, 2  ;;  %v2239_v19 = vrot.slane %v1904_v29, 3  ;;  %v2240_v20 = vrot.slane %v1904_v29, 4 }
 0x6a7   :  { %2266 = vst [vmem:[%s4564_s8 + $0x47] sm:$0x1] %v1904_v29  ;;  %v2241_v25 = vrot.slane %v1904_v29, 5  ;;  %v2242_v63 = vrot.slane %v1904_v29, 6  ;;  %v2243_v32 = vrot.slane %v1904_v29, 7 }
 0x6a8   :  { %2267 = vst [vmem:[%s4564_s8 + $0x4f] sm:$0x1] %v2237_v35 }
 0x6a9   :  { %2268 = vst [vmem:[%s4564_s8 + $0x57] sm:$0x1] %v2238_v41 }
 0x6aa   :  { %2269 = vst [vmem:[%s4564_s8 + $0x5f] sm:$0x1] %v2239_v19 }
 0x6ab   :  { %2270 = vst [vmem:[%s4564_s8 + $0x67] sm:$0x1] %v2240_v20 }
 0x6ac   :  { %2271 = vst [vmem:[%s4564_s8 + $0x6f] sm:$0x1] %v2241_v25 }
 0x6ad   :  { %2272 = vst [vmem:[%s4564_s8 + $0x77] sm:$0x1] %v2242_v63 }
 0x6ae   :  { %2273 = vst [vmem:[%s4564_s8 + $0x7f] sm:$0x1] %v2243_v32 }

</bundles_post_ra>
